<compile_context>
chip_gen: v7x
topology: tpu7x:2x2x1
jax: 0.10.0
libtpu: 0.0.40
codegen_flags: <defaults>
</compile_context>

<pallas_src>
import functools

import jax
import jax.numpy as jnp
from jax import lax
from jax.experimental import pallas as pl
from jax.experimental.pallas import tpu as pltpu


# ---------------------------------------------------------------------------
# Pallas kernels
# ---------------------------------------------------------------------------
def _conv3x3_kernel(*refs, wp, lp, halo, relu, has_res):
    """3x3 SAME conv (+bias [+relu] [+residual]) on a flat-padded block.

    Refs: x (1,Cin,Lp), w (9,Cout,Cin), b (Cout,1), mask (1,Lp), [res (1,Cout,Lp)],
          out (1,Cout,Lp), scratch xext (Cin, Lp + 2*halo).
    """
    if has_res:
        x_ref, w_ref, b_ref, m_ref, res_ref, o_ref, xext_ref = refs
    else:
        x_ref, w_ref, b_ref, m_ref, o_ref, xext_ref = refs
        res_ref = None

    cin = x_ref.shape[1]
    cout = w_ref.shape[1]

    # Zero the haloed scratch, then place the ring-masked input in its middle.
    # The flat-offset gather below is exact for interior pixels because the
    # zero ring (SAME padding) absorbs any row wrap-around contribution.
    mask = m_ref[...]                                            # (1, lp)
    xext_ref[...] = jnp.zeros((cin, lp + 2 * halo), jnp.float32)
    xext_ref[:, pl.ds(halo, lp)] = x_ref[0] * mask               # (cin, lp)

    acc = jnp.zeros((cout, lp), jnp.float32)
    for dh in range(3):
        for dw in range(3):
            off = halo + (dh - 1) * wp + (dw - 1)                # static offset
            xs = xext_ref[:, pl.ds(off, lp)]                     # (cin, lp)
            acc = acc + jnp.dot(w_ref[3 * dh + dw], xs,
                                preferred_element_type=jnp.float32)

    acc = acc + b_ref[...]                                       # (cout,1) bcast
    if relu:
        acc = jnp.maximum(acc, 0.0)
    if has_res:
        acc = acc + res_ref[0]
    o_ref[0] = acc


def _ca_apply_kernel(y_ref, t2_ref, m_ref, w1_ref, b1_ref, w2_ref, b2_ref,
                     o_ref, *, inv_hw):
    """Channel attention (pool + MLP + sigmoid gate) fused with residual add.

    y,t2,out: (1,C,Lp); mask (1,Lp); w1t,w2: (C,Cr); b1 (1,Cr); b2 (C,1).
    Computes:  out = y + t2 * sigmoid(W2 @ relu(W1 @ mean_hw(t2) + b1) + b2)
    """
    t2 = t2_ref[0]                                               # (C, Lp)
    mask = m_ref[...]                                            # (1, Lp)

    # masked global average pool == AdaptiveAvgPool2d(1) (pad ring excluded)
    pool = jnp.sum(t2 * mask, axis=1, keepdims=True) * inv_hw    # (C, 1)

    # squeeze-excite MLP without transposes:
    #   z[1,j] = relu( sum_c W1[j,c]*pool[c] + b1[j] )   (sublane reduction)
    #   a[c,1] = sigmoid( sum_j W2[c,j]*z[j]   + b2[c] ) (lane   reduction)
    z = jnp.maximum(
        jnp.sum(w1_ref[...] * pool, axis=0, keepdims=True) + b1_ref[...], 0.0)
    pre = jnp.sum(w2_ref[...] * z, axis=1, keepdims=True) + b2_ref[...]
    a = 1.0 / (1.0 + jnp.exp(-pre))                              # (C, 1)

    o_ref[0] = y_ref[0] + t2 * a


# ---------------------------------------------------------------------------
# Pallas wrappers
# ---------------------------------------------------------------------------
def _conv3x3_flat(xf, w, b, mask, H, W, *, relu=False, residual=None):
    """xf: (N, Cin, Lp) flat-padded maps; w: (Cout, Cin, 3, 3); b: (Cout,)."""
    N, Cin, Lp = xf.shape
    Cout = w.shape[0]
    Wp = W + 2
    halo = Wp + 1
    Lext = Lp + 2 * halo

    wT = jnp.transpose(w, (2, 3, 0, 1)).reshape(9, Cout, Cin)    # tap-major
    bcol = b.reshape(Cout, 1)
    has_res = residual is not None

    kernel = functools.partial(_conv3x3_kernel, wp=Wp, lp=Lp, halo=halo,
                               relu=relu, has_res=has_res)

    in_specs = [
        pl.BlockSpec((1, Cin, Lp), lambda n: (n, 0, 0)),         # x
        pl.BlockSpec((9, Cout, Cin), lambda n: (0, 0, 0)),       # weights
        pl.BlockSpec((Cout, 1), lambda n: (0, 0)),               # bias
        pl.BlockSpec((1, Lp), lambda n: (0, 0)),                 # interior mask
    ]
    args = [xf, wT, bcol, mask]
    if has_res:
        in_specs.append(pl.BlockSpec((1, Cout, Lp), lambda n: (n, 0, 0)))
        args.append(residual)

    return pl.pallas_call(
        kernel,
        out_shape=jax.ShapeDtypeStruct((N, Cout, Lp), jnp.float32),
        grid=(N,),
        in_specs=in_specs,
        out_specs=pl.BlockSpec((1, Cout, Lp), lambda n: (n, 0, 0)),
        scratch_shapes=[pltpu.VMEM((Cin, Lext), jnp.float32)],
        compiler_params=pltpu.CompilerParams(
            dimension_semantics=("parallel",)),
    )(*args)


def _ca_apply(y, t2, mask, ca_w1, ca_b1, ca_w2, ca_b2, H, W):
    """y, t2: (N, C, Lp); ca_w1: (Cr, C); ca_w2: (C, Cr)."""
    N, C, Lp = y.shape
    Cr = ca_w1.shape[0]
    w1t = ca_w1.T                                                # (C, Cr)
    b1r = ca_b1.reshape(1, Cr)
    w2m = ca_w2                                                  # (C, Cr)
    b2c = ca_b2.reshape(C, 1)

    kernel = functools.partial(_ca_apply_kernel, inv_hw=1.0 / float(H * W))

    return pl.pallas_call(
        kernel,
        out_shape=jax.ShapeDtypeStruct((N, C, Lp), jnp.float32),
        grid=(N,),
        in_specs=[
            pl.BlockSpec((1, C, Lp), lambda n: (n, 0, 0)),       # y (residual)
            pl.BlockSpec((1, C, Lp), lambda n: (n, 0, 0)),       # t2
            pl.BlockSpec((1, Lp), lambda n: (0, 0)),             # mask
            pl.BlockSpec((C, Cr), lambda n: (0, 0)),             # W1^T
            pl.BlockSpec((1, Cr), lambda n: (0, 0)),             # b1
            pl.BlockSpec((C, Cr), lambda n: (0, 0)),             # W2
            pl.BlockSpec((C, 1), lambda n: (0, 0)),              # b2
        ],
        out_specs=pl.BlockSpec((1, C, Lp), lambda n: (n, 0, 0)),
        compiler_params=pltpu.CompilerParams(
            dimension_semantics=("parallel",)),
    )(y, t2, mask, w1t, b1r, w2m, b2c)


# ---------------------------------------------------------------------------
# Layout glue (pure XLA: pad / crop / reshape only)
# ---------------------------------------------------------------------------
def _to_flat(x):                       # (N,C,H,W) -> (N,C,(H+2)*(W+2))
    N, C, H, W = x.shape
    xp = jnp.pad(x, ((0, 0), (0, 0), (1, 1), (1, 1)))
    return xp.reshape(N, C, (H + 2) * (W + 2))


def _from_flat(xf, H, W):              # (N,C,Lp) -> (N,C,H,W)
    N, C, _ = xf.shape
    return xf.reshape(N, C, H + 2, W + 2)[:, :, 1:1 + H, 1:1 + W]


def _interior_mask(H, W):
    m = jnp.zeros((H + 2, W + 2), jnp.float32).at[1:1 + H, 1:1 + W].set(1.0)
    return m.reshape(1, (H + 2) * (W + 2))


def rg_forward_pallas(x_nchw, params):
    x = x_nchw.astype(jnp.float32)
    N, C, H, W = x.shape
    mask = _interior_mask(H, W)
    xf = _to_flat(x)

    y = xf
    for blk in params["rcabs"]:
        t1 = _conv3x3_flat(y, blk["w1"], blk["b1"], mask, H, W, relu=True)
        t2 = _conv3x3_flat(t1, blk["w2"], blk["b2"], mask, H, W, relu=False)
        y = _ca_apply(y, t2, mask, blk["ca_w1"], blk["ca_b1"],
                      blk["ca_w2"], blk["ca_b2"], H, W)

    out = _conv3x3_flat(y, params["w_last"], params["b_last"], mask, H, W,
                        relu=False, residual=xf)                 # RG residual
    return _from_flat(out, H, W)


# ---------------------------------------------------------------------------
# Deterministic parameter init (kaiming-normal convs, torch-like biases)
# ---------------------------------------------------------------------------
def init_rg_params(key, num_features, num_rcab, reduction):
    C = num_features
    Cr = num_features // reduction

    def conv_init(k, cout, cin, ksz):
        kw, kb = jax.random.split(k)
        fan_in = cin * ksz * ksz
        w = jax.random.normal(kw, (cout, cin, ksz, ksz), jnp.float32) \
            * jnp.sqrt(2.0 / fan_in)
        lim = 1.0 / jnp.sqrt(fan_in)
        b = jax.random.uniform(kb, (cout,), jnp.float32, -lim, lim)
        return w, b

    keys = jax.random.split(key, num_rcab + 1)
    rcabs = []
    for i in range(num_rcab):
        k1, k2, k3, k4 = jax.random.split(keys[i], 4)
        w1, b1 = conv_init(k1, C, C, 3)
        w2, b2 = conv_init(k2, C, C, 3)
        cw1, cb1 = conv_init(k3, Cr, C, 1)
        cw2, cb2 = conv_init(k4, C, Cr, 1)
        rcabs.append(dict(w1=w1, b1=b1, w2=w2, b2=b2,
                          ca_w1=cw1[:, :, 0, 0], ca_b1=cb1,
                          ca_w2=cw2[:, :, 0, 0], ca_b2=cb2))
    w_last, b_last = conv_init(keys[-1], C, C, 3)
    return dict(rcabs=rcabs, w_last=w_last, b_last=b_last)


# ---------------------------------------------------------------------------
# Pure-JAX reference (exact module semantics) for a sanity check
# ---------------------------------------------------------------------------
def _conv3x3_ref(x, w, b):
    dn = ("NCHW", "OIHW", "NCHW")
    y = lax.conv_general_dilated(x, w, window_strides=(1, 1), padding="SAME",
                                 dimension_numbers=dn)
    return y + b[None, :, None, None]


def rg_reference(x, params):
    y = x
    for blk in params["rcabs"]:
        t = jax.nn.relu(_conv3x3_ref(y, blk["w1"], blk["b1"]))
        t = _conv3x3_ref(t, blk["w2"], blk["b2"])
        p = jnp.mean(t, axis=(2, 3))                              # (N, C)
        z = jax.nn.relu(p @ blk["ca_w1"].T + blk["ca_b1"])        # (N, Cr)
        a = jax.nn.sigmoid(z @ blk["ca_w2"].T + blk["ca_b2"])     # (N, C)
        y = y + t * a[:, :, None, None]
    y = _conv3x3_ref(y, params["w_last"], params["b_last"])
    return x + y


if __name__ == "__main__":
    key = jax.random.PRNGKey(0)
    kx, kp = jax.random.split(key)

    # small shapes consistent with the module: RG(num_features=32, num_rcab=2, reduction=4)
    N, C, H, W = 2, 32, 16, 16
    num_rcab, reduction = 2, 4

    x = jax.random.normal(kx, (N, C, H, W), jnp.float32)
    params = init_rg_params(kp, C, num_rcab, reduction)

    fwd = jax.jit(rg_forward_pallas)
    out = jax.block_until_ready(fwd(x, params))

    ref = rg_reference(x, params)
    assert out.shape == ref.shape, (out.shape, ref.shape)
    assert bool(jnp.all(jnp.isfinite(out)))
    if not jnp.allclose(out, ref, rtol=5e-2, atol=5e-2):
        err = float(jnp.max(jnp.abs(out - ref)))
        raise AssertionError(f"Pallas output mismatch, max abs err = {err}")

    print("KERNEL_OK")
</pallas_src>

<mosaic_0001>
module attributes {stable_mosaic.version = 11 : i64} {
  func.func @_conv3x3_kernel(%arg0: i32, %arg1: memref<1x32x324xf32, #tpu.memory_space<vmem>>, %arg2: memref<9x32x32xf32, #tpu.memory_space<vmem>>, %arg3: memref<32x1xf32, #tpu.memory_space<vmem>>, %arg4: memref<1x324xf32, #tpu.memory_space<vmem>>, %arg5: memref<1x32x324xf32, #tpu.memory_space<vmem>>, %arg6: memref<32x362xf32, #tpu.memory_space<vmem>>) attributes {dimension_semantics = [#tpu.dimension_semantics<parallel>], iteration_bounds = array<i64: 2>, scalar_prefetch = 0 : i64, scratch_operands = 1 : i64, tpu.core_type = #tpu.core_type<tc>, window_params = [{transform_indices = @transform_0, window_bounds = array<i64: 1, 32, 324>}, {pipeline_mode = #tpu.pipeline_mode<synchronous>, transform_indices = @transform_1, window_bounds = array<i64: 9, 32, 32>}, {pipeline_mode = #tpu.pipeline_mode<synchronous>, transform_indices = @transform_2, window_bounds = array<i64: 32, 1>}, {pipeline_mode = #tpu.pipeline_mode<synchronous>, transform_indices = @transform_3, window_bounds = array<i64: 1, 324>}, {transform_indices = @transform_4, window_bounds = array<i64: 1, 32, 324>}]} {
    %c0 = arith.constant 0 : index
    %c0_0 = arith.constant 0 : index
    %0 = vector.load %arg4[%c0, %c0_0] : memref<1x324xf32, #tpu.memory_space<vmem>>, vector<1x324xf32>
    %cst = arith.constant 0.000000e+00 : f32
    %1 = vector.broadcast %cst : f32 to vector<32x362xf32>
    %c0_1 = arith.constant 0 : index
    %c0_2 = arith.constant 0 : index
    %2 = vector.load %arg6[%c0_1, %c0_2] : memref<32x362xf32, #tpu.memory_space<vmem>>, vector<32x362xf32>
    tpu.vector_store %arg6[%c0_1, %c0_2], %1 {strides = array<i32>} : memref<32x362xf32, #tpu.memory_space<vmem>>, vector<32x362xf32>,
    %c0_3 = arith.constant 0 : index
    %c0_4 = arith.constant 0 : index
    %c0_5 = arith.constant 0 : index
    %3 = vector.load %arg1[%c0_3, %c0_4, %c0_5] : memref<1x32x324xf32, #tpu.memory_space<vmem>>, vector<1x32x324xf32>
    %4 = vector.shape_cast %3 : vector<1x32x324xf32> to vector<32x324xf32>
    %5 = vector.broadcast %0 : vector<1x324xf32> to vector<32x324xf32>
    %6 = arith.mulf %4, %5 : vector<32x324xf32>
    %c0_6 = arith.constant 0 : index
    %c19 = arith.constant 19 : index
    %7 = vector.load %arg6[%c0_6, %c19] : memref<32x362xf32, #tpu.memory_space<vmem>>, vector<32x324xf32>
    tpu.vector_store %arg6[%c0_6, %c19], %6 {strides = array<i32>} : memref<32x362xf32, #tpu.memory_space<vmem>>, vector<32x324xf32>,
    %cst_7 = arith.constant 0.000000e+00 : f32
    %8 = vector.broadcast %cst_7 : f32 to vector<32x324xf32>
    %c0_8 = arith.constant 0 : index
    %c0_9 = arith.constant 0 : index
    %9 = vector.load %arg6[%c0_8, %c0_9] : memref<32x362xf32, #tpu.memory_space<vmem>>, vector<32x324xf32>
    %c0_10 = arith.constant 0 : index
    %c0_11 = arith.constant 0 : index
    %c0_12 = arith.constant 0 : index
    %10 = vector.load %arg2[%c0_10, %c0_11, %c0_12] : memref<9x32x32xf32, #tpu.memory_space<vmem>>, vector<1x32x32xf32>
    %11 = vector.shape_cast %10 : vector<1x32x32xf32> to vector<32x32xf32>
    %cst_13 = arith.constant dense<0.000000e+00> : vector<32x324xf32>
    %12 = tpu.matmul %11, %9, %cst_13 {dimension_numbers = #tpu.dot_dimension_numbers<[1], [0], [0], [1], [0, 0, 1, 1], [], []>} : vector<32x32xf32>, vector<32x324xf32>, vector<32x324xf32> -> vector<32x324xf32>
    %13 = arith.addf %8, %12 : vector<32x324xf32>
    %c0_14 = arith.constant 0 : index
    %c1 = arith.constant 1 : index
    %14 = vector.load %arg6[%c0_14, %c1] : memref<32x362xf32, #tpu.memory_space<vmem>>, vector<32x324xf32>
    %c1_15 = arith.constant 1 : index
    %c0_16 = arith.constant 0 : index
    %c0_17 = arith.constant 0 : index
    %15 = vector.load %arg2[%c1_15, %c0_16, %c0_17] : memref<9x32x32xf32, #tpu.memory_space<vmem>>, vector<1x32x32xf32>
    %16 = vector.shape_cast %15 : vector<1x32x32xf32> to vector<32x32xf32>
    %cst_18 = arith.constant dense<0.000000e+00> : vector<32x324xf32>
    %17 = tpu.matmul %16, %14, %cst_18 {dimension_numbers = #tpu.dot_dimension_numbers<[1], [0], [0], [1], [0, 0, 1, 1], [], []>} : vector<32x32xf32>, vector<32x324xf32>, vector<32x324xf32> -> vector<32x324xf32>
    %18 = arith.addf %13, %17 : vector<32x324xf32>
    %c0_19 = arith.constant 0 : index
    %c2 = arith.constant 2 : index
    %19 = vector.load %arg6[%c0_19, %c2] : memref<32x362xf32, #tpu.memory_space<vmem>>, vector<32x324xf32>
    %c2_20 = arith.constant 2 : index
    %c0_21 = arith.constant 0 : index
    %c0_22 = arith.constant 0 : index
    %20 = vector.load %arg2[%c2_20, %c0_21, %c0_22] : memref<9x32x32xf32, #tpu.memory_space<vmem>>, vector<1x32x32xf32>
    %21 = vector.shape_cast %20 : vector<1x32x32xf32> to vector<32x32xf32>
    %cst_23 = arith.constant dense<0.000000e+00> : vector<32x324xf32>
    %22 = tpu.matmul %21, %19, %cst_23 {dimension_numbers = #tpu.dot_dimension_numbers<[1], [0], [0], [1], [0, 0, 1, 1], [], []>} : vector<32x32xf32>, vector<32x324xf32>, vector<32x324xf32> -> vector<32x324xf32>
    %23 = arith.addf %18, %22 : vector<32x324xf32>
    %c0_24 = arith.constant 0 : index
    %c18 = arith.constant 18 : index
    %24 = vector.load %arg6[%c0_24, %c18] : memref<32x362xf32, #tpu.memory_space<vmem>>, vector<32x324xf32>
    %c3 = arith.constant 3 : index
    %c0_25 = arith.constant 0 : index
    %c0_26 = arith.constant 0 : index
    %25 = vector.load %arg2[%c3, %c0_25, %c0_26] : memref<9x32x32xf32, #tpu.memory_space<vmem>>, vector<1x32x32xf32>
    %26 = vector.shape_cast %25 : vector<1x32x32xf32> to vector<32x32xf32>
    %cst_27 = arith.constant dense<0.000000e+00> : vector<32x324xf32>
    %27 = tpu.matmul %26, %24, %cst_27 {dimension_numbers = #tpu.dot_dimension_numbers<[1], [0], [0], [1], [0, 0, 1, 1], [], []>} : vector<32x32xf32>, vector<32x324xf32>, vector<32x324xf32> -> vector<32x324xf32>
    %28 = arith.addf %23, %27 : vector<32x324xf32>
    %c0_28 = arith.constant 0 : index
    %c19_29 = arith.constant 19 : index
    %29 = vector.load %arg6[%c0_28, %c19_29] : memref<32x362xf32, #tpu.memory_space<vmem>>, vector<32x324xf32>
    %c4 = arith.constant 4 : index
    %c0_30 = arith.constant 0 : index
    %c0_31 = arith.constant 0 : index
    %30 = vector.load %arg2[%c4, %c0_30, %c0_31] : memref<9x32x32xf32, #tpu.memory_space<vmem>>, vector<1x32x32xf32>
    %31 = vector.shape_cast %30 : vector<1x32x32xf32> to vector<32x32xf32>
    %cst_32 = arith.constant dense<0.000000e+00> : vector<32x324xf32>
    %32 = tpu.matmul %31, %29, %cst_32 {dimension_numbers = #tpu.dot_dimension_numbers<[1], [0], [0], [1], [0, 0, 1, 1], [], []>} : vector<32x32xf32>, vector<32x324xf32>, vector<32x324xf32> -> vector<32x324xf32>
    %33 = arith.addf %28, %32 : vector<32x324xf32>
    %c0_33 = arith.constant 0 : index
    %c20 = arith.constant 20 : index
    %34 = vector.load %arg6[%c0_33, %c20] : memref<32x362xf32, #tpu.memory_space<vmem>>, vector<32x324xf32>
    %c5 = arith.constant 5 : index
    %c0_34 = arith.constant 0 : index
    %c0_35 = arith.constant 0 : index
    %35 = vector.load %arg2[%c5, %c0_34, %c0_35] : memref<9x32x32xf32, #tpu.memory_space<vmem>>, vector<1x32x32xf32>
    %36 = vector.shape_cast %35 : vector<1x32x32xf32> to vector<32x32xf32>
    %cst_36 = arith.constant dense<0.000000e+00> : vector<32x324xf32>
    %37 = tpu.matmul %36, %34, %cst_36 {dimension_numbers = #tpu.dot_dimension_numbers<[1], [0], [0], [1], [0, 0, 1, 1], [], []>} : vector<32x32xf32>, vector<32x324xf32>, vector<32x324xf32> -> vector<32x324xf32>
    %38 = arith.addf %33, %37 : vector<32x324xf32>
    %c0_37 = arith.constant 0 : index
    %c36 = arith.constant 36 : index
    %39 = vector.load %arg6[%c0_37, %c36] : memref<32x362xf32, #tpu.memory_space<vmem>>, vector<32x324xf32>
    %c6 = arith.constant 6 : index
    %c0_38 = arith.constant 0 : index
    %c0_39 = arith.constant 0 : index
    %40 = vector.load %arg2[%c6, %c0_38, %c0_39] : memref<9x32x32xf32, #tpu.memory_space<vmem>>, vector<1x32x32xf32>
    %41 = vector.shape_cast %40 : vector<1x32x32xf32> to vector<32x32xf32>
    %cst_40 = arith.constant dense<0.000000e+00> : vector<32x324xf32>
    %42 = tpu.matmul %41, %39, %cst_40 {dimension_numbers = #tpu.dot_dimension_numbers<[1], [0], [0], [1], [0, 0, 1, 1], [], []>} : vector<32x32xf32>, vector<32x324xf32>, vector<32x324xf32> -> vector<32x324xf32>
    %43 = arith.addf %38, %42 : vector<32x324xf32>
    %c0_41 = arith.constant 0 : index
    %c37 = arith.constant 37 : index
    %44 = vector.load %arg6[%c0_41, %c37] : memref<32x362xf32, #tpu.memory_space<vmem>>, vector<32x324xf32>
    %c7 = arith.constant 7 : index
    %c0_42 = arith.constant 0 : index
    %c0_43 = arith.constant 0 : index
    %45 = vector.load %arg2[%c7, %c0_42, %c0_43] : memref<9x32x32xf32, #tpu.memory_space<vmem>>, vector<1x32x32xf32>
    %46 = vector.shape_cast %45 : vector<1x32x32xf32> to vector<32x32xf32>
    %cst_44 = arith.constant dense<0.000000e+00> : vector<32x324xf32>
    %47 = tpu.matmul %46, %44, %cst_44 {dimension_numbers = #tpu.dot_dimension_numbers<[1], [0], [0], [1], [0, 0, 1, 1], [], []>} : vector<32x32xf32>, vector<32x324xf32>, vector<32x324xf32> -> vector<32x324xf32>
    %48 = arith.addf %43, %47 : vector<32x324xf32>
    %c0_45 = arith.constant 0 : index
    %c38 = arith.constant 38 : index
    %49 = vector.load %arg6[%c0_45, %c38] : memref<32x362xf32, #tpu.memory_space<vmem>>, vector<32x324xf32>
    %c8 = arith.constant 8 : index
    %c0_46 = arith.constant 0 : index
    %c0_47 = arith.constant 0 : index
    %50 = vector.load %arg2[%c8, %c0_46, %c0_47] : memref<9x32x32xf32, #tpu.memory_space<vmem>>, vector<1x32x32xf32>
    %51 = vector.shape_cast %50 : vector<1x32x32xf32> to vector<32x32xf32>
    %cst_48 = arith.constant dense<0.000000e+00> : vector<32x324xf32>
    %52 = tpu.matmul %51, %49, %cst_48 {dimension_numbers = #tpu.dot_dimension_numbers<[1], [0], [0], [1], [0, 0, 1, 1], [], []>} : vector<32x32xf32>, vector<32x324xf32>, vector<32x324xf32> -> vector<32x324xf32>
    %53 = arith.addf %48, %52 : vector<32x324xf32>
    %c0_49 = arith.constant 0 : index
    %c0_50 = arith.constant 0 : index
    %54 = vector.load %arg3[%c0_49, %c0_50] : memref<32x1xf32, #tpu.memory_space<vmem>>, vector<32x1xf32>
    %55 = vector.broadcast %54 : vector<32x1xf32> to vector<32x324xf32>
    %56 = arith.addf %53, %55 : vector<32x324xf32>
    %cst_51 = arith.constant 0.000000e+00 : f32
    %57 = vector.broadcast %cst_51 : f32 to vector<32x324xf32>
    %58 = arith.maximumf %56, %57 : vector<32x324xf32>
    %c0_52 = arith.constant 0 : index
    %c0_53 = arith.constant 0 : index
    %c0_54 = arith.constant 0 : index
    %59 = vector.load %arg5[%c0_52, %c0_53, %c0_54] : memref<1x32x324xf32, #tpu.memory_space<vmem>>, vector<1x32x324xf32>
    %60 = vector.shape_cast %59 : vector<1x32x324xf32> to vector<32x324xf32>
    %61 = vector.shape_cast %58 : vector<32x324xf32> to vector<1x32x324xf32>
    tpu.vector_store %arg5[%c0_52, %c0_53, %c0_54], %61 {strides = array<i32>} : memref<1x32x324xf32, #tpu.memory_space<vmem>>, vector<1x32x324xf32>,
    return
  }
  func.func @transform_0(%arg0: i32) -> (i32, i32, i32) {
    %c0_i32 = arith.constant 0 : i32
    %c0_i32_0 = arith.constant 0 : i32
    %c0_i32_1 = arith.constant 0 : i32
    return %arg0, %c0_i32, %c0_i32_0 : i32, i32, i32
  }
  func.func @transform_1(%arg0: i32) -> (i32, i32, i32) {
    %c0_i32 = arith.constant 0 : i32
    %c0_i32_0 = arith.constant 0 : i32
    %c0_i32_1 = arith.constant 0 : i32
    %c0_i32_2 = arith.constant 0 : i32
    return %c0_i32, %c0_i32_0, %c0_i32_1 : i32, i32, i32
  }
  func.func @transform_2(%arg0: i32) -> (i32, i32) {
    %c0_i32 = arith.constant 0 : i32
    %c0_i32_0 = arith.constant 0 : i32
    %c0_i32_1 = arith.constant 0 : i32
    return %c0_i32, %c0_i32_0 : i32, i32
  }
  func.func @transform_3(%arg0: i32) -> (i32, i32) {
    %c0_i32 = arith.constant 0 : i32
    %c0_i32_0 = arith.constant 0 : i32
    %c0_i32_1 = arith.constant 0 : i32
    return %c0_i32, %c0_i32_0 : i32, i32
  }
  func.func @transform_4(%arg0: i32) -> (i32, i32, i32) {
    %c0_i32 = arith.constant 0 : i32
    %c0_i32_0 = arith.constant 0 : i32
    %c0_i32_1 = arith.constant 0 : i32
    return %arg0, %c0_i32, %c0_i32_0 : i32, i32, i32
  }
}

module attributes {stable_mosaic.version = 11 : i64} {
  func.func @_conv3x3_kernel(%arg0: i32, %arg1: memref<1x32x324xf32, #tpu.memory_space<vmem>>, %arg2: memref<9x32x32xf32, #tpu.memory_space<vmem>>, %arg3: memref<32x1xf32, #tpu.memory_space<vmem>>, %arg4: memref<1x324xf32, #tpu.memory_space<vmem>>, %arg5: memref<1x32x324xf32, #tpu.memory_space<vmem>>, %arg6: memref<32x362xf32, #tpu.memory_space<vmem>>) attributes {dimension_semantics = [#tpu.dimension_semantics<parallel>], iteration_bounds = array<i64: 2>, scalar_prefetch = 0 : i64, scratch_operands = 1 : i64, tpu.core_type = #tpu.core_type<tc>, window_params = [{transform_indices = @transform_0, window_bounds = array<i64: 1, 32, 324>}, {pipeline_mode = #tpu.pipeline_mode<synchronous>, transform_indices = @transform_1, window_bounds = array<i64: 9, 32, 32>}, {pipeline_mode = #tpu.pipeline_mode<synchronous>, transform_indices = @transform_2, window_bounds = array<i64: 32, 1>}, {pipeline_mode = #tpu.pipeline_mode<synchronous>, transform_indices = @transform_3, window_bounds = array<i64: 1, 324>}, {transform_indices = @transform_4, window_bounds = array<i64: 1, 32, 324>}]} {
    %c0 = arith.constant 0 : index
    %c0_0 = arith.constant 0 : index
    %0 = vector.load %arg4[%c0, %c0_0] : memref<1x324xf32, #tpu.memory_space<vmem>>, vector<1x324xf32>
    %cst = arith.constant 0.000000e+00 : f32
    %1 = vector.broadcast %cst : f32 to vector<32x362xf32>
    %c0_1 = arith.constant 0 : index
    %c0_2 = arith.constant 0 : index
    %2 = vector.load %arg6[%c0_1, %c0_2] : memref<32x362xf32, #tpu.memory_space<vmem>>, vector<32x362xf32>
    tpu.vector_store %arg6[%c0_1, %c0_2], %1 {strides = array<i32>} : memref<32x362xf32, #tpu.memory_space<vmem>>, vector<32x362xf32>,
    %c0_3 = arith.constant 0 : index
    %c0_4 = arith.constant 0 : index
    %c0_5 = arith.constant 0 : index
    %3 = vector.load %arg1[%c0_3, %c0_4, %c0_5] : memref<1x32x324xf32, #tpu.memory_space<vmem>>, vector<1x32x324xf32>
    %4 = vector.shape_cast %3 : vector<1x32x324xf32> to vector<32x324xf32>
    %5 = vector.broadcast %0 : vector<1x324xf32> to vector<32x324xf32>
    %6 = arith.mulf %4, %5 : vector<32x324xf32>
    %c0_6 = arith.constant 0 : index
    %c19 = arith.constant 19 : index
    %7 = vector.load %arg6[%c0_6, %c19] : memref<32x362xf32, #tpu.memory_space<vmem>>, vector<32x324xf32>
    tpu.vector_store %arg6[%c0_6, %c19], %6 {strides = array<i32>} : memref<32x362xf32, #tpu.memory_space<vmem>>, vector<32x324xf32>,
    %cst_7 = arith.constant 0.000000e+00 : f32
    %8 = vector.broadcast %cst_7 : f32 to vector<32x324xf32>
    %c0_8 = arith.constant 0 : index
    %c0_9 = arith.constant 0 : index
    %9 = vector.load %arg6[%c0_8, %c0_9] : memref<32x362xf32, #tpu.memory_space<vmem>>, vector<32x324xf32>
    %c0_10 = arith.constant 0 : index
    %c0_11 = arith.constant 0 : index
    %c0_12 = arith.constant 0 : index
    %10 = vector.load %arg2[%c0_10, %c0_11, %c0_12] : memref<9x32x32xf32, #tpu.memory_space<vmem>>, vector<1x32x32xf32>
    %11 = vector.shape_cast %10 : vector<1x32x32xf32> to vector<32x32xf32>
    %cst_13 = arith.constant dense<0.000000e+00> : vector<32x324xf32>
    %12 = tpu.matmul %11, %9, %cst_13 {dimension_numbers = #tpu.dot_dimension_numbers<[1], [0], [0], [1], [0, 0, 1, 1], [], []>} : vector<32x32xf32>, vector<32x324xf32>, vector<32x324xf32> -> vector<32x324xf32>
    %13 = arith.addf %8, %12 : vector<32x324xf32>
    %c0_14 = arith.constant 0 : index
    %c1 = arith.constant 1 : index
    %14 = vector.load %arg6[%c0_14, %c1] : memref<32x362xf32, #tpu.memory_space<vmem>>, vector<32x324xf32>
    %c1_15 = arith.constant 1 : index
    %c0_16 = arith.constant 0 : index
    %c0_17 = arith.constant 0 : index
    %15 = vector.load %arg2[%c1_15, %c0_16, %c0_17] : memref<9x32x32xf32, #tpu.memory_space<vmem>>, vector<1x32x32xf32>
    %16 = vector.shape_cast %15 : vector<1x32x32xf32> to vector<32x32xf32>
    %cst_18 = arith.constant dense<0.000000e+00> : vector<32x324xf32>
    %17 = tpu.matmul %16, %14, %cst_18 {dimension_numbers = #tpu.dot_dimension_numbers<[1], [0], [0], [1], [0, 0, 1, 1], [], []>} : vector<32x32xf32>, vector<32x324xf32>, vector<32x324xf32> -> vector<32x324xf32>
    %18 = arith.addf %13, %17 : vector<32x324xf32>
    %c0_19 = arith.constant 0 : index
    %c2 = arith.constant 2 : index
    %19 = vector.load %arg6[%c0_19, %c2] : memref<32x362xf32, #tpu.memory_space<vmem>>, vector<32x324xf32>
    %c2_20 = arith.constant 2 : index
    %c0_21 = arith.constant 0 : index
    %c0_22 = arith.constant 0 : index
    %20 = vector.load %arg2[%c2_20, %c0_21, %c0_22] : memref<9x32x32xf32, #tpu.memory_space<vmem>>, vector<1x32x32xf32>
    %21 = vector.shape_cast %20 : vector<1x32x32xf32> to vector<32x32xf32>
    %cst_23 = arith.constant dense<0.000000e+00> : vector<32x324xf32>
    %22 = tpu.matmul %21, %19, %cst_23 {dimension_numbers = #tpu.dot_dimension_numbers<[1], [0], [0], [1], [0, 0, 1, 1], [], []>} : vector<32x32xf32>, vector<32x324xf32>, vector<32x324xf32> -> vector<32x324xf32>
    %23 = arith.addf %18, %22 : vector<32x324xf32>
    %c0_24 = arith.constant 0 : index
    %c18 = arith.constant 18 : index
    %24 = vector.load %arg6[%c0_24, %c18] : memref<32x362xf32, #tpu.memory_space<vmem>>, vector<32x324xf32>
    %c3 = arith.constant 3 : index
    %c0_25 = arith.constant 0 : index
    %c0_26 = arith.constant 0 : index
    %25 = vector.load %arg2[%c3, %c0_25, %c0_26] : memref<9x32x32xf32, #tpu.memory_space<vmem>>, vector<1x32x32xf32>
    %26 = vector.shape_cast %25 : vector<1x32x32xf32> to vector<32x32xf32>
    %cst_27 = arith.constant dense<0.000000e+00> : vector<32x324xf32>
    %27 = tpu.matmul %26, %24, %cst_27 {dimension_numbers = #tpu.dot_dimension_numbers<[1], [0], [0], [1], [0, 0, 1, 1], [], []>} : vector<32x32xf32>, vector<32x324xf32>, vector<32x324xf32> -> vector<32x324xf32>
    %28 = arith.addf %23, %27 : vector<32x324xf32>
    %c0_28 = arith.constant 0 : index
    %c19_29 = arith.constant 19 : index
    %29 = vector.load %arg6[%c0_28, %c19_29] : memref<32x362xf32, #tpu.memory_space<vmem>>, vector<32x324xf32>
    %c4 = arith.constant 4 : index
    %c0_30 = arith.constant 0 : index
    %c0_31 = arith.constant 0 : index
    %30 = vector.load %arg2[%c4, %c0_30, %c0_31] : memref<9x32x32xf32, #tpu.memory_space<vmem>>, vector<1x32x32xf32>
    %31 = vector.shape_cast %30 : vector<1x32x32xf32> to vector<32x32xf32>
    %cst_32 = arith.constant dense<0.000000e+00> : vector<32x324xf32>
    %32 = tpu.matmul %31, %29, %cst_32 {dimension_numbers = #tpu.dot_dimension_numbers<[1], [0], [0], [1], [0, 0, 1, 1], [], []>} : vector<32x32xf32>, vector<32x324xf32>, vector<32x324xf32> -> vector<32x324xf32>
    %33 = arith.addf %28, %32 : vector<32x324xf32>
    %c0_33 = arith.constant 0 : index
    %c20 = arith.constant 20 : index
    %34 = vector.load %arg6[%c0_33, %c20] : memref<32x362xf32, #tpu.memory_space<vmem>>, vector<32x324xf32>
    %c5 = arith.constant 5 : index
    %c0_34 = arith.constant 0 : index
    %c0_35 = arith.constant 0 : index
    %35 = vector.load %arg2[%c5, %c0_34, %c0_35] : memref<9x32x32xf32, #tpu.memory_space<vmem>>, vector<1x32x32xf32>
    %36 = vector.shape_cast %35 : vector<1x32x32xf32> to vector<32x32xf32>
    %cst_36 = arith.constant dense<0.000000e+00> : vector<32x324xf32>
    %37 = tpu.matmul %36, %34, %cst_36 {dimension_numbers = #tpu.dot_dimension_numbers<[1], [0], [0], [1], [0, 0, 1, 1], [], []>} : vector<32x32xf32>, vector<32x324xf32>, vector<32x324xf32> -> vector<32x324xf32>
    %38 = arith.addf %33, %37 : vector<32x324xf32>
    %c0_37 = arith.constant 0 : index
    %c36 = arith.constant 36 : index
    %39 = vector.load %arg6[%c0_37, %c36] : memref<32x362xf32, #tpu.memory_space<vmem>>, vector<32x324xf32>
    %c6 = arith.constant 6 : index
    %c0_38 = arith.constant 0 : index
    %c0_39 = arith.constant 0 : index
    %40 = vector.load %arg2[%c6, %c0_38, %c0_39] : memref<9x32x32xf32, #tpu.memory_space<vmem>>, vector<1x32x32xf32>
    %41 = vector.shape_cast %40 : vector<1x32x32xf32> to vector<32x32xf32>
    %cst_40 = arith.constant dense<0.000000e+00> : vector<32x324xf32>
    %42 = tpu.matmul %41, %39, %cst_40 {dimension_numbers = #tpu.dot_dimension_numbers<[1], [0], [0], [1], [0, 0, 1, 1], [], []>} : vector<32x32xf32>, vector<32x324xf32>, vector<32x324xf32> -> vector<32x324xf32>
    %43 = arith.addf %38, %42 : vector<32x324xf32>
    %c0_41 = arith.constant 0 : index
    %c37 = arith.constant 37 : index
    %44 = vector.load %arg6[%c0_41, %c37] : memref<32x362xf32, #tpu.memory_space<vmem>>, vector<32x324xf32>
    %c7 = arith.constant 7 : index
    %c0_42 = arith.constant 0 : index
    %c0_43 = arith.constant 0 : index
    %45 = vector.load %arg2[%c7, %c0_42, %c0_43] : memref<9x32x32xf32, #tpu.memory_space<vmem>>, vector<1x32x32xf32>
    %46 = vector.shape_cast %45 : vector<1x32x32xf32> to vector<32x32xf32>
    %cst_44 = arith.constant dense<0.000000e+00> : vector<32x324xf32>
    %47 = tpu.matmul %46, %44, %cst_44 {dimension_numbers = #tpu.dot_dimension_numbers<[1], [0], [0], [1], [0, 0, 1, 1], [], []>} : vector<32x32xf32>, vector<32x324xf32>, vector<32x324xf32> -> vector<32x324xf32>
    %48 = arith.addf %43, %47 : vector<32x324xf32>
    %c0_45 = arith.constant 0 : index
    %c38 = arith.constant 38 : index
    %49 = vector.load %arg6[%c0_45, %c38] : memref<32x362xf32, #tpu.memory_space<vmem>>, vector<32x324xf32>
    %c8 = arith.constant 8 : index
    %c0_46 = arith.constant 0 : index
    %c0_47 = arith.constant 0 : index
    %50 = vector.load %arg2[%c8, %c0_46, %c0_47] : memref<9x32x32xf32, #tpu.memory_space<vmem>>, vector<1x32x32xf32>
    %51 = vector.shape_cast %50 : vector<1x32x32xf32> to vector<32x32xf32>
    %cst_48 = arith.constant dense<0.000000e+00> : vector<32x324xf32>
    %52 = tpu.matmul %51, %49, %cst_48 {dimension_numbers = #tpu.dot_dimension_numbers<[1], [0], [0], [1], [0, 0, 1, 1], [], []>} : vector<32x32xf32>, vector<32x324xf32>, vector<32x324xf32> -> vector<32x324xf32>
    %53 = arith.addf %48, %52 : vector<32x324xf32>
    %c0_49 = arith.constant 0 : index
    %c0_50 = arith.constant 0 : index
    %54 = vector.load %arg3[%c0_49, %c0_50] : memref<32x1xf32, #tpu.memory_space<vmem>>, vector<32x1xf32>
    %55 = vector.broadcast %54 : vector<32x1xf32> to vector<32x324xf32>
    %56 = arith.addf %53, %55 : vector<32x324xf32>
    %c0_51 = arith.constant 0 : index
    %c0_52 = arith.constant 0 : index
    %c0_53 = arith.constant 0 : index
    %57 = vector.load %arg5[%c0_51, %c0_52, %c0_53] : memref<1x32x324xf32, #tpu.memory_space<vmem>>, vector<1x32x324xf32>
    %58 = vector.shape_cast %57 : vector<1x32x324xf32> to vector<32x324xf32>
    %59 = vector.shape_cast %56 : vector<32x324xf32> to vector<1x32x324xf32>
    tpu.vector_store %arg5[%c0_51, %c0_52, %c0_53], %59 {strides = array<i32>} : memref<1x32x324xf32, #tpu.memory_space<vmem>>, vector<1x32x324xf32>,
    return
  }
  func.func @transform_0(%arg0: i32) -> (i32, i32, i32) {
    %c0_i32 = arith.constant 0 : i32
    %c0_i32_0 = arith.constant 0 : i32
    %c0_i32_1 = arith.constant 0 : i32
    return %arg0, %c0_i32, %c0_i32_0 : i32, i32, i32
  }
  func.func @transform_1(%arg0: i32) -> (i32, i32, i32) {
    %c0_i32 = arith.constant 0 : i32
    %c0_i32_0 = arith.constant 0 : i32
    %c0_i32_1 = arith.constant 0 : i32
    %c0_i32_2 = arith.constant 0 : i32
    return %c0_i32, %c0_i32_0, %c0_i32_1 : i32, i32, i32
  }
  func.func @transform_2(%arg0: i32) -> (i32, i32) {
    %c0_i32 = arith.constant 0 : i32
    %c0_i32_0 = arith.constant 0 : i32
    %c0_i32_1 = arith.constant 0 : i32
    return %c0_i32, %c0_i32_0 : i32, i32
  }
  func.func @transform_3(%arg0: i32) -> (i32, i32) {
    %c0_i32 = arith.constant 0 : i32
    %c0_i32_0 = arith.constant 0 : i32
    %c0_i32_1 = arith.constant 0 : i32
    return %c0_i32, %c0_i32_0 : i32, i32
  }
  func.func @transform_4(%arg0: i32) -> (i32, i32, i32) {
    %c0_i32 = arith.constant 0 : i32
    %c0_i32_0 = arith.constant 0 : i32
    %c0_i32_1 = arith.constant 0 : i32
    return %arg0, %c0_i32, %c0_i32_0 : i32, i32, i32
  }
}

module attributes {stable_mosaic.version = 11 : i64} {
  func.func @_conv3x3_kernel(%arg0: i32, %arg1: memref<1x32x324xf32, #tpu.memory_space<vmem>>, %arg2: memref<9x32x32xf32, #tpu.memory_space<vmem>>, %arg3: memref<32x1xf32, #tpu.memory_space<vmem>>, %arg4: memref<1x324xf32, #tpu.memory_space<vmem>>, %arg5: memref<1x32x324xf32, #tpu.memory_space<vmem>>, %arg6: memref<1x32x324xf32, #tpu.memory_space<vmem>>, %arg7: memref<32x362xf32, #tpu.memory_space<vmem>>) attributes {dimension_semantics = [#tpu.dimension_semantics<parallel>], iteration_bounds = array<i64: 2>, scalar_prefetch = 0 : i64, scratch_operands = 1 : i64, tpu.core_type = #tpu.core_type<tc>, window_params = [{transform_indices = @transform_0, window_bounds = array<i64: 1, 32, 324>}, {pipeline_mode = #tpu.pipeline_mode<synchronous>, transform_indices = @transform_1, window_bounds = array<i64: 9, 32, 32>}, {pipeline_mode = #tpu.pipeline_mode<synchronous>, transform_indices = @transform_2, window_bounds = array<i64: 32, 1>}, {pipeline_mode = #tpu.pipeline_mode<synchronous>, transform_indices = @transform_3, window_bounds = array<i64: 1, 324>}, {transform_indices = @transform_4, window_bounds = array<i64: 1, 32, 324>}, {transform_indices = @transform_5, window_bounds = array<i64: 1, 32, 324>}]} {
    %c0 = arith.constant 0 : index
    %c0_0 = arith.constant 0 : index
    %0 = vector.load %arg4[%c0, %c0_0] : memref<1x324xf32, #tpu.memory_space<vmem>>, vector<1x324xf32>
    %cst = arith.constant 0.000000e+00 : f32
    %1 = vector.broadcast %cst : f32 to vector<32x362xf32>
    %c0_1 = arith.constant 0 : index
    %c0_2 = arith.constant 0 : index
    %2 = vector.load %arg7[%c0_1, %c0_2] : memref<32x362xf32, #tpu.memory_space<vmem>>, vector<32x362xf32>
    tpu.vector_store %arg7[%c0_1, %c0_2], %1 {strides = array<i32>} : memref<32x362xf32, #tpu.memory_space<vmem>>, vector<32x362xf32>,
    %c0_3 = arith.constant 0 : index
    %c0_4 = arith.constant 0 : index
    %c0_5 = arith.constant 0 : index
    %3 = vector.load %arg1[%c0_3, %c0_4, %c0_5] : memref<1x32x324xf32, #tpu.memory_space<vmem>>, vector<1x32x324xf32>
    %4 = vector.shape_cast %3 : vector<1x32x324xf32> to vector<32x324xf32>
    %5 = vector.broadcast %0 : vector<1x324xf32> to vector<32x324xf32>
    %6 = arith.mulf %4, %5 : vector<32x324xf32>
    %c0_6 = arith.constant 0 : index
    %c19 = arith.constant 19 : index
    %7 = vector.load %arg7[%c0_6, %c19] : memref<32x362xf32, #tpu.memory_space<vmem>>, vector<32x324xf32>
    tpu.vector_store %arg7[%c0_6, %c19], %6 {strides = array<i32>} : memref<32x362xf32, #tpu.memory_space<vmem>>, vector<32x324xf32>,
    %cst_7 = arith.constant 0.000000e+00 : f32
    %8 = vector.broadcast %cst_7 : f32 to vector<32x324xf32>
    %c0_8 = arith.constant 0 : index
    %c0_9 = arith.constant 0 : index
    %9 = vector.load %arg7[%c0_8, %c0_9] : memref<32x362xf32, #tpu.memory_space<vmem>>, vector<32x324xf32>
    %c0_10 = arith.constant 0 : index
    %c0_11 = arith.constant 0 : index
    %c0_12 = arith.constant 0 : index
    %10 = vector.load %arg2[%c0_10, %c0_11, %c0_12] : memref<9x32x32xf32, #tpu.memory_space<vmem>>, vector<1x32x32xf32>
    %11 = vector.shape_cast %10 : vector<1x32x32xf32> to vector<32x32xf32>
    %cst_13 = arith.constant dense<0.000000e+00> : vector<32x324xf32>
    %12 = tpu.matmul %11, %9, %cst_13 {dimension_numbers = #tpu.dot_dimension_numbers<[1], [0], [0], [1], [0, 0, 1, 1], [], []>} : vector<32x32xf32>, vector<32x324xf32>, vector<32x324xf32> -> vector<32x324xf32>
    %13 = arith.addf %8, %12 : vector<32x324xf32>
    %c0_14 = arith.constant 0 : index
    %c1 = arith.constant 1 : index
    %14 = vector.load %arg7[%c0_14, %c1] : memref<32x362xf32, #tpu.memory_space<vmem>>, vector<32x324xf32>
    %c1_15 = arith.constant 1 : index
    %c0_16 = arith.constant 0 : index
    %c0_17 = arith.constant 0 : index
    %15 = vector.load %arg2[%c1_15, %c0_16, %c0_17] : memref<9x32x32xf32, #tpu.memory_space<vmem>>, vector<1x32x32xf32>
    %16 = vector.shape_cast %15 : vector<1x32x32xf32> to vector<32x32xf32>
    %cst_18 = arith.constant dense<0.000000e+00> : vector<32x324xf32>
    %17 = tpu.matmul %16, %14, %cst_18 {dimension_numbers = #tpu.dot_dimension_numbers<[1], [0], [0], [1], [0, 0, 1, 1], [], []>} : vector<32x32xf32>, vector<32x324xf32>, vector<32x324xf32> -> vector<32x324xf32>
    %18 = arith.addf %13, %17 : vector<32x324xf32>
    %c0_19 = arith.constant 0 : index
    %c2 = arith.constant 2 : index
    %19 = vector.load %arg7[%c0_19, %c2] : memref<32x362xf32, #tpu.memory_space<vmem>>, vector<32x324xf32>
    %c2_20 = arith.constant 2 : index
    %c0_21 = arith.constant 0 : index
    %c0_22 = arith.constant 0 : index
    %20 = vector.load %arg2[%c2_20, %c0_21, %c0_22] : memref<9x32x32xf32, #tpu.memory_space<vmem>>, vector<1x32x32xf32>
    %21 = vector.shape_cast %20 : vector<1x32x32xf32> to vector<32x32xf32>
    %cst_23 = arith.constant dense<0.000000e+00> : vector<32x324xf32>
    %22 = tpu.matmul %21, %19, %cst_23 {dimension_numbers = #tpu.dot_dimension_numbers<[1], [0], [0], [1], [0, 0, 1, 1], [], []>} : vector<32x32xf32>, vector<32x324xf32>, vector<32x324xf32> -> vector<32x324xf32>
    %23 = arith.addf %18, %22 : vector<32x324xf32>
    %c0_24 = arith.constant 0 : index
    %c18 = arith.constant 18 : index
    %24 = vector.load %arg7[%c0_24, %c18] : memref<32x362xf32, #tpu.memory_space<vmem>>, vector<32x324xf32>
    %c3 = arith.constant 3 : index
    %c0_25 = arith.constant 0 : index
    %c0_26 = arith.constant 0 : index
    %25 = vector.load %arg2[%c3, %c0_25, %c0_26] : memref<9x32x32xf32, #tpu.memory_space<vmem>>, vector<1x32x32xf32>
    %26 = vector.shape_cast %25 : vector<1x32x32xf32> to vector<32x32xf32>
    %cst_27 = arith.constant dense<0.000000e+00> : vector<32x324xf32>
    %27 = tpu.matmul %26, %24, %cst_27 {dimension_numbers = #tpu.dot_dimension_numbers<[1], [0], [0], [1], [0, 0, 1, 1], [], []>} : vector<32x32xf32>, vector<32x324xf32>, vector<32x324xf32> -> vector<32x324xf32>
    %28 = arith.addf %23, %27 : vector<32x324xf32>
    %c0_28 = arith.constant 0 : index
    %c19_29 = arith.constant 19 : index
    %29 = vector.load %arg7[%c0_28, %c19_29] : memref<32x362xf32, #tpu.memory_space<vmem>>, vector<32x324xf32>
    %c4 = arith.constant 4 : index
    %c0_30 = arith.constant 0 : index
    %c0_31 = arith.constant 0 : index
    %30 = vector.load %arg2[%c4, %c0_30, %c0_31] : memref<9x32x32xf32, #tpu.memory_space<vmem>>, vector<1x32x32xf32>
    %31 = vector.shape_cast %30 : vector<1x32x32xf32> to vector<32x32xf32>
    %cst_32 = arith.constant dense<0.000000e+00> : vector<32x324xf32>
    %32 = tpu.matmul %31, %29, %cst_32 {dimension_numbers = #tpu.dot_dimension_numbers<[1], [0], [0], [1], [0, 0, 1, 1], [], []>} : vector<32x32xf32>, vector<32x324xf32>, vector<32x324xf32> -> vector<32x324xf32>
    %33 = arith.addf %28, %32 : vector<32x324xf32>
    %c0_33 = arith.constant 0 : index
    %c20 = arith.constant 20 : index
    %34 = vector.load %arg7[%c0_33, %c20] : memref<32x362xf32, #tpu.memory_space<vmem>>, vector<32x324xf32>
    %c5 = arith.constant 5 : index
    %c0_34 = arith.constant 0 : index
    %c0_35 = arith.constant 0 : index
    %35 = vector.load %arg2[%c5, %c0_34, %c0_35] : memref<9x32x32xf32, #tpu.memory_space<vmem>>, vector<1x32x32xf32>
    %36 = vector.shape_cast %35 : vector<1x32x32xf32> to vector<32x32xf32>
    %cst_36 = arith.constant dense<0.000000e+00> : vector<32x324xf32>
    %37 = tpu.matmul %36, %34, %cst_36 {dimension_numbers = #tpu.dot_dimension_numbers<[1], [0], [0], [1], [0, 0, 1, 1], [], []>} : vector<32x32xf32>, vector<32x324xf32>, vector<32x324xf32> -> vector<32x324xf32>
    %38 = arith.addf %33, %37 : vector<32x324xf32>
    %c0_37 = arith.constant 0 : index
    %c36 = arith.constant 36 : index
    %39 = vector.load %arg7[%c0_37, %c36] : memref<32x362xf32, #tpu.memory_space<vmem>>, vector<32x324xf32>
    %c6 = arith.constant 6 : index
    %c0_38 = arith.constant 0 : index
    %c0_39 = arith.constant 0 : index
    %40 = vector.load %arg2[%c6, %c0_38, %c0_39] : memref<9x32x32xf32, #tpu.memory_space<vmem>>, vector<1x32x32xf32>
    %41 = vector.shape_cast %40 : vector<1x32x32xf32> to vector<32x32xf32>
    %cst_40 = arith.constant dense<0.000000e+00> : vector<32x324xf32>
    %42 = tpu.matmul %41, %39, %cst_40 {dimension_numbers = #tpu.dot_dimension_numbers<[1], [0], [0], [1], [0, 0, 1, 1], [], []>} : vector<32x32xf32>, vector<32x324xf32>, vector<32x324xf32> -> vector<32x324xf32>
    %43 = arith.addf %38, %42 : vector<32x324xf32>
    %c0_41 = arith.constant 0 : index
    %c37 = arith.constant 37 : index
    %44 = vector.load %arg7[%c0_41, %c37] : memref<32x362xf32, #tpu.memory_space<vmem>>, vector<32x324xf32>
    %c7 = arith.constant 7 : index
    %c0_42 = arith.constant 0 : index
    %c0_43 = arith.constant 0 : index
    %45 = vector.load %arg2[%c7, %c0_42, %c0_43] : memref<9x32x32xf32, #tpu.memory_space<vmem>>, vector<1x32x32xf32>
    %46 = vector.shape_cast %45 : vector<1x32x32xf32> to vector<32x32xf32>
    %cst_44 = arith.constant dense<0.000000e+00> : vector<32x324xf32>
    %47 = tpu.matmul %46, %44, %cst_44 {dimension_numbers = #tpu.dot_dimension_numbers<[1], [0], [0], [1], [0, 0, 1, 1], [], []>} : vector<32x32xf32>, vector<32x324xf32>, vector<32x324xf32> -> vector<32x324xf32>
    %48 = arith.addf %43, %47 : vector<32x324xf32>
    %c0_45 = arith.constant 0 : index
    %c38 = arith.constant 38 : index
    %49 = vector.load %arg7[%c0_45, %c38] : memref<32x362xf32, #tpu.memory_space<vmem>>, vector<32x324xf32>
    %c8 = arith.constant 8 : index
    %c0_46 = arith.constant 0 : index
    %c0_47 = arith.constant 0 : index
    %50 = vector.load %arg2[%c8, %c0_46, %c0_47] : memref<9x32x32xf32, #tpu.memory_space<vmem>>, vector<1x32x32xf32>
    %51 = vector.shape_cast %50 : vector<1x32x32xf32> to vector<32x32xf32>
    %cst_48 = arith.constant dense<0.000000e+00> : vector<32x324xf32>
    %52 = tpu.matmul %51, %49, %cst_48 {dimension_numbers = #tpu.dot_dimension_numbers<[1], [0], [0], [1], [0, 0, 1, 1], [], []>} : vector<32x32xf32>, vector<32x324xf32>, vector<32x324xf32> -> vector<32x324xf32>
    %53 = arith.addf %48, %52 : vector<32x324xf32>
    %c0_49 = arith.constant 0 : index
    %c0_50 = arith.constant 0 : index
    %54 = vector.load %arg3[%c0_49, %c0_50] : memref<32x1xf32, #tpu.memory_space<vmem>>, vector<32x1xf32>
    %55 = vector.broadcast %54 : vector<32x1xf32> to vector<32x324xf32>
    %56 = arith.addf %53, %55 : vector<32x324xf32>
    %c0_51 = arith.constant 0 : index
    %c0_52 = arith.constant 0 : index
    %c0_53 = arith.constant 0 : index
    %57 = vector.load %arg5[%c0_51, %c0_52, %c0_53] : memref<1x32x324xf32, #tpu.memory_space<vmem>>, vector<1x32x324xf32>
    %58 = vector.shape_cast %57 : vector<1x32x324xf32> to vector<32x324xf32>
    %59 = arith.addf %56, %58 : vector<32x324xf32>
    %c0_54 = arith.constant 0 : index
    %c0_55 = arith.constant 0 : index
    %c0_56 = arith.constant 0 : index
    %60 = vector.load %arg6[%c0_54, %c0_55, %c0_56] : memref<1x32x324xf32, #tpu.memory_space<vmem>>, vector<1x32x324xf32>
    %61 = vector.shape_cast %60 : vector<1x32x324xf32> to vector<32x324xf32>
    %62 = vector.shape_cast %59 : vector<32x324xf32> to vector<1x32x324xf32>
    tpu.vector_store %arg6[%c0_54, %c0_55, %c0_56], %62 {strides = array<i32>} : memref<1x32x324xf32, #tpu.memory_space<vmem>>, vector<1x32x324xf32>,
    return
  }
  func.func @transform_0(%arg0: i32) -> (i32, i32, i32) {
    %c0_i32 = arith.constant 0 : i32
    %c0_i32_0 = arith.constant 0 : i32
    %c0_i32_1 = arith.constant 0 : i32
    return %arg0, %c0_i32, %c0_i32_0 : i32, i32, i32
  }
  func.func @transform_1(%arg0: i32) -> (i32, i32, i32) {
    %c0_i32 = arith.constant 0 : i32
    %c0_i32_0 = arith.constant 0 : i32
    %c0_i32_1 = arith.constant 0 : i32
    %c0_i32_2 = arith.constant 0 : i32
    return %c0_i32, %c0_i32_0, %c0_i32_1 : i32, i32, i32
  }
  func.func @transform_2(%arg0: i32) -> (i32, i32) {
    %c0_i32 = arith.constant 0 : i32
    %c0_i32_0 = arith.constant 0 : i32
    %c0_i32_1 = arith.constant 0 : i32
    return %c0_i32, %c0_i32_0 : i32, i32
  }
  func.func @transform_3(%arg0: i32) -> (i32, i32) {
    %c0_i32 = arith.constant 0 : i32
    %c0_i32_0 = arith.constant 0 : i32
    %c0_i32_1 = arith.constant 0 : i32
    return %c0_i32, %c0_i32_0 : i32, i32
  }
  func.func @transform_4(%arg0: i32) -> (i32, i32, i32) {
    %c0_i32 = arith.constant 0 : i32
    %c0_i32_0 = arith.constant 0 : i32
    %c0_i32_1 = arith.constant 0 : i32
    return %arg0, %c0_i32, %c0_i32_0 : i32, i32, i32
  }
  func.func @transform_5(%arg0: i32) -> (i32, i32, i32) {
    %c0_i32 = arith.constant 0 : i32
    %c0_i32_0 = arith.constant 0 : i32
    %c0_i32_1 = arith.constant 0 : i32
    return %arg0, %c0_i32, %c0_i32_0 : i32, i32, i32
  }
}

module attributes {stable_mosaic.version = 11 : i64} {
  func.func @_ca_apply_kernel(%arg0: i32, %arg1: memref<1x32x324xf32, #tpu.memory_space<vmem>>, %arg2: memref<1x32x324xf32, #tpu.memory_space<vmem>>, %arg3: memref<1x324xf32, #tpu.memory_space<vmem>>, %arg4: memref<32x8xf32, #tpu.memory_space<vmem>>, %arg5: memref<1x8xf32, #tpu.memory_space<vmem>>, %arg6: memref<32x8xf32, #tpu.memory_space<vmem>>, %arg7: memref<32x1xf32, #tpu.memory_space<vmem>>, %arg8: memref<1x32x324xf32, #tpu.memory_space<vmem>>) attributes {dimension_semantics = [#tpu.dimension_semantics<parallel>], iteration_bounds = array<i64: 2>, scalar_prefetch = 0 : i64, scratch_operands = 0 : i64, tpu.core_type = #tpu.core_type<tc>, window_params = [{transform_indices = @transform_0, window_bounds = array<i64: 1, 32, 324>}, {transform_indices = @transform_1, window_bounds = array<i64: 1, 32, 324>}, {pipeline_mode = #tpu.pipeline_mode<synchronous>, transform_indices = @transform_2, window_bounds = array<i64: 1, 324>}, {pipeline_mode = #tpu.pipeline_mode<synchronous>, transform_indices = @transform_3, window_bounds = array<i64: 32, 8>}, {pipeline_mode = #tpu.pipeline_mode<synchronous>, transform_indices = @transform_4, window_bounds = array<i64: 1, 8>}, {pipeline_mode = #tpu.pipeline_mode<synchronous>, transform_indices = @transform_5, window_bounds = array<i64: 32, 8>}, {pipeline_mode = #tpu.pipeline_mode<synchronous>, transform_indices = @transform_6, window_bounds = array<i64: 32, 1>}, {transform_indices = @transform_7, window_bounds = array<i64: 1, 32, 324>}]} {
    %c0 = arith.constant 0 : index
    %c0_0 = arith.constant 0 : index
    %c0_1 = arith.constant 0 : index
    %0 = vector.load %arg2[%c0, %c0_0, %c0_1] : memref<1x32x324xf32, #tpu.memory_space<vmem>>, vector<1x32x324xf32>
    %1 = vector.shape_cast %0 : vector<1x32x324xf32> to vector<32x324xf32>
    %c0_2 = arith.constant 0 : index
    %c0_3 = arith.constant 0 : index
    %2 = vector.load %arg3[%c0_2, %c0_3] : memref<1x324xf32, #tpu.memory_space<vmem>>, vector<1x324xf32>
    %3 = vector.broadcast %2 : vector<1x324xf32> to vector<32x324xf32>
    %4 = arith.mulf %1, %3 : vector<32x324xf32>
    %cst = arith.constant dense<0.000000e+00> : vector<32xf32>
    %5 = vector.multi_reduction <add>, %4, %cst [1] : vector<32x324xf32> to vector<32xf32>
    %6 = vector.shape_cast %5 : vector<32xf32> to vector<32x1xf32>
    %cst_4 = arith.constant 3.906250e-03 : f32
    %7 = vector.broadcast %cst_4 : f32 to vector<32x1xf32>
    %8 = arith.mulf %6, %7 : vector<32x1xf32>
    %c0_5 = arith.constant 0 : index
    %c0_6 = arith.constant 0 : index
    %9 = vector.load %arg4[%c0_5, %c0_6] : memref<32x8xf32, #tpu.memory_space<vmem>>, vector<32x8xf32>
    %10 = vector.broadcast %8 : vector<32x1xf32> to vector<32x8xf32>
    %11 = arith.mulf %9, %10 : vector<32x8xf32>
    %cst_7 = arith.constant dense<0.000000e+00> : vector<8xf32>
    %12 = vector.multi_reduction <add>, %11, %cst_7 [0] : vector<32x8xf32> to vector<8xf32>
    %13 = vector.shape_cast %12 : vector<8xf32> to vector<1x8xf32>
    %c0_8 = arith.constant 0 : index
    %c0_9 = arith.constant 0 : index
    %14 = vector.load %arg5[%c0_8, %c0_9] : memref<1x8xf32, #tpu.memory_space<vmem>>, vector<1x8xf32>
    %15 = arith.addf %13, %14 : vector<1x8xf32>
    %cst_10 = arith.constant 0.000000e+00 : f32
    %16 = vector.broadcast %cst_10 : f32 to vector<1x8xf32>
    %17 = arith.maximumf %15, %16 : vector<1x8xf32>
    %c0_11 = arith.constant 0 : index
    %c0_12 = arith.constant 0 : index
    %18 = vector.load %arg6[%c0_11, %c0_12] : memref<32x8xf32, #tpu.memory_space<vmem>>, vector<32x8xf32>
    %19 = vector.broadcast %17 : vector<1x8xf32> to vector<32x8xf32>
    %20 = arith.mulf %18, %19 : vector<32x8xf32>
    %cst_13 = arith.constant dense<0.000000e+00> : vector<32xf32>
    %21 = vector.multi_reduction <add>, %20, %cst_13 [1] : vector<32x8xf32> to vector<32xf32>
    %22 = vector.shape_cast %21 : vector<32xf32> to vector<32x1xf32>
    %c0_14 = arith.constant 0 : index
    %c0_15 = arith.constant 0 : index
    %23 = vector.load %arg7[%c0_14, %c0_15] : memref<32x1xf32, #tpu.memory_space<vmem>>, vector<32x1xf32>
    %24 = arith.addf %22, %23 : vector<32x1xf32>
    %cst_16 = arith.constant 0.000000e+00 : f32
    %25 = vector.broadcast %cst_16 : f32 to vector<32x1xf32>
    %26 = arith.subf %25, %24 : vector<32x1xf32>
    %27 = math.exp %26 : vector<32x1xf32>
    %cst_17 = arith.constant 1.000000e+00 : f32
    %28 = vector.broadcast %cst_17 : f32 to vector<32x1xf32>
    %29 = arith.addf %28, %27 : vector<32x1xf32>
    %cst_18 = arith.constant 1.000000e+00 : f32
    %30 = vector.broadcast %cst_18 : f32 to vector<32x1xf32>
    %31 = arith.divf %30, %29 : vector<32x1xf32>
    %c0_19 = arith.constant 0 : index
    %c0_20 = arith.constant 0 : index
    %c0_21 = arith.constant 0 : index
    %32 = vector.load %arg1[%c0_19, %c0_20, %c0_21] : memref<1x32x324xf32, #tpu.memory_space<vmem>>, vector<1x32x324xf32>
    %33 = vector.shape_cast %32 : vector<1x32x324xf32> to vector<32x324xf32>
    %34 = vector.broadcast %31 : vector<32x1xf32> to vector<32x324xf32>
    %35 = arith.mulf %1, %34 : vector<32x324xf32>
    %36 = arith.addf %33, %35 : vector<32x324xf32>
    %c0_22 = arith.constant 0 : index
    %c0_23 = arith.constant 0 : index
    %c0_24 = arith.constant 0 : index
    %37 = vector.load %arg8[%c0_22, %c0_23, %c0_24] : memref<1x32x324xf32, #tpu.memory_space<vmem>>, vector<1x32x324xf32>
    %38 = vector.shape_cast %37 : vector<1x32x324xf32> to vector<32x324xf32>
    %39 = vector.shape_cast %36 : vector<32x324xf32> to vector<1x32x324xf32>
    tpu.vector_store %arg8[%c0_22, %c0_23, %c0_24], %39 {strides = array<i32>} : memref<1x32x324xf32, #tpu.memory_space<vmem>>, vector<1x32x324xf32>,
    return
  }
  func.func @transform_0(%arg0: i32) -> (i32, i32, i32) {
    %c0_i32 = arith.constant 0 : i32
    %c0_i32_0 = arith.constant 0 : i32
    %c0_i32_1 = arith.constant 0 : i32
    return %arg0, %c0_i32, %c0_i32_0 : i32, i32, i32
  }
  func.func @transform_1(%arg0: i32) -> (i32, i32, i32) {
    %c0_i32 = arith.constant 0 : i32
    %c0_i32_0 = arith.constant 0 : i32
    %c0_i32_1 = arith.constant 0 : i32
    return %arg0, %c0_i32, %c0_i32_0 : i32, i32, i32
  }
  func.func @transform_2(%arg0: i32) -> (i32, i32) {
    %c0_i32 = arith.constant 0 : i32
    %c0_i32_0 = arith.constant 0 : i32
    %c0_i32_1 = arith.constant 0 : i32
    return %c0_i32, %c0_i32_0 : i32, i32
  }
  func.func @transform_3(%arg0: i32) -> (i32, i32) {
    %c0_i32 = arith.constant 0 : i32
    %c0_i32_0 = arith.constant 0 : i32
    %c0_i32_1 = arith.constant 0 : i32
    return %c0_i32, %c0_i32_0 : i32, i32
  }
  func.func @transform_4(%arg0: i32) -> (i32, i32) {
    %c0_i32 = arith.constant 0 : i32
    %c0_i32_0 = arith.constant 0 : i32
    %c0_i32_1 = arith.constant 0 : i32
    return %c0_i32, %c0_i32_0 : i32, i32
  }
  func.func @transform_5(%arg0: i32) -> (i32, i32) {
    %c0_i32 = arith.constant 0 : i32
    %c0_i32_0 = arith.constant 0 : i32
    %c0_i32_1 = arith.constant 0 : i32
    return %c0_i32, %c0_i32_0 : i32, i32
  }
  func.func @transform_6(%arg0: i32) -> (i32, i32) {
    %c0_i32 = arith.constant 0 : i32
    %c0_i32_0 = arith.constant 0 : i32
    %c0_i32_1 = arith.constant 0 : i32
    return %c0_i32, %c0_i32_0 : i32, i32
  }
  func.func @transform_7(%arg0: i32) -> (i32, i32, i32) {
    %c0_i32 = arith.constant 0 : i32
    %c0_i32_0 = arith.constant 0 : i32
    %c0_i32_1 = arith.constant 0 : i32
    return %arg0, %c0_i32, %c0_i32_0 : i32, i32, i32
  }
}

</mosaic_0001>

<bundles_post_ra>
// kernel: rg_forward_pallas.9
= control target key start
LH: loop header
LB: loop body
LE: loop exit
PB: predicated region body
PF: predicated region fallthrough
CT: control target
= control target key end

     0   :  { %s668_s24 = smov 0   ;;  %s836_s0 = inlined_call_operand.vmem [shape: f32[2,32,324], index: 0, kind: input, shape index: {}]   ;;  %s837_s1 = inlined_call_operand.vmem [shape: f32[2,32,324], index: 1, kind: input, shape index: {}]   ;;  %s838_s2 = inlined_call_operand.vmem [shape: f32[1,324], index: 2, kind: input, shape index: {}]   ;;  %s839_s3 = inlined_call_operand.vmem [shape: f32[32,8], index: 3, kind: input, shape index: {}]   ;;  %s840_s4 = inlined_call_operand.vmem [shape: f32[1,8], index: 4, kind: input, shape index: {}]   ;;  %s841_s5 = inlined_call_operand.vmem [shape: f32[32,8], index: 5, kind: input, shape index: {}]   ;;  %s842_s6 = inlined_call_operand.vmem [shape: f32[32,1], index: 6, kind: input, shape index: {}]   ;;  %s843_s7 = inlined_call_operand.vmem [shape: f32[2,32,324], index: 7, kind: output, shape index: {}]  }
   0x1 LB: > { %s581_s25 = sadd.s32 4294967295, %s625_s24   ;;  %p585_p0 = scmp.ge.s32.totalorder %s625_s24, 1  ;;  %s625_s24 = sphi %s668_s24, %s17_s24  }
   0x2   : > { %p247_p1 = scmp.lt.s32.totalorder %s625_s24, 3 }
   0x4   : > { %p248_p2 = pnand %p585_p0, %p247_p1 }
   0x5   : > { %p284_p3 = scmp.lt.s32.totalorder (!%p248_p2), %s581_s25, 1  ;;  %v313_v0 = vlaneseq (!%p248_p2)  ;;  %v311_v2 = vld [vmem:[%s838_s2] sm:$0x7] (!%p248_p2)  ;;  %vm341_vm0 = vcmask (!%p248_p2), 556032   ;;  %v367_v50 = vld [vmem:[%s839_s3 + $0x10] sm:$0xff] (!%p248_p2)  ;;  %v366_v51 = vld [vmem:[%s839_s3 + $0x8] sm:$0xff] (!%p248_p2) }
   0x6   : > { %251 = sbr.rel (%p248_p2) target bundleno = 517 (0x205), region = 48  ;;  %v365_v48 = vld [vmem:[%s839_s3] sm:$0xff] (!%p248_p2)  ;;  %v368_v55 = vld [vmem:[%s839_s3 + $0x18] sm:$0xff] (!%p248_p2)  ;;  %vm373_vm1 = vcmask (!%p248_p2), 64512  }
   0x7   : > { %v676_v1 = vshrl.u32 (!%p248_p2), %v313_v0, 7 }
   0x9   : > { %v315_v3 = vsub.s32 (!%p248_p2), 0, %v676_v1  ;;  %v319_v4 = vsub.s32 (!%p248_p2), 1, %v676_v1  ;;  %v323_v5 = vsub.s32 (!%p248_p2), 2, %v676_v1 }
   0xb   : > { %v316_v6 = vrot.slane (!%p248_p2), %v311_v2, %v315_v3  ;;  %v320_v7 = vrot.slane (!%p248_p2), %v311_v2, %v319_v4  ;;  %v324_v8 = vrot.slane (!%p248_p2), %v311_v2, %v323_v5 }
   0xd   : > { %s845_s25 = smov (!%p284_p3, %s581_s25), 1 }
   0xe   : > { %s681_s28 = smul.u32 96, %s845_s25 }
  0x10   : > { %s293_s8 = scalar_lea.vmem %s837_s1, %s681_s28  ;;  %s785_s16 = scalar_lea.vmem %s836_s0, %s681_s28 }
  0x11   : > { %v692_v9 = vld [vmem:[%s293_s8] sm:$0xff]  ;;  %v694_v10 = vld [vmem:[%s293_s8 + $0x8] sm:$0xff]  ;;  %v696_v11 = vld [vmem:[%s293_s8 + $0x10] sm:$0xff]  ;;  %s800_s19 = scalar_lea.vmem %s843_s7, %s681_s28 }
  0x12   : > { %v328_v12 = vmul.f32 %v316_v6, %v692_v9  ;;  %v329_v13 = vmul.f32 %v320_v7, %v694_v10  ;;  %v330_v14 = vmul.f32 %v324_v8, %v696_v11  ;;  %v701_v15 = vld [vmem:[%s293_s8 + $0x30] sm:$0xff]  ;;  %v703_v16 = vld [vmem:[%s293_s8 + $0x38] sm:$0xff]  ;;  %v705_v17 = vld [vmem:[%s293_s8 + $0x40] sm:$0xff] }
  0x13   : > { %v334_v18 = vmul.f32 %v316_v6, %v701_v15  ;;  %v335_v19 = vmul.f32 %v320_v7, %v703_v16  ;;  %v336_v20 = vmul.f32 %v324_v8, %v705_v17  ;;  %v710_v21 = vld [vmem:[%s293_s8 + $0x18] sm:$0xff]  ;;  %v712_v22 = vld [vmem:[%s293_s8 + $0x20] sm:$0xff]  ;;  %v714_v23 = vld [vmem:[%s293_s8 + $0x28] sm:$0xff] }
  0x14   : > { %v340_v24 = vadd.f32 %v329_v13, %v328_v12  ;;  %v342_v25 = vsel %vm341_vm0, %v330_v14, 0.0  ;;  %v331_v26 = vmul.f32 %v316_v6, %v710_v21  ;;  %v332_v27 = vmul.f32 %v320_v7, %v712_v22  ;;  %v719_v28 = vld [vmem:[%s293_s8 + $0x48] sm:$0xff]  ;;  %v721_v29 = vld [vmem:[%s293_s8 + $0x50] sm:$0xff]  ;;  %v723_v30 = vld [vmem:[%s293_s8 + $0x58] sm:$0xff] }
  0x15   : > { %v351_v31 = vadd.f32 %v335_v19, %v334_v18  ;;  %v352_v32 = vsel %vm341_vm0, %v336_v20, 0.0  ;;  %v333_v33 = vmul.f32 %v324_v8, %v714_v23  ;;  %v337_v34 = vmul.f32 %v316_v6, %v719_v28  ;;  %v387_v14 = vld [vmem:[%s840_s4] sm:$0x1] }
  0x16   : > { %v343_v35 = vadd.f32 %v342_v25, %v340_v24  ;;  %v346_v36 = vadd.f32 %v332_v27, %v331_v26  ;;  %v338_v37 = vmul.f32 %v320_v7, %v721_v29  ;;  %v339_v38 = vmul.f32 %v324_v8, %v723_v30  ;;  %v391_v24 = vld [vmem:[%s841_s5 + $0x8] sm:$0xff]  ;;  %v390_v25 = vld [vmem:[%s841_s5] sm:$0xff]  ;;  %v393_v27 = vld [vmem:[%s841_s5 + $0x18] sm:$0xff] }
  0x17   : > { %v353_v39 = vadd.f32 %v352_v32, %v351_v31  ;;  %v347_v40 = vsel %vm341_vm0, %v333_v33, 0.0  ;;  %v392_v31 = vld [vmem:[%s841_s5 + $0x10] sm:$0xff] }
  0x18   : > { %344 = vadd.xlane.f32.xlu0 %v343_v35  ;;  %v348_v41 = vadd.f32 %v347_v40, %v346_v36  ;;  %v356_v42 = vadd.f32 %v338_v37, %v337_v34  ;;  %v357_v43 = vsel %vm341_vm0, %v339_v38, 0.0  ;;  %v627_v38 = vmov 0   ;;  %v414_v40 = vld [vmem:[%s842_s6] sm:$0xff] }
  0x19   : > { %354 = vadd.xlane.f32.xlu1 %v353_v39  ;;  %601 = vset.pattern.permute.xlu0 %v627_v38  ;;  %v415_v39 = vld [vmem:[%s842_s6 + $0x8] sm:$0xff] }
  0x1a   : > { %v358_v44 = vadd.f32 %v357_v43, %v356_v42  ;;  %602 = vset.pattern.permute.xlu1 %v627_v38 }
  0x1c   : > { %349 = vadd.xlane.f32.xlu0 %v348_v41 }
  0x1d   : > { %359 = vadd.xlane.f32.xlu1 %v358_v44 }
  0xa5   : > { %v345_v45 = vpop.xlane.xlu0 %344 }
  0xa6   : > { %v361_v46 = vmul.f32 0.00390625, %v345_v45  ;;  %v355_v47 = vpop.xlane.xlu1 %354  ;;  %v417_v45 = vld [vmem:[%s842_s6 + $0x18] sm:$0xff] }
  0xa7   : > { %v363_v49 = vmul.f32 0.00390625, %v355_v47 }
  0xa8   : > { %v369_v53 = vmul.f32 %v365_v48, %v361_v46  ;;  %v416_v46 = vld [vmem:[%s842_s6 + $0x10] sm:$0xff] }
  0xa9   : > { %v350_v52 = vpop.xlane.xlu0 %349  ;;  %v371_v58 = vmul.f32 %v367_v50, %v363_v49 }
  0xaa   : > { %v362_v54 = vmul.f32 0.00390625, %v350_v52  ;;  %v360_v56 = vpop.xlane.xlu1 %359  ;;  %v374_v61 = vsel %vm373_vm1, %v369_v53, 0.0 }
  0xab   : > { %v364_v57 = vmul.f32 0.00390625, %v360_v56  ;;  %v377_v0 = vsel %vm373_vm1, %v371_v58, 0.0 }
  0xac   : > { %v370_v59 = vmul.f32 %v366_v51, %v362_v54 }
  0xad   : > { %v372_v60 = vmul.f32 %v368_v55, %v364_v57 }
  0xae   : > { %v375_v62 = vsel %vm373_vm1, %v370_v59, 0.0 }
  0xaf   : > { %v376_v63 = vadd.f32 %v375_v62, %v374_v61  ;;  %v379_v2 = vsel %vm373_vm1, %v372_v60, 0.0 }
  0xb1   : > { %v378_v4 = vadd.f32 %v377_v0, %v376_v63 }
  0xb3   : > { %v380_v5 = vadd.f32 %v379_v2, %v378_v4 }
  0xb5   : > { %v381_v6 = vrot.slane %v380_v5, 4 }
  0xb7   : > { %v382_v7 = vadd.f32 %v381_v6, %v380_v5 }
  0xb9   : > { %v383_v8 = vrot.slane %v382_v7, 2 }
  0xbb   : > { %v384_v12 = vadd.f32 %v383_v8, %v382_v7 }
  0xbd   : > { %v385_v13 = vrot.slane %v384_v12, 1 }
  0xbf   : > { %v386_v18 = vadd.f32 %v385_v13, %v384_v12  ;;  %v449_v13 = vld [vmem:[%s785_s16 + $0x18] sm:$0xff] }
  0xc1   : > { %v388_v19 = vadd.f32 %v387_v14, %v386_v18  ;;  %v450_v14 = vld [vmem:[%s785_s16 + $0x20] sm:$0xff]  ;;  %v451_v18 = vld [vmem:[%s785_s16 + $0x28] sm:$0xff] }
  0xc3   : > { %v389_v20 = vmax.f32 %v388_v19, 0.0 }
  0xc5   : > { %v397_v26 = vrot.slane %v389_v20, %v315_v3 }
  0xc7   : > { %v399_v32 = vmul.f32 %v397_v26, %v391_v24  ;;  %v398_v33 = vmul.f32 %v397_v26, %v390_v25  ;;  %v401_v36 = vmul.f32 %v397_v26, %v393_v27  ;;  %v400_v37 = vmul.f32 %v397_v26, %v392_v31  ;;  %v446_v26 = vld [vmem:[%s785_s16] sm:$0xff]  ;;  %v447_v27 = vld [vmem:[%s785_s16 + $0x8] sm:$0xff]  ;;  %v448_v31 = vld [vmem:[%s785_s16 + $0x10] sm:$0xff] }
  0xc9   : > { %v405_v34 = vsel %vm373_vm1, %v399_v32, 0.0  ;;  %v402_v35 = vsel %vm373_vm1, %v398_v33, 0.0  ;;  %v411_v1 = vsel %vm373_vm1, %v401_v36, 0.0  ;;  %v408_v3 = vsel %vm373_vm1, %v400_v37, 0.0 }
  0xca   : > { %406 = vadd.xlane.f32.xlu1 %v405_v34  ;;  %403 = vadd.xlane.f32.xlu0 %v402_v35 }
  0xce   : > { %412 = vadd.xlane.f32.xlu1 %v411_v1  ;;  %409 = vadd.xlane.f32.xlu0 %v408_v3  ;;  %v452_v1 = vld [vmem:[%s785_s16 + $0x30] sm:$0xff] }
 0x157   : > { %v407_v41 = vpop.xlane.xlu1 %406  ;;  %v404_v42 = vpop.xlane.xlu0 %403 }
 0x158   : > { %v419_v43 = vadd.f32 %v415_v39, %v407_v41  ;;  %v418_v44 = vadd.f32 %v414_v40, %v404_v42 }
 0x15a   : > { %v423_v47 = vsub.f32 0.0, %v419_v43  ;;  %v422_v48 = vsub.f32 0.0, %v418_v44  ;;  %v455_v44 = vld [vmem:[%s785_s16 + $0x48] sm:$0xff] }
 0x15b   : > { %v413_v49 = vpop.xlane.xlu1 %412  ;;  %v410_v50 = vpop.xlane.xlu0 %409 }
 0x15c   : > { %v428_v51 = vmul.f32 1.442695, %v423_v47  ;;  %v426_v52 = vmul.f32 1.442695, %v422_v48  ;;  %v421_v53 = vadd.f32 %v417_v45, %v413_v49  ;;  %v420_v54 = vadd.f32 %v416_v46, %v410_v50  ;;  %v456_v45 = vld [vmem:[%s785_s16 + $0x50] sm:$0xff]  ;;  %v457_v46 = vld [vmem:[%s785_s16 + $0x58] sm:$0xff] }
 0x15e   : > { %603 = vpow2.f32 %v428_v51  ;;  %v425_v55 = vsub.f32 0.0, %v421_v53  ;;  %v424_v56 = vsub.f32 0.0, %v420_v54 }
 0x15f   : > { %605 = vpow2.f32 %v426_v52 }
 0x160   : > { %v432_v57 = vmul.f32 1.442695, %v425_v55  ;;  %v430_v58 = vmul.f32 1.442695, %v424_v56 }
 0x162   : > { %607 = vpow2.f32 %v432_v57 }
 0x163   : > { %609 = vpow2.f32 %v430_v58 }
 0x168   : > { %v604_v59 = vpop.eup %603 }
 0x169   : > { %v606_v60 = vpop.eup %605  ;;  %v435_v61 = vadd.f32 1.0, %v604_v59 }
 0x16a   : > { %v434_v62 = vadd.f32 1.0, %v606_v60 }
 0x16b   : > { %611 = vrcp.f32 %v435_v61 }
 0x16c   : > { %v608_v63 = vpop.eup %607  ;;  %613 = vrcp.f32 %v434_v62 }
 0x16d   : > { %v610_v0 = vpop.eup %609  ;;  %v437_v4 = vadd.f32 1.0, %v608_v63 }
 0x16e   : > { %v436_v2 = vadd.f32 1.0, %v610_v0 }
 0x170   : > { %615 = vrcp.f32 %v436_v2 }
 0x171   : > { %617 = vrcp.f32 %v437_v4 }
 0x175   : > { %v612_v5 = vpop.eup %611 }
 0x176   : > { %v614_v6 = vpop.eup %613  ;;  %465 = vperm.xlu1 %602, %v612_v5  }
 0x177   : > { %460 = vperm.xlu0 %601, %v614_v6  }
 0x17a   : > { %v616_v7 = vpop.eup %615 }
 0x17b   : > { %470 = vperm.xlu1 %602, %v616_v7   ;;  %v618_v8 = vpop.eup %617 }
 0x17f   : > { %475 = vperm.xlu1 %602, %v618_v8  }
 0x1f5   : > { %v466_v12 = vpop.permute.xlu1 %465 }
 0x1f6   : > { %v481_v19 = vmul.f32 %v466_v12, %v710_v21  ;;  %v482_v20 = vmul.f32 %v466_v12, %v712_v22  ;;  %v483_v24 = vmul.f32 %v466_v12, %v714_v23  ;;  %v461_v25 = vpop.permute.xlu0 %460 }
 0x1f7   : > { %v478_v21 = vmul.f32 %v461_v25, %v692_v9  ;;  %v479_v22 = vmul.f32 %v461_v25, %v694_v10  ;;  %v480_v23 = vmul.f32 %v461_v25, %v696_v11  ;;  %v453_v10 = vld [vmem:[%s785_s16 + $0x38] sm:$0xff]  ;;  %v454_v11 = vld [vmem:[%s785_s16 + $0x40] sm:$0xff] }
 0x1f8   : > { %v493_v32 = vadd.f32 %v481_v19, %v449_v13  ;;  %v494_v33 = vadd.f32 %v482_v20, %v450_v14  ;;  %v495_v34 = vadd.f32 %v483_v24, %v451_v18 }
 0x1f9   : > { %v490_v35 = vadd.f32 %v478_v21, %v446_v26  ;;  %v491_v36 = vadd.f32 %v479_v22, %v447_v27  ;;  %v492_v37 = vadd.f32 %v480_v23, %v448_v31 }
 0x1fa   : > { %505 = vst [vmem:[%s800_s19 + $0x18] sm:$0xff] %v493_v32  ;;  %506 = vst [vmem:[%s800_s19 + $0x20] sm:$0xff] %v494_v33  ;;  %v471_v9 = vpop.permute.xlu1 %470 }
 0x1fb   : > { %507 = vst.msk [vmem:[%s800_s19 + $0x28] sm:$0xff] %vm341_vm0, %v495_v34  ;;  %502 = vst [vmem:[%s800_s19] sm:$0xff] %v490_v35  ;;  %v484_v3 = vmul.f32 %v471_v9, %v701_v15  ;;  %v485_v38 = vmul.f32 %v471_v9, %v703_v16  ;;  %v486_v39 = vmul.f32 %v471_v9, %v705_v17 }
 0x1fc   : > { %503 = vst [vmem:[%s800_s19 + $0x8] sm:$0xff] %v491_v36  ;;  %504 = vst.msk [vmem:[%s800_s19 + $0x10] sm:$0xff] %vm341_vm0, %v492_v37 }
 0x1fd   : > { %v496_v40 = vadd.f32 %v484_v3, %v452_v1  ;;  %v497_v41 = vadd.f32 %v485_v38, %v453_v10  ;;  %v498_v42 = vadd.f32 %v486_v39, %v454_v11 }
 0x1fe   : > { %v476_v43 = vpop.permute.xlu1 %475 }
 0x1ff   : > { %508 = vst [vmem:[%s800_s19 + $0x30] sm:$0xff] %v496_v40  ;;  %509 = vst [vmem:[%s800_s19 + $0x38] sm:$0xff] %v497_v41  ;;  %v487_v15 = vmul.f32 %v476_v43, %v719_v28  ;;  %v488_v16 = vmul.f32 %v476_v43, %v721_v29  ;;  %v489_v17 = vmul.f32 %v476_v43, %v723_v30 }
 0x200   : > { %510 = vst.msk [vmem:[%s800_s19 + $0x40] sm:$0xff] %vm341_vm0, %v498_v42 }
 0x201   : > { %v499_v47 = vadd.f32 %v487_v15, %v455_v44  ;;  %v500_v48 = vadd.f32 %v488_v16, %v456_v45  ;;  %v501_v49 = vadd.f32 %v489_v17, %v457_v46 }
 0x203   : > { %511 = vst [vmem:[%s800_s19 + $0x48] sm:$0xff] %v499_v47  ;;  %512 = vst [vmem:[%s800_s19 + $0x50] sm:$0xff] %v500_v48 }
 0x204   : > { %513 = vst.msk [vmem:[%s800_s19 + $0x58] sm:$0xff] %vm341_vm0, %v501_v49 }
 0x205 PF: > { %s17_s24 = sadd.s32 1, %s625_s24  }
 0x206   : > { %p14_p4 = scmp.ge.s32.totalorder %s17_s24, 4  }
 0x208   :  { %16 = sbr.rel (!%p14_p4) target bundleno = 1 (0x1), region = 81 }

// kernel: rg_forward_pallas.8
= control target key start
LH: loop header
LB: loop body
LE: loop exit
PB: predicated region body
PF: predicated region fallthrough
CT: control target
= control target key end

     0   :  { %s3471_s15 = smov 0   ;;  %s4268_s0 = inlined_call_operand.vmem [shape: f32[2,32,324], index: 0, kind: input, shape index: {}]   ;;  %s4269_s1 = inlined_call_operand.vmem [shape: f32[9,32,32], index: 1, kind: input, shape index: {}]   ;;  %s4270_s2 = inlined_call_operand.vmem [shape: f32[32,1], index: 2, kind: input, shape index: {}]   ;;  %s4271_s3 = inlined_call_operand.vmem [shape: f32[1,324], index: 3, kind: input, shape index: {}]   ;;  %s4272_s4 = inlined_call_operand.vmem [shape: f32[2,32,324], index: 4, kind: output, shape index: {}]  }
   0x1 LB: > { %s2614_s16 = sadd.s32 4294967295, %s3433_s15   ;;  %p2618_p0 = scmp.ge.s32.totalorder %s3433_s15, 1  ;;  %s3433_s15 = sphi %s3471_s15, %s14_s15  }
   0x2   : > { %p162_p1 = scmp.lt.s32.totalorder %s3433_s15, 3 }
   0x4   : > { %p163_p2 = pnand %p2618_p0, %p162_p1 }
   0x5   : > { %p188_p3 = scmp.lt.s32.totalorder (!%p163_p2), %s2614_s16, 1  ;;  %v225_v0 = vlaneseq (!%p163_p2)  ;;  %v3435_v1 = vmov (!%p163_p2), 0.0   ;;  %vm201_vm0 = vcmask (!%p163_p2), 867328   ;;  %v198_v3 = vld [vmem:[%s4271_s3] sm:$0x7] (!%p163_p2)  ;;  %s3436_s23 = smov (!%p163_p2), 19  }
   0x6   : > { %166 = sbr.rel (%p163_p2) target bundleno = 626 (0x272), region = 36  ;;  %199 = vst [vmem:[#allocation2] sm:$0xff] (!%p163_p2), %v3435_v1  ;;  %203 = vst [vmem:[#allocation2 + $0x18] sm:$0xff] (!%p163_p2), %v3435_v1  ;;  %900 = vmatprep.mubr.f32.mxu0 (!%p163_p2), %v3435_v1  ;;  %478 = vmatprep.mubr.f32.mxu1 (!%p163_p2), %v3435_v1  ;;  %vm309_vm1 = vcmask (!%p163_p2), 1047704   ;;  %vm288_vm2 = vcmask (!%p163_p2), 154624   ;;  %vm312_vm3 = vcmask (!%p163_p2), 711680  }
   0x7   : > { %206 = vst [vmem:[#allocation2 + $0x30] sm:$0xff] (!%p163_p2), %v3435_v1  ;;  %209 = vst [vmem:[#allocation2 + $0x48] sm:$0xff] (!%p163_p2), %v3435_v1  ;;  %v226_v2 = vshrl.u32 (!%p163_p2), %v225_v0, 7  ;;  %s3437_s24 = smov (!%p163_p2), 126   ;;  %s3438_s25 = smov (!%p163_p2), 127   ;;  %vm803_vm4 = vcmask (!%p163_p2), 1031168  }
   0x8   : > { %202 = vst.msk [vmem:[#allocation2 + $0x10] sm:$0xff] (!%p163_p2), %vm201_vm0, %v3435_v1  ;;  %205 = vst.msk [vmem:[#allocation2 + $0x28] sm:$0xff] (!%p163_p2), %vm201_vm0, %v3435_v1  ;;  %s3439_s26 = smov (!%p163_p2), 110   ;;  %s3440_s27 = smov (!%p163_p2), 109   ;;  %vm380_vm5 = vcmask (!%p163_p2), 1039360   ;;  %vm401_vm6 = vcmask (!%p163_p2), 261120  }
   0x9   : > { %208 = vst.msk [vmem:[#allocation2 + $0x40] sm:$0xff] (!%p163_p2), %vm201_vm0, %v3435_v1  ;;  %211 = vst.msk [vmem:[#allocation2 + $0x58] sm:$0xff] (!%p163_p2), %vm201_vm0, %v3435_v1  ;;  %v235_v4 = vsub.s32 (!%p163_p2), 2, %v226_v2  ;;  %v227_v5 = vsub.s32 (!%p163_p2), 0, %v226_v2  ;;  %v231_v6 = vsub.s32 (!%p163_p2), 1, %v226_v2  ;;  %s3441_s28 = smov (!%p163_p2), 108  }
   0xa   : > { %s3442_s29 = smov (!%p163_p2), 92   ;;  %s3443_s30 = smov (!%p163_p2), 91   ;;  %vm1051_vm7 = vcmask (!%p163_p2), 900096   ;;  %vm1299_vm8 = vcmask (!%p163_p2), 891904   ;;  %vm1547_vm9 = vcmask (!%p163_p2), 883712   ;;  %vm1795_vm10 = vcmask (!%p163_p2), 752640  }
   0xb   : > { %v236_v7 = vrot.slane (!%p163_p2), %v198_v3, %v235_v4  ;;  %v228_v8 = vrot.slane (!%p163_p2), %v198_v3, %v227_v5  ;;  %v232_v9 = vrot.slane (!%p163_p2), %v198_v3, %v231_v6  ;;  %s3444_s5 = smov (!%p163_p2), 90   ;;  %vm2043_vm11 = vcmask (!%p163_p2), 744448  }
   0xc   : > { %vm2291_vm12 = vcmask (!%p163_p2), 736256   ;;  %vm2548_vm13 = vcmask (!%p163_p2), 556032  }
   0xd   : > { %s4284_s16 = smov (!%p188_p3, %s2614_s16), 1 }
   0xe   : > { %s3165_s19 = smul.u32 96, %s4284_s16 }
  0x10   : > { %s3500_s22 = scalar_lea.vmem %s4268_s0, %s3165_s19 }
  0x11   : > { %v214_v10 = vld [vmem:[%s3500_s22 + $0x10] sm:$0xff]  ;;  %v212_v11 = vld [vmem:[%s3500_s22] sm:$0xff]  ;;  %v215_v12 = vld [vmem:[%s3500_s22 + $0x18] sm:$0xff] }
  0x12   : > { %v242_v13 = vmul.f32 %v236_v7, %v214_v10  ;;  %v240_v14 = vmul.f32 %v228_v8, %v212_v11  ;;  %v213_v15 = vld [vmem:[%s3500_s22 + $0x8] sm:$0xff]  ;;  %v243_v16 = vmul.f32 %v228_v8, %v215_v12  ;;  %v216_v19 = vld [vmem:[%s3500_s22 + $0x20] sm:$0xff]  ;;  %v219_v22 = vld [vmem:[%s3500_s22 + $0x38] sm:$0xff] }
  0x13   : > { %v241_v17 = vmul.f32 %v232_v9, %v213_v15  ;;  %v217_v18 = vld [vmem:[%s3500_s22 + $0x28] sm:$0xff]  ;;  %v244_v21 = vmul.f32 %v232_v9, %v216_v19  ;;  %v218_v23 = vld [vmem:[%s3500_s22 + $0x30] sm:$0xff]  ;;  %v247_v24 = vmul.f32 %v232_v9, %v219_v22  ;;  %v220_v27 = vld [vmem:[%s3500_s22 + $0x40] sm:$0xff]  ;;  %v3445_v22 = vmov 0  }
  0x14   : > { %268 = vrot.lane.b32.xlu1 %v242_v13, %s3436_s23  ;;  %264 = vrot.lane.b32.xlu0 %v240_v14, %s3436_s23  ;;  %v245_v20 = vmul.f32 %v236_v7, %v217_v18  ;;  %v246_v25 = vmul.f32 %v228_v8, %v218_v23  ;;  %v221_v26 = vld [vmem:[%s3500_s22 + $0x48] sm:$0xff]  ;;  %v248_v29 = vmul.f32 %v236_v7, %v220_v27  ;;  %v223_v30 = vld [vmem:[%s3500_s22 + $0x58] sm:$0xff] }
  0x15   : > { %v249_v28 = vmul.f32 %v228_v8, %v221_v26  ;;  %v222_v31 = vld [vmem:[%s3500_s22 + $0x50] sm:$0xff]  ;;  %v251_v32 = vmul.f32 %v236_v7, %v223_v30  ;;  %v2510_v18 = vld [vmem:[%s4270_s2] sm:$0xff]  ;;  %v2511_v19 = vld [vmem:[%s4270_s2 + $0x8] sm:$0xff]  ;;  %3425 = vset.pattern.permute.xlu0 %v3445_v22  ;;  %3426 = vset.pattern.permute.xlu1 %v3445_v22  ;;  %s4247_s22 = scalar_lea.vmem %s4272_s4, %s3165_s19 }
  0x16   : > { %v250_v33 = vmul.f32 %v232_v9, %v222_v31 }
  0x18   : > { %270 = vrot.lane.b32.xlu1 %v243_v16, %s3436_s23  ;;  %266 = vrot.lane.b32.xlu0 %v241_v17, %s3436_s23 }
  0x1c   : > { %274 = vrot.lane.b32.xlu1 %v245_v20, %s3436_s23  ;;  %272 = vrot.lane.b32.xlu0 %v244_v21, %s3436_s23 }
  0x20   : > { %278 = vrot.lane.b32.xlu1 %v247_v24, %s3436_s23  ;;  %276 = vrot.lane.b32.xlu0 %v246_v25, %s3436_s23  ;;  %v2513_v24 = vld [vmem:[%s4270_s2 + $0x18] sm:$0xff]  ;;  %v2512_v25 = vld [vmem:[%s4270_s2 + $0x10] sm:$0xff] }
  0x24   : > { %282 = vrot.lane.b32.xlu1 %v249_v28, %s3436_s23  ;;  %280 = vrot.lane.b32.xlu0 %v248_v29, %s3436_s23 }
  0x28   : > { %286 = vrot.lane.b32.xlu1 %v251_v32, %s3436_s23  ;;  %284 = vrot.lane.b32.xlu0 %v250_v33, %s3436_s23 }
  0x86   : > { %v269_v34 = vpop.permute.xlu1 %268  ;;  %v265_v35 = vpop.permute.xlu0 %264 }
  0x87   : > { %310 = vst.msk [vmem:[#allocation2] sm:$0xff] %vm309_vm1, %v265_v35 }
  0x8a   : > { %v271_v36 = vpop.permute.xlu1 %270  ;;  %v267_v37 = vpop.permute.xlu0 %266 }
  0x8b   : > { %314 = vst.msk [vmem:[#allocation2 + $0x18] sm:$0xff] %vm309_vm1, %v271_v36  ;;  %v3517_v38 = vsel %vm288_vm2, %v265_v35, %v267_v37  ;;  %v290_v39 = vsel %vm288_vm2, %v267_v37, %v269_v34 }
  0x8c   : > { %313 = vst.msk [vmem:[#allocation2 + $0x10] sm:$0xff] %vm312_vm3, %v290_v39 }
  0x8e   : > { %v275_v40 = vpop.permute.xlu1 %274  ;;  %v273_v41 = vpop.permute.xlu0 %272  ;;  %v3526_v44 = vld [vmem:[#allocation2] sm:$0xff] }
  0x8f   : > { %v3522_v42 = vsel %vm288_vm2, %v271_v36, %v273_v41  ;;  %v292_v43 = vsel %vm288_vm2, %v273_v41, %v275_v40 }
  0x90   : > { %316 = vst.msk [vmem:[#allocation2 + $0x28] sm:$0xff] %vm312_vm3, %v292_v43  ;;  %v2941_v45 = vpack.c.bf16 %v3522_v42, %v3517_v38 }
  0x92   : > { %v279_v46 = vpop.permute.xlu1 %278  ;;  %v277_v47 = vpop.permute.xlu0 %276  ;;  %v3530_v48 = vld [vmem:[#allocation2 + $0x18] sm:$0xff] }
  0x93   : > { %v3533_v49 = vsel %vm288_vm2, %v277_v47, %v279_v46  ;;  %317 = vst.msk [vmem:[#allocation2 + $0x30] sm:$0xff] %vm309_vm1, %v277_v47  ;;  %v3538_v50 = vpack.i.bf16 %v3530_v48, %v3526_v44  ;;  %v2943_v51 = vpack.c.bf16 %v3530_v48, %v3526_v44  ;;  %v325_v55 = vld [vmem:[#allocation2 + $0x10] sm:$0xff]  ;;  %v3841_v48 = vld [vmem:[%s4269_s1 + $0x78] sm:$0xff] }
  0x94   : > { %v3210_v2 = vpack.i.bf16 %v325_v55, %v3517_v38  ;;  %v3766_v38 = vld [vmem:[%s4269_s1 + $0x60] sm:$0xff] }
  0x95   : > { %3186 = vrot.lane.b32.xlu0 %v3538_v50, %s3437_s24 }
  0x96   : > { %v283_v52 = vpop.permute.xlu1 %282  ;;  %v281_v53 = vpop.permute.xlu0 %280 }
  0x97   : > { %320 = vst.msk [vmem:[#allocation2 + $0x48] sm:$0xff] %vm309_vm1, %v283_v52  ;;  %v294_v54 = vsel %vm288_vm2, %v279_v46, %v281_v53  ;;  %v328_v56 = vld [vmem:[#allocation2 + $0x28] sm:$0xff] }
  0x98   : > { %319 = vst.msk [vmem:[#allocation2 + $0x40] sm:$0xff] %vm312_vm3, %v294_v54  ;;  %v3547_v57 = vpack.c.bf16 %v328_v56, %v325_v55  ;;  %v3215_v9 = vpack.i.bf16 %v328_v56, %v3522_v42 }
  0x99   : > { %3196 = vrot.lane.b32.xlu0 %v3538_v50, %s3438_s25 }
  0x9a   : > { %v287_v58 = vpop.permute.xlu1 %286  ;;  %v285_v59 = vpop.permute.xlu0 %284  ;;  %v3556_v62 = vld [vmem:[#allocation2 + $0x30] sm:$0xff] }
  0x9b   : > { %v3552_v60 = vsel %vm288_vm2, %v283_v52, %v285_v59  ;;  %v296_v61 = vsel %vm288_vm2, %v285_v59, %v287_v58 }
  0x9c   : > { %322 = vst.msk [vmem:[#allocation2 + $0x58] sm:$0xff] %vm312_vm3, %v296_v61  ;;  %v2945_v63 = vpack.c.bf16 %v3552_v60, %v3533_v49 }
  0x9d   : > { %3206 = vrot.lane.b32.xlu0 %v3538_v50, %s3439_s26 }
  0x9e   : > { %v3561_v0 = vld [vmem:[#allocation2 + $0x48] sm:$0xff] }
  0x9f   : > { %v3190_v3 = vpack.i.bf16 %v3561_v0, %v3556_v62  ;;  %v2947_v4 = vpack.c.bf16 %v3561_v0, %v3556_v62  ;;  %v331_v6 = vld [vmem:[#allocation2 + $0x40] sm:$0xff] }
  0xa0   : > { %v3220_v10 = vpack.i.bf16 %v331_v6, %v3533_v49 }
  0xa1   : > { %3211 = vrot.lane.b32.xlu0 %v3210_v2, %s3437_s24  ;;  %3191 = vrot.lane.b32.xlu1 %v3190_v3, %s3437_s24 }
  0xa3   : > { %v334_v5 = vld [vmem:[#allocation2 + $0x58] sm:$0xff] }
  0xa4   : > { %v3225_v7 = vpack.i.bf16 %v334_v5, %v3552_v60  ;;  %v3571_v8 = vpack.c.bf16 %v334_v5, %v331_v6  ;;  %v3852_v60 = vld [vmem:[%s4269_s1] sm:$0xff] }
  0xa5   : > { %3201 = vrot.lane.b32.xlu1 %v3190_v3, %s3438_s25 }
  0xa6   : > { %3226 = vrot.lane.b32.xlu0 %v3225_v7, %s3437_s24 }
  0xa9   : > { %3216 = vrot.lane.b32.xlu1 %v3215_v9, %s3437_s24 }
  0xaa   : > { %3231 = vrot.lane.b32.xlu0 %v3210_v2, %s3438_s25 }
  0xad   : > { %3221 = vrot.lane.b32.xlu1 %v3220_v10, %s3437_s24 }
  0xae   : > { %3246 = vrot.lane.b32.xlu0 %v3225_v7, %s3438_s25 }
  0xb1   : > { %3236 = vrot.lane.b32.xlu1 %v3215_v9, %s3438_s25 }
  0xb2   : > { %3251 = vrot.lane.b32.xlu0 %v3210_v2, %s3439_s26 }
  0xb5   : > { %3241 = vrot.lane.b32.xlu1 %v3220_v10, %s3438_s25 }
  0xb6   : > { %3266 = vrot.lane.b32.xlu0 %v3225_v7, %s3439_s26 }
  0xb9   : > { %3256 = vrot.lane.b32.xlu1 %v3215_v9, %s3439_s26 }
  0xba   : > { %3276 = vrot.lane.b32.xlu0 %v3538_v50, %s3440_s27 }
  0xbd   : > { %3261 = vrot.lane.b32.xlu1 %v3220_v10, %s3439_s26 }
  0xbe   : > { %3281 = vrot.lane.b32.xlu0 %v3210_v2, %s3440_s27 }
  0xc1   : > { %3271 = vrot.lane.b32.xlu1 %v3190_v3, %s3439_s26 }
  0xc2   : > { %3296 = vrot.lane.b32.xlu0 %v3225_v7, %s3440_s27 }
  0xc5   : > { %3286 = vrot.lane.b32.xlu1 %v3215_v9, %s3440_s27 }
  0xc6   : > { %3306 = vrot.lane.b32.xlu0 %v3538_v50, %s3441_s28 }
  0xc9   : > { %3291 = vrot.lane.b32.xlu1 %v3220_v10, %s3440_s27 }
  0xca   : > { %3311 = vrot.lane.b32.xlu0 %v3210_v2, %s3441_s28 }
  0xcd   : > { %3301 = vrot.lane.b32.xlu1 %v3190_v3, %s3440_s27 }
  0xce   : > { %3326 = vrot.lane.b32.xlu0 %v3225_v7, %s3441_s28 }
  0xd1   : > { %3316 = vrot.lane.b32.xlu1 %v3215_v9, %s3441_s28 }
  0xd2   : > { %3336 = vrot.lane.b32.xlu0 %v3538_v50, %s3442_s29 }
  0xd5   : > { %3321 = vrot.lane.b32.xlu1 %v3220_v10, %s3441_s28 }
  0xd6   : > { %3341 = vrot.lane.b32.xlu0 %v3210_v2, %s3442_s29 }
  0xd9   : > { %3331 = vrot.lane.b32.xlu1 %v3190_v3, %s3441_s28 }
  0xda   : > { %3356 = vrot.lane.b32.xlu0 %v3225_v7, %s3442_s29 }
  0xdd   : > { %3346 = vrot.lane.b32.xlu1 %v3215_v9, %s3442_s29 }
  0xde   : > { %3366 = vrot.lane.b32.xlu0 %v3538_v50, %s3443_s30 }
  0xe1   : > { %3351 = vrot.lane.b32.xlu1 %v3220_v10, %s3442_s29 }
  0xe2   : > { %3371 = vrot.lane.b32.xlu0 %v3210_v2, %s3443_s30 }
  0xe5   : > { %3361 = vrot.lane.b32.xlu1 %v3190_v3, %s3442_s29 }
  0xe6   : > { %3386 = vrot.lane.b32.xlu0 %v3225_v7, %s3443_s30 }
  0xe9   : > { %3376 = vrot.lane.b32.xlu1 %v3215_v9, %s3443_s30 }
  0xea   : > { %3396 = vrot.lane.b32.xlu0 %v3538_v50, %s3444_s5 }
  0xed   : > { %3381 = vrot.lane.b32.xlu1 %v3220_v10, %s3443_s30 }
  0xee   : > { %3401 = vrot.lane.b32.xlu0 %v3210_v2, %s3444_s5 }
  0xf1   : > { %3391 = vrot.lane.b32.xlu1 %v3190_v3, %s3443_s30 }
  0xf2   : > { %3416 = vrot.lane.b32.xlu0 %v3225_v7, %s3444_s5 }
  0xf5   : > { %3406 = vrot.lane.b32.xlu1 %v3215_v9, %s3444_s5 }
  0xf6   : > { %2516 = vperm.xlu0 %3425, %v2510_v18  }
  0xf9   : > { %3411 = vrot.lane.b32.xlu1 %v3220_v10, %s3444_s5 }
  0xfa   : > { %2531 = vperm.xlu0 %3425, %v2513_v24  }
  0xfd   : > { %3421 = vrot.lane.b32.xlu1 %v3190_v3, %s3444_s5 }
 0x101   : > { %2521 = vperm.xlu1 %3426, %v2511_v19  }
 0x105   : > { %2526 = vperm.xlu1 %3426, %v2512_v25  }
 0x107   : > { %v3187_v11 = vpop.permute.xlu0 %3186 }
 0x108   : > { %v3189_v26 = vunpack.i.h.bf16 %v3187_v11  ;;  %v3188_v27 = vunpack.i.l.bf16 %v3187_v11 }
 0x10b   : > { %v3588_v12 = vpop.permute.xlu0 %3196 }
 0x10c   : > { %v3199_v3 = vunpack.i.h.bf16 %v3588_v12  ;;  %v3198_v5 = vunpack.i.l.bf16 %v3588_v12  ;;  %v3657_v12 = vld [vmem:[%s4269_s1 + $0x40] sm:$0xff] }
 0x10f   : > { %v3590_v13 = vpop.permute.xlu0 %3206 }
 0x113   : > { %v3192_v14 = vpop.permute.xlu1 %3191  ;;  %v3592_v15 = vpop.permute.xlu0 %3211 }
 0x114   : > { %v3214_v20 = vunpack.i.h.bf16 %v3592_v15  ;;  %v3213_v21 = vunpack.i.l.bf16 %v3592_v15  ;;  %v3194_v37 = vunpack.i.h.bf16 %v3192_v14  ;;  %v3193_v43 = vunpack.i.l.bf16 %v3192_v14 }
 0x116   : > { %v805_v33 = vsel %vm803_vm4, %v3213_v21, %v3214_v20  ;;  %v804_v35 = vsel %vm803_vm4, %v3188_v27, %v3213_v21 }
 0x117   : > { %v3594_v16 = vpop.permute.xlu1 %3201 }
 0x118   : > { %v3596_v17 = vpop.permute.xlu0 %3226  ;;  %v3203_v27 = vunpack.i.l.bf16 %v3594_v16 }
 0x119   : > { %v3229_v31 = vunpack.i.h.bf16 %v3596_v17  ;;  %v3228_v32 = vunpack.i.l.bf16 %v3596_v17 }
 0x11b   : > { %v3606_v23 = vpop.permute.xlu1 %3216  ;;  %v811_v52 = vsel %vm803_vm4, %v3228_v32, %v3229_v31  ;;  %v810_v53 = vsel %vm803_vm4, %v3194_v37, %v3228_v32 }
 0x11c   : > { %v3219_v28 = vunpack.i.h.bf16 %v3606_v23  ;;  %v3218_v29 = vunpack.i.l.bf16 %v3606_v23  ;;  %v3616_v30 = vpop.permute.xlu0 %3231 }
 0x11d   : > { %v3234_v54 = vunpack.i.h.bf16 %v3616_v30  ;;  %v3233_v55 = vunpack.i.l.bf16 %v3616_v30 }
 0x11e   : > { %v807_v34 = vsel %vm803_vm4, %v3218_v29, %v3219_v28  ;;  %v806_v36 = vsel %vm803_vm4, %v3189_v26, %v3218_v29  ;;  %v3204_v26 = vunpack.i.h.bf16 %v3594_v16 }
 0x11f   : > { %v3628_v39 = vpop.permute.xlu1 %3221  ;;  %v2957_v40 = vpack.c.bf16 %v807_v34, %v805_v33  ;;  %v2959_v41 = vpack.c.bf16 %v806_v36, %v804_v35  ;;  %v382_v14 = vsel %vm380_vm5, %v3233_v55, %v3234_v54  ;;  %v381_v19 = vsel %vm380_vm5, %v3198_v5, %v3233_v55 }
 0x120   : > { %v3224_v46 = vunpack.i.h.bf16 %v3628_v39  ;;  %v3223_v47 = vunpack.i.l.bf16 %v3628_v39  ;;  %v3632_v50 = vpop.permute.xlu0 %3246 }
 0x121   : > { %2958 = vmatprep.subr.bf16.mxu0 %v2957_v40  ;;  %v3249_v10 = vunpack.i.h.bf16 %v3632_v50  ;;  %v3248_v11 = vunpack.i.l.bf16 %v3632_v50  ;;  %v3675_v40 = vld [vmem:[%s4269_s1 + $0x48] sm:$0xff] }
 0x122   : > { %2960 = vmatpush1.bf16.msra.mxu0 %v2959_v41  ;;  %v809_v56 = vsel %vm803_vm4, %v3223_v47, %v3224_v46  ;;  %v808_v58 = vsel %vm803_vm4, %v3193_v43, %v3223_v47  ;;  %v3208_v41 = vunpack.i.l.bf16 %v3590_v13 }
 0x123   : > { %v3237_v59 = vpop.permute.xlu1 %3236  ;;  %v2961_v61 = vpack.c.bf16 %v811_v52, %v809_v56  ;;  %v2963_v2 = vpack.c.bf16 %v810_v53, %v808_v58  ;;  %v388_v35 = vsel %vm380_vm5, %v3248_v11, %v3249_v10  ;;  %v387_v37 = vsel %vm380_vm5, %v3204_v26, %v3248_v11 }
 0x124   : > { %v3239_v6 = vunpack.i.h.bf16 %v3237_v59  ;;  %v3238_v7 = vunpack.i.l.bf16 %v3237_v59  ;;  %v3646_v9 = vpop.permute.xlu0 %3251  ;;  %v3209_v52 = vunpack.i.h.bf16 %v3590_v13 }
 0x125   : > { %2962 = vmatprep.subr.bf16.mxu0 %v2961_v61  ;;  %v3254_v33 = vunpack.i.h.bf16 %v3646_v9  ;;  %v3253_v34 = vunpack.i.l.bf16 %v3646_v9 }
 0x126   : > { %2964 = vmatpush1.bf16.msra.mxu0 %v2963_v2  ;;  %v384_v18 = vsel %vm380_vm5, %v3238_v7, %v3239_v6  ;;  %v383_v21 = vsel %vm380_vm5, %v3199_v3, %v3238_v7  ;;  %v2933_v58 = vpack.c.bf16 %v3239_v6, %v3234_v54  ;;  %v3697_v54 = vld [vmem:[%s4269_s1 + $0x20] sm:$0xff] }
 0x127   : > { %v3242_v22 = vpop.permute.xlu1 %3241  ;;  %v2925_v24 = vpack.c.bf16 %v384_v18, %v382_v14  ;;  %v2927_v25 = vpack.c.bf16 %v383_v21, %v381_v19  ;;  %v1052_v59 = vsel %vm1051_vm7, %v3208_v41, %v3253_v34  ;;  %v1053_v61 = vsel %vm1051_vm7, %v3253_v34, %v3254_v33 }
 0x128   : > { %v3244_v29 = vunpack.i.h.bf16 %v3242_v22  ;;  %v3243_v30 = vunpack.i.l.bf16 %v3242_v22  ;;  %v3661_v32 = vpop.permute.xlu0 %3266  ;;  %v3714_v22 = vld [vmem:[%s4269_s1 + $0x50] sm:$0xff] }
 0x129   : > { %2926 = vmatprep.subr.bf16.mxu1 %v2925_v24  ;;  %2645 = vmatmul.mubr.msk.f32.vlgmr.msra.gmra.mrb[0].mxu0 %vm401_vm6, %v3657_v12  ;;  %v3269_v2 = vunpack.i.h.bf16 %v3661_v32  ;;  %v3268_v13 = vunpack.i.l.bf16 %v3661_v32  ;;  %v3719_v24 = vld [vmem:[%s4269_s1 + $0x28] sm:$0xff] }
 0x12a   : > { %2928 = vmatpush1.bf16.msra.mxu1 %v2927_v25  ;;  %v386_v36 = vsel %vm380_vm5, %v3243_v30, %v3244_v29  ;;  %v385_v16 = vsel %vm380_vm5, %v3203_v27, %v3243_v30  ;;  %906 = vmatprep.mubr.f32.mxu0 %v3435_v1  ;;  %v2937_v21 = vpack.c.bf16 %v3249_v10, %v3244_v29 }
 0x12b   : > { %v3678_v43 = vpop.permute.xlu1 %3256  ;;  %v2929_v47 = vpack.c.bf16 %v388_v35, %v386_v36  ;;  %v2931_v50 = vpack.c.bf16 %v387_v37, %v385_v16  ;;  %v1059_v25 = vsel %vm1051_vm7, %v3268_v13, %v3269_v2  ;;  %v3739_v16 = vld [vmem:[%s4269_s1 + $0x58] sm:$0xff] }
 0x12c   : > { %v3259_v53 = vunpack.i.h.bf16 %v3678_v43  ;;  %v3258_v55 = vunpack.i.l.bf16 %v3678_v43  ;;  %v3683_v56 = vpop.permute.xlu0 %3276 }
 0x12d   : > { %2930 = vmatprep.subr.bf16.mxu1 %v2929_v47  ;;  %2646 = vmatmul.mubr.msk.f32.gmra.mrb[2].mxu0 %vm401_vm6, %v3675_v40  ;;  %v2623_v47 = vld [vmem:[%s4269_s1 + $0x30] sm:$0xff] }
 0x12e   : > { %v1054_v3 = vsel %vm1051_vm7, %v3209_v52, %v3258_v55  ;;  %2932 = vmatpush1.bf16.msra.mxu1 %v2931_v50  ;;  %v1055_v5 = vsel %vm1051_vm7, %v3258_v55, %v3259_v53  ;;  %912 = vmatprep.mubr.f32.mxu0 %v3435_v1  ;;  %v3278_v50 = vunpack.i.l.bf16 %v3683_v56 }
 0x12f   : > { %v2975_v6 = vpack.c.bf16 %v1054_v3, %v1052_v59  ;;  %v3703_v7 = vpop.permute.xlu1 %3261  ;;  %2934 = vmatprep.subr.bf16.mxu1 %v2933_v58  ;;  %v2973_v11 = vpack.c.bf16 %v1055_v5, %v1053_v61 }
 0x130   : > { %v3264_v14 = vunpack.i.h.bf16 %v3703_v7  ;;  %v3263_v18 = vunpack.i.l.bf16 %v3703_v7  ;;  %v3707_v19 = vpop.permute.xlu0 %3281  ;;  %v4056_v7 = vld [vmem:[%s4269_s1 + $0xb8] sm:$0xff] }
 0x131   : > { %2625 = vmatmul.mubr.msk.f32.vlgmr.msra.gmra.mrb[0].mxu1 %vm401_vm6, %v3697_v54  ;;  %2974 = vmatprep.subr.bf16.mxu0 %v2973_v11  ;;  %v3284_v35 = vunpack.i.h.bf16 %v3707_v19  ;;  %v3283_v36 = vunpack.i.l.bf16 %v3707_v19 }
 0x132   : > { %2936 = vmatpush3.bf16.msra.mxu1 %v2933_v58  ;;  %2976 = vmatpush1.bf16.msra.mxu0 %v2975_v6  ;;  %v1057_v10 = vsel %vm1051_vm7, %v3263_v18, %v3264_v14  ;;  %v3279_v58 = vunpack.i.h.bf16 %v3683_v56  ;;  %v2624_v6 = vld [vmem:[%s4269_s1 + $0x38] sm:$0xff] }
 0x133   : > { %v3272_v26 = vpop.permute.xlu1 %3271  ;;  %2938 = vmatprep.subr.bf16.mxu1 %v2937_v21  ;;  %484 = vmatprep.mubr.f32.mxu1 %v3435_v1  ;;  %v2977_v27 = vpack.c.bf16 %v1059_v25, %v1057_v10  ;;  %v1300_v3 = vsel %vm1299_vm8, %v3278_v50, %v3283_v36  ;;  %v1301_v42 = vsel %vm1299_vm8, %v3283_v36, %v3284_v35 }
 0x134   : > { %v3274_v29 = vunpack.i.h.bf16 %v3272_v26  ;;  %v3273_v30 = vunpack.i.l.bf16 %v3272_v26  ;;  %v3728_v34 = vpop.permute.xlu0 %3296  ;;  %2647 = vmatmul.mubr.msk.f32.gmra.mrb[4].mxu0 %vm401_vm6, %v3714_v22 }
 0x135   : > { %2626 = vmatmul.mubr.msk.f32.gmra.mrb[2].mxu1 %vm401_vm6, %v3719_v24  ;;  %2978 = vmatprep.subr.bf16.mxu0 %v2977_v27  ;;  %v3298_v56 = vunpack.i.l.bf16 %v3728_v34 }
 0x136   : > { %v1056_v37 = vsel %vm1051_vm7, %v3273_v30, %v3263_v18  ;;  %v1058_v41 = vsel %vm1051_vm7, %v3274_v29, %v3268_v13  ;;  %2940 = vmatpush3.bf16.msra.mxu1 %v2937_v21  ;;  %918 = vmatprep.mubr.f32.mxu0 %v3435_v1  ;;  %v3794_v29 = vld [vmem:[%s4269_s1 + $0x68] sm:$0xff] }
 0x137   : > { %v2979_v52 = vpack.c.bf16 %v1058_v41, %v1056_v37  ;;  %v3748_v55 = vpop.permute.xlu1 %3286  ;;  %2942 = vmatprep.subr.bf16.mxu1 %v2941_v45  ;;  %490 = vmatprep.mubr.f32.mxu1 %v3435_v1  ;;  %v3299_v45 = vunpack.i.h.bf16 %v3728_v34 }
 0x138   : > { %v3289_v59 = vunpack.i.h.bf16 %v3748_v55  ;;  %v3288_v61 = vunpack.i.l.bf16 %v3748_v55  ;;  %v3757_v13 = vpop.permute.xlu0 %3306  ;;  %2648 = vmatmul.mubr.msk.f32.gmra.mrb[6].mxu0 %vm401_vm6, %v3739_v16 }
 0x139   : > { %2627 = vmatmul.mubr.msk.f32.gmra.mrb[4].mxu1 %vm401_vm6, %v2623_v47  ;;  %2980 = vmatpush1.bf16.msra.mxu0 %v2979_v52  ;;  %v1307_v36 = vsel %vm1299_vm8, %v3298_v56, %v3299_v45  ;;  %v3309_v44 = vunpack.i.h.bf16 %v3757_v13  ;;  %v3308_v0 = vunpack.i.l.bf16 %v3757_v13 }
 0x13a   : > { %v1302_v5 = vsel %vm1299_vm8, %v3279_v58, %v3288_v61  ;;  %1148 = vmatprep.mubr.f32.mxu0 %v3435_v1  ;;  %496 = vmatprep.mubr.f32.mxu1 %v3435_v1  ;;  %v1303_v11 = vsel %vm1299_vm8, %v3288_v61, %v3289_v59  ;;  %v3814_v61 = vld [vmem:[%s4269_s1 + $0x70] sm:$0xff]  ;;  %v2997_v32 = vpack.c.bf16 %v3289_v59, %v3284_v35 }
 0x13b   : > { %v2991_v18 = vpack.c.bf16 %v1302_v5, %v1300_v3  ;;  %v3782_v21 = vpop.permute.xlu1 %3291  ;;  %v2989_v10 = vpack.c.bf16 %v1303_v11, %v1301_v42 }
 0x13c   : > { %v3294_v25 = vunpack.i.h.bf16 %v3782_v21  ;;  %v3293_v26 = vunpack.i.l.bf16 %v3782_v21  ;;  %v3786_v27 = vpop.permute.xlu0 %3311  ;;  %2657 = vmatmul.mubr.msk.f32.vlgmr.msra.gmra.mrb[0].mxu0 %vm401_vm6, %v3766_v38 }
 0x13d   : > { %2628 = vmatmul.mubr.msk.f32.gmra.mrb[6].mxu1 %vm401_vm6, %v2624_v6  ;;  %2990 = vmatprep.subr.bf16.mxu0 %v2989_v10  ;;  %v3314_v3 = vunpack.i.h.bf16 %v3786_v27 }
 0x13e   : > { %2992 = vmatpush1.bf16.msra.mxu0 %v2991_v18  ;;  %1154 = vmatprep.mubr.f32.mxu0 %v3435_v1  ;;  %v1305_v30 = vsel %vm1299_vm8, %v3293_v26, %v3294_v25 }
 0x13f   : > { %v3302_v37 = vpop.permute.xlu1 %3301  ;;  %2807 = vmatprep.mubr.msk.f32.mxu1 %vm401_vm6, %v3697_v54  ;;  %v2993_v41 = vpack.c.bf16 %v1307_v36, %v1305_v30  ;;  %v3313_v54 = vunpack.i.l.bf16 %v3786_v27 }
 0x140   : > { %v3304_v50 = vunpack.i.h.bf16 %v3302_v37  ;;  %v3303_v52 = vunpack.i.l.bf16 %v3302_v37  ;;  %v3805_v58 = vpop.permute.xlu0 %3326  ;;  %2658 = vmatmul.mubr.msk.f32.gmra.mrb[2].mxu0 %vm401_vm6, %v3794_v29  ;;  %v3877_v37 = vld [vmem:[%s4269_s1 + $0x80] sm:$0xff] }
 0x141   : > { %2808 = vmatmul.mubr.msk.f32.vlgmr.msra.gmra.mrb[8].mxu1 %vm401_vm6, %v3719_v24  ;;  %2994 = vmatprep.subr.bf16.mxu0 %v2993_v41  ;;  %v4275_v49 = vunpack.i.h.bf16 %v3805_v58  ;;  %v1548_v13 = vsel %vm1547_vm9, %v3308_v0, %v3313_v54  ;;  %v3885_v41 = vld [vmem:[%s4269_s1 + $0x8] sm:$0xff] }
 0x142   : > { %v1304_v42 = vsel %vm1299_vm8, %v3303_v52, %v3293_v26  ;;  %v1306_v5 = vsel %vm1299_vm8, %v3304_v50, %v3298_v56  ;;  %2944 = vmatpush1.bf16.msra.mxu1 %v2943_v51  ;;  %1160 = vmatprep.mubr.f32.mxu0 %v3435_v1  ;;  %v3328_v51 = vunpack.i.l.bf16 %v3805_v58 }
 0x143   : > { %v2995_v24 = vpack.c.bf16 %v1306_v5, %v1304_v42  ;;  %2946 = vmatprep.subr.bf16.mxu1 %v2945_v63  ;;  %v3827_v11 = vpop.permute.xlu1 %3316  ;;  %2810 = vmatprep.mubr.msk.f32.mxu1 %vm401_vm6, %v2623_v47  ;;  %v1549_v63 = vsel %vm1547_vm9, %v3313_v54, %v3314_v3 }
 0x144   : > { %v4277_v18 = vunpack.i.h.bf16 %v3827_v11  ;;  %v3318_v56 = vunpack.i.l.bf16 %v3827_v11  ;;  %v3832_v10 = vpop.permute.xlu0 %3336  ;;  %2659 = vmatmul.mubr.msk.f32.gmra.mrb[4].mxu0 %vm401_vm6, %v3814_v61  ;;  %v1555_v52 = vsel %vm1547_vm9, %v3328_v51, %v4275_v49 }
 0x145   : > { %2811 = vmatmul.mubr.msk.f32.gmra.mrb[10].mxu1 %vm401_vm6, %v2624_v6  ;;  %2996 = vmatpush1.bf16.msra.mxu0 %v2995_v24 }
 0x146   : > { %2948 = vmatpush1.bf16.msra.mxu1 %v2947_v4  ;;  %1166 = vmatprep.mubr.f32.mxu0 %v3435_v1  ;;  %v1551_v47 = vsel %vm1547_vm9, %v3318_v56, %v4277_v18  ;;  %v1550_v4 = vsel %vm1547_vm9, %v3309_v44, %v3318_v56  ;;  %v2965_v44 = vpack.c.bf16 %v3219_v28, %v3214_v20  ;;  %v337_v20 = vld [vmem:[%s4269_s1 + $0x10] sm:$0xff] }
 0x147   : > { %2950 = vmatprep.subr.bf16.mxu1 %v3547_v57  ;;  %v3861_v6 = vpop.permute.xlu1 %3321  ;;  %664 = vmatprep.mubr.f32.mxu1 %v3435_v1  ;;  %v3005_v62 = vpack.c.bf16 %v1551_v47, %v1549_v63  ;;  %v3007_v42 = vpack.c.bf16 %v1550_v4, %v1548_v13  ;;  %v3908_v63 = vld [vmem:[%s4269_s1 + $0x88] sm:$0xff]  ;;  %v2969_v18 = vpack.c.bf16 %v3229_v31, %v3224_v46 }
 0x148   : > { %v4276_v26 = vunpack.i.h.bf16 %v3861_v6  ;;  %v3323_v30 = vunpack.i.l.bf16 %v3861_v6  ;;  %v3868_v36 = vpop.permute.xlu0 %3341  ;;  %2660 = vmatmul.mubr.msk.f32.gmra.mrb[6].mxu0 %vm401_vm6, %v3841_v48 }
 0x149   : > { %2633 = vmatmul.mubr.msk.f32.vlgmr.msra.gmra.mrb[0].mxu1 %vm401_vm6, %v3852_v60  ;;  %3006 = vmatprep.subr.bf16.mxu0 %v3005_v62  ;;  %v4274_v47 = vunpack.i.h.bf16 %v3868_v36  ;;  %v3343_v62 = vunpack.i.l.bf16 %v3868_v36 }
 0x14a   : > { %2952 = vmatpush3.bf16.msra.mxu1 %v3547_v57  ;;  %1396 = vmatprep.mubr.f32.mxu0 %v3435_v1  ;;  %v1553_v50 = vsel %vm1547_vm9, %v3323_v30, %v4276_v26 }
 0x14b   : > { %2954 = vmatprep.subr.bf16.mxu1 %v3571_v8  ;;  %v3332_v54 = vpop.permute.xlu1 %3331  ;;  %670 = vmatprep.mubr.f32.mxu1 %v3435_v1  ;;  %v3009_v57 = vpack.c.bf16 %v1555_v52, %v1553_v50  ;;  %v1797_v50 = vsel %vm1795_vm10, %v3343_v62, %v4274_v47 }
 0x14c   : > { %v3334_v5 = vunpack.i.h.bf16 %v3332_v54  ;;  %v3333_v24 = vunpack.i.l.bf16 %v3332_v54  ;;  %v3895_v56 = vpop.permute.xlu0 %3356  ;;  %2669 = vmatmul.mubr.msk.f32.vlgmr.msra.gmra.mrb[0].mxu0 %vm401_vm6, %v3877_v37 }
 0x14d   : > { %3008 = vmatpush1.bf16.msra.mxu0 %v3007_v42  ;;  %2634 = vmatmul.mubr.msk.f32.gmra.mrb[2].mxu1 %vm401_vm6, %v3885_v41 }
 0x14e   : > { %v1552_v0 = vsel %vm1547_vm9, %v3333_v24, %v3323_v30  ;;  %v1554_v15 = vsel %vm1547_vm9, %v3334_v5, %v3328_v51  ;;  %2956 = vmatpush3.bf16.msra.mxu1 %v3571_v8  ;;  %3010 = vmatprep.subr.bf16.mxu0 %v3009_v57  ;;  %v3932_v8 = vld [vmem:[%s4269_s1 + $0x90] sm:$0xff]  ;;  %v338_v51 = vld [vmem:[%s4269_s1 + $0x18] sm:$0xff] }
 0x14f   : > { %v3011_v23 = vpack.c.bf16 %v1554_v15, %v1552_v0  ;;  %2966 = vmatprep.subr.bf16.mxu1 %v2965_v44  ;;  %v3918_v28 = vpop.permute.xlu1 %3346  ;;  %1402 = vmatprep.mubr.f32.mxu0 %v3435_v1  ;;  %v3955_v24 = vld [vmem:[%s4269_s1 + $0x98] sm:$0xff]  ;;  %v3339_v0 = vunpack.i.h.bf16 %v3832_v10  ;;  %v3359_v15 = vunpack.i.h.bf16 %v3895_v56 }
 0x150   : > { %v4273_v4 = vunpack.i.h.bf16 %v3918_v28  ;;  %v3348_v30 = vunpack.i.l.bf16 %v3918_v28  ;;  %v3923_v13 = vpop.permute.xlu0 %3366  ;;  %676 = vmatprep.mubr.f32.mxu1 %v3435_v1  ;;  %2670 = vmatmul.mubr.msk.f32.gmra.mrb[2].mxu0 %vm401_vm6, %v3908_v63 }
 0x151   : > { %2635 = vmatmul.mubr.msk.f32.gmra.mrb[4].mxu1 %vm401_vm6, %v337_v20  ;;  %3012 = vmatpush1.bf16.msra.mxu0 %v3011_v23  ;;  %v3358_v23 = vunpack.i.l.bf16 %v3895_v56 }
 0x152   : > { %1408 = vmatprep.mubr.f32.mxu0 %v3435_v1  ;;  %682 = vmatprep.mubr.f32.mxu1 %v3435_v1  ;;  %v1799_v52 = vsel %vm1795_vm10, %v3348_v30, %v4273_v4  ;;  %v1798_v4 = vsel %vm1795_vm10, %v3339_v0, %v3348_v30 }
 0x153   : > { %v3945_v42 = vpop.permute.xlu1 %3351  ;;  %v3021_v54 = vpack.c.bf16 %v1799_v52, %v1797_v50  ;;  %v3338_v52 = vunpack.i.l.bf16 %v3832_v10  ;;  %v3982_v10 = vld [vmem:[%s4269_s1 + $0xa0] sm:$0xff]  ;;  %v1803_v17 = vsel %vm1795_vm10, %v3358_v23, %v3359_v15 }
 0x154   : > { %v3354_v57 = vunpack.i.h.bf16 %v3945_v42  ;;  %v3353_v5 = vunpack.i.l.bf16 %v3945_v42  ;;  %2671 = vmatmul.mubr.msk.f32.gmra.mrb[4].mxu0 %vm401_vm6, %v3932_v8  ;;  %v3960_v50 = vpop.permute.xlu0 %3371 }
 0x155   : > { %2636 = vmatmul.mubr.msk.f32.gmra.mrb[6].mxu1 %vm401_vm6, %v338_v51  ;;  %3022 = vmatprep.subr.bf16.mxu0 %v3021_v54  ;;  %v3374_v30 = vunpack.i.h.bf16 %v3960_v50  ;;  %v3373_v0 = vunpack.i.l.bf16 %v3960_v50 }
 0x156   : > { %1414 = vmatprep.mubr.f32.mxu0 %v3435_v1  ;;  %2821 = vmatprep.mubr.msk.f32.mxu1 %vm401_vm6, %v3852_v60  ;;  %v1801_v26 = vsel %vm1795_vm10, %v3353_v5, %v3354_v57  ;;  %v1796_v60 = vsel %vm1795_vm10, %v3338_v52, %v3343_v62 }
 0x157   : > { %v3362_v54 = vpop.permute.xlu1 %3361  ;;  %v3023_v31 = vpack.c.bf16 %v1798_v4, %v1796_v60  ;;  %v3025_v46 = vpack.c.bf16 %v1803_v17, %v1801_v26  ;;  %v2981_v4 = vpack.c.bf16 %v3259_v53, %v3254_v33  ;;  %v2045_v26 = vsel %vm2043_vm11, %v3373_v0, %v3374_v30 }
 0x158   : > { %v3364_v47 = vunpack.i.h.bf16 %v3362_v54  ;;  %v3363_v49 = vunpack.i.l.bf16 %v3362_v54  ;;  %2672 = vmatmul.mubr.msk.f32.gmra.mrb[6].mxu0 %vm401_vm6, %v3955_v24  ;;  %v3995_v52 = vpop.permute.xlu0 %3386 }
 0x159   : > { %2822 = vmatmul.mubr.msk.f32.vlgmr.msra.gmra.mrb[8].mxu1 %vm401_vm6, %v3885_v41  ;;  %1644 = vmatprep.mubr.f32.mxu0 %v3435_v1  ;;  %v3389_v19 = vunpack.i.h.bf16 %v3995_v52 }
 0x15a   : > { %2968 = vmatpush3.bf16.msra.mxu1 %v2965_v44  ;;  %2824 = vmatprep.mubr.msk.f32.mxu1 %vm401_vm6, %v337_v20  ;;  %v1800_v41 = vsel %vm1795_vm10, %v3363_v49, %v3353_v5  ;;  %v1802_v62 = vsel %vm1795_vm10, %v3364_v47, %v3358_v23  ;;  %v4009_v49 = vld [vmem:[%s4269_s1 + $0xa8] sm:$0xff]  ;;  %v4035_v47 = vld [vmem:[%s4269_s1 + $0xb0] sm:$0xff] }
 0x15b   : > { %2970 = vmatprep.subr.bf16.mxu1 %v2969_v18  ;;  %v3991_v39 = vpop.permute.xlu1 %3376  ;;  %v3027_v33 = vpack.c.bf16 %v1802_v62, %v1800_v41  ;;  %v4111_v62 = vld [vmem:[%s4269_s1 + $0xc8] sm:$0xff] }
 0x15c   : > { %v3379_v44 = vunpack.i.h.bf16 %v3991_v39  ;;  %v3378_v20 = vunpack.i.l.bf16 %v3991_v39  ;;  %2681 = vmatmul.mubr.msk.f32.vlgmr.msra.gmra.mrb[0].mxu0 %vm401_vm6, %v3982_v10 }
 0x15d   : > { %3024 = vmatpush1.bf16.msra.mxu0 %v3023_v31  ;;  %2825 = vmatmul.mubr.msk.f32.gmra.mrb[10].mxu1 %vm401_vm6, %v338_v51  ;;  %v4037_v51 = vpop.permute.xlu0 %3396 }
 0x15e   : > { %2972 = vmatpush3.bf16.msra.mxu1 %v2969_v18  ;;  %3026 = vmatprep.subr.bf16.mxu0 %v3025_v46  ;;  %v2047_v9 = vsel %vm2043_vm11, %v3378_v20, %v3379_v44  ;;  %v2985_v18 = vpack.c.bf16 %v3269_v2, %v3264_v14  ;;  %v3369_v14 = vunpack.i.h.bf16 %v3923_v13 }
 0x15f   : > { %2982 = vmatprep.subr.bf16.mxu1 %v2981_v4  ;;  %v4019_v43 = vpop.permute.xlu1 %3381  ;;  %1650 = vmatprep.mubr.f32.mxu0 %v3435_v1  ;;  %v3037_v53 = vpack.c.bf16 %v2047_v9, %v2045_v26  ;;  %v4280_v26 = vunpack.i.h.bf16 %v3805_v58  ;;  %v4281_v58 = vunpack.i.h.bf16 %v3868_v36 }
 0x160   : > { %2835 = vmatprep.mubr.msk.f32.mxu1 %vm401_vm6, %v3657_v12  ;;  %2682 = vmatmul.mubr.msk.f32.gmra.mrb[2].mxu0 %vm401_vm6, %v4009_v49  ;;  %v3383_v2 = vunpack.i.l.bf16 %v4019_v43  ;;  %v2046_v55 = vsel %vm2043_vm11, %v3369_v14, %v3378_v20 }
 0x161   : > { %3028 = vmatpush1.bf16.msra.mxu0 %v3027_v33  ;;  %2836 = vmatmul.mubr.msk.f32.vlgmr.msra.gmra.mrb[8].mxu1 %vm401_vm6, %v3675_v40  ;;  %v3384_v40 = vunpack.i.h.bf16 %v4019_v43  ;;  %v4067_v59 = vpop.permute.xlu0 %3401  ;;  %v2691_v33 = vld [vmem:[%s4269_s1 + $0xd0] sm:$0xff]  ;;  %v2713_v43 = vld [vmem:[%s4269_s1 + $0x100] sm:$0xff] }
 0x162   : > { %2984 = vmatpush3.bf16.msra.mxu1 %v2981_v4  ;;  %3038 = vmatprep.subr.bf16.mxu0 %v3037_v53 }
 0x163   : > { %2986 = vmatprep.subr.bf16.mxu1 %v2985_v18  ;;  %v3392_v12 = vpop.permute.xlu1 %3391  ;;  %1656 = vmatprep.mubr.f32.mxu0 %v3435_v1  ;;  %v2049_v21 = vsel %vm2043_vm11, %v3383_v2, %v3384_v40  ;;  %v3049_v50 = vpack.c.bf16 %v3389_v19, %v3384_v40  ;;  %v2714_v40 = vld [vmem:[%s4269_s1 + $0x108] sm:$0xff] }
 0x164   : > { %2838 = vmatprep.mubr.msk.f32.mxu1 %vm401_vm6, %v3714_v22  ;;  %2683 = vmatmul.mubr.msk.f32.gmra.mrb[4].mxu0 %vm401_vm6, %v4035_v47  ;;  %v3388_v22 = vunpack.i.l.bf16 %v3995_v52  ;;  %v3394_v5 = vunpack.i.h.bf16 %v3392_v12  ;;  %v3393_v23 = vunpack.i.l.bf16 %v3392_v12  ;;  %v2704_v52 = vld [vmem:[%s4269_s1 + $0xf8] sm:$0xff] }
 0x165   : > { %2839 = vmatmul.mubr.msk.f32.gmra.mrb[10].mxu1 %vm401_vm6, %v3739_v16  ;;  %1662 = vmatprep.mubr.f32.mxu0 %v3435_v1  ;;  %v3368_v16 = vunpack.i.l.bf16 %v3923_v13  ;;  %v4083_v13 = vld [vmem:[%s4269_s1 + $0xc0] sm:$0xff] }
 0x166   : > { %2988 = vmatpush3.bf16.msra.mxu1 %v2985_v18  ;;  %2849 = vmatprep.mubr.msk.f32.mxu1 %vm401_vm6, %v3766_v38  ;;  %v3001_v38 = vpack.c.bf16 %v3299_v45, %v3294_v25  ;;  %v3404_v25 = vunpack.i.h.bf16 %v4067_v59  ;;  %v2051_v17 = vsel %vm2043_vm11, %v3388_v22, %v3389_v19  ;;  %v2048_v31 = vsel %vm2043_vm11, %v3393_v23, %v3383_v2  ;;  %v2716_v19 = vld [vmem:[%s4269_s1 + $0x118] sm:$0xff] }
 0x167   : > { %2998 = vmatprep.subr.bf16.mxu1 %v2997_v32  ;;  %v4063_v35 = vpop.permute.xlu1 %3406  ;;  %v2044_v34 = vsel %vm2043_vm11, %v3368_v16, %v3373_v0  ;;  %v2050_v46 = vsel %vm2043_vm11, %v3394_v5, %v3388_v22  ;;  %v3041_v0 = vpack.c.bf16 %v2051_v17, %v2049_v21  ;;  %v3398_v2 = vunpack.i.l.bf16 %v4037_v51 }
 0x168   : > { %2684 = vmatmul.mubr.msk.f32.gmra.mrb[6].mxu0 %vm401_vm6, %v4056_v7  ;;  %v3409_v54 = vunpack.i.h.bf16 %v4063_v35  ;;  %v3408_v60 = vunpack.i.l.bf16 %v4063_v35  ;;  %v3039_v45 = vpack.c.bf16 %v2046_v55, %v2044_v34  ;;  %v3043_v4 = vpack.c.bf16 %v2050_v46, %v2048_v31 }
 0x169   : > { %2850 = vmatmul.mubr.msk.f32.vlgmr.msra.gmra.mrb[8].mxu1 %vm401_vm6, %v3794_v29  ;;  %1892 = vmatprep.mubr.f32.mxu0 %v3435_v1  ;;  %v3403_v29 = vunpack.i.l.bf16 %v4067_v59  ;;  %v3033_v16 = vpack.c.bf16 %v3359_v15, %v3354_v57  ;;  %v3045_v5 = vpack.c.bf16 %v3379_v44, %v3374_v30  ;;  %v2703_v30 = vld [vmem:[%s4269_s1 + $0xf0] sm:$0xff] }
 0x16a   : > { %3000 = vmatpush3.bf16.msra.mxu1 %v2997_v32  ;;  %2852 = vmatprep.mubr.msk.f32.mxu1 %vm401_vm6, %v3814_v61  ;;  %v4278_v61 = vunpack.i.h.bf16 %v3827_v11  ;;  %v2295_v20 = vsel %vm2291_vm12, %v3408_v60, %v3409_v54  ;;  %v3399_v32 = vunpack.i.h.bf16 %v4037_v51  ;;  %v3061_v39 = vpack.c.bf16 %v3409_v54, %v3404_v25 }
 0x16b   : > { %3002 = vmatprep.subr.bf16.mxu1 %v3001_v38  ;;  %v4116_v27 = vpop.permute.xlu1 %3411  ;;  %v2292_v55 = vsel %vm2291_vm12, %v3398_v2, %v3403_v29 }
 0x16c   : > { %2693 = vmatmul.mubr.msk.f32.vlgmr.msra.gmra.mrb[0].mxu0 %vm401_vm6, %v4083_v13  ;;  %v3013_v41 = vpack.c.bf16 %v4278_v61, %v3314_v3  ;;  %v2293_v3 = vsel %vm2291_vm12, %v3403_v29, %v3404_v25  ;;  %v3414_v53 = vunpack.i.h.bf16 %v4116_v27  ;;  %v3413_v18 = vunpack.i.l.bf16 %v4116_v27 }
 0x16d   : > { %3040 = vmatpush1.bf16.msra.mxu0 %v3039_v45  ;;  %2853 = vmatmul.mubr.msk.f32.gmra.mrb[10].mxu1 %vm401_vm6, %v3841_v48  ;;  %v3053_v11 = vpack.c.bf16 %v2295_v20, %v2293_v3  ;;  %v4279_v48 = vunpack.i.h.bf16 %v3861_v6  ;;  %v4282_v6 = vunpack.i.h.bf16 %v3918_v28 }
 0x16e   : > { %3004 = vmatpush3.bf16.msra.mxu1 %v3001_v38  ;;  %3042 = vmatprep.subr.bf16.mxu0 %v3041_v0  ;;  %v2297_v51 = vsel %vm2291_vm12, %v3413_v18, %v3414_v53 }
 0x16f   : > { %3014 = vmatprep.subr.bf16.mxu1 %v3013_v41  ;;  %1898 = vmatprep.mubr.f32.mxu0 %v3435_v1  ;;  %v3017_v9 = vpack.c.bf16 %v4280_v26, %v4279_v48  ;;  %v3422_v12 = vpop.permute.xlu1 %3421 }
 0x170   : > { %2863 = vmatprep.mubr.msk.f32.mxu1 %vm401_vm6, %v3877_v37  ;;  %2694 = vmatmul.mubr.msk.f32.gmra.mrb[2].mxu0 %vm401_vm6, %v4111_v62  ;;  %v4136_v37 = vpop.permute.xlu0 %3416  ;;  %v3424_v14 = vunpack.i.h.bf16 %v3422_v12  ;;  %v3423_v22 = vunpack.i.l.bf16 %v3422_v12 }
 0x171   : > { %3044 = vmatpush1.bf16.msra.mxu0 %v3043_v4  ;;  %2864 = vmatmul.mubr.msk.f32.vlgmr.msra.gmra.mrb[8].mxu1 %vm401_vm6, %v3908_v63  ;;  %v3029_v63 = vpack.c.bf16 %v4282_v6, %v4281_v58  ;;  %v3419_v36 = vunpack.i.h.bf16 %v4136_v37  ;;  %v3418_v28 = vunpack.i.l.bf16 %v4136_v37 }
 0x172   : > { %3016 = vmatpush3.bf16.msra.mxu1 %v3013_v41  ;;  %3054 = vmatprep.subr.bf16.mxu0 %v3053_v11  ;;  %v2296_v57 = vsel %vm2291_vm12, %v3423_v22, %v3413_v18 }
 0x173   : > { %3018 = vmatprep.subr.bf16.mxu1 %v3017_v9  ;;  %1904 = vmatprep.mubr.f32.mxu0 %v3435_v1  ;;  %v2299_v56 = vsel %vm2291_vm12, %v3418_v28, %v3419_v36  ;;  %v2298_v15 = vsel %vm2291_vm12, %v3424_v14, %v3418_v28  ;;  %v3065_v44 = vpack.c.bf16 %v3419_v36, %v3414_v53 }
 0x174   : > { %2866 = vmatprep.mubr.msk.f32.mxu1 %vm401_vm6, %v3932_v8  ;;  %2695 = vmatmul.mubr.msk.f32.gmra.mrb[4].mxu0 %vm401_vm6, %v2691_v33  ;;  %v2692_v8 = vld [vmem:[%s4269_s1 + $0xd8] sm:$0xff]  ;;  %v3059_v23 = vpack.c.bf16 %v2298_v15, %v2296_v57 }
 0x175   : > { %2867 = vmatmul.mubr.msk.f32.gmra.mrb[10].mxu1 %vm401_vm6, %v3955_v24  ;;  %1910 = vmatprep.mubr.f32.mxu0 %v3435_v1  ;;  %v2294_v24 = vsel %vm2291_vm12, %v3399_v32, %v3408_v60  ;;  %v2517_v25 = vpop.permute.xlu0 %2516 }
 0x176   : > { %3020 = vmatpush3.bf16.msra.mxu1 %v3017_v9  ;;  %2877 = vmatprep.mubr.msk.f32.mxu1 %vm401_vm6, %v3982_v10  ;;  %v2701_v10 = vld [vmem:[%s4269_s1 + $0xe0] sm:$0xff]  ;;  %v3055_v42 = vpack.c.bf16 %v2294_v24, %v2292_v55 }
 0x177   : > { %3030 = vmatprep.subr.bf16.mxu1 %v3029_v63 }
 0x178   : > { %2696 = vmatmul.mubr.msk.f32.gmra.mrb[6].mxu0 %vm401_vm6, %v2692_v8 }
 0x179   : > { %2878 = vmatmul.mubr.msk.f32.vlgmr.msra.gmra.mrb[8].mxu1 %vm401_vm6, %v4009_v49  ;;  %2140 = vmatprep.mubr.f32.mxu0 %v3435_v1  ;;  %v3057_v49 = vpack.c.bf16 %v2299_v56, %v2297_v51  ;;  %v2532_v26 = vpop.permute.xlu0 %2531 }
 0x17a   : > { %3032 = vmatpush3.bf16.msra.mxu1 %v3029_v63  ;;  %2880 = vmatprep.mubr.msk.f32.mxu1 %vm401_vm6, %v4035_v47  ;;  %v2702_v47 = vld [vmem:[%s4269_s1 + $0xe8] sm:$0xff] }
 0x17b   : > { %3034 = vmatprep.subr.bf16.mxu1 %v3033_v16 }
 0x17c   : > { %2705 = vmatmul.mubr.msk.f32.vlgmr.msra.gmra.mrb[0].mxu0 %vm401_vm6, %v2701_v10 }
 0x17d   : > { %3056 = vmatpush1.bf16.msra.mxu0 %v3055_v42  ;;  %2881 = vmatmul.mubr.msk.f32.gmra.mrb[10].mxu1 %vm401_vm6, %v4056_v7  ;;  %v2715_v7 = vld [vmem:[%s4269_s1 + $0x110] sm:$0xff] }
 0x17e   : > { %3036 = vmatpush3.bf16.msra.mxu1 %v3033_v16  ;;  %3058 = vmatprep.subr.bf16.mxu0 %v3057_v49 }
 0x17f   : > { %3046 = vmatprep.subr.bf16.mxu1 %v3045_v5  ;;  %2146 = vmatprep.mubr.f32.mxu0 %v3435_v1 }
 0x180   : > { %2891 = vmatprep.mubr.msk.f32.mxu1 %vm401_vm6, %v4083_v13  ;;  %2706 = vmatmul.mubr.msk.f32.gmra.mrb[2].mxu0 %vm401_vm6, %v2702_v47 }
 0x181   : > { %3060 = vmatpush1.bf16.msra.mxu0 %v3059_v23  ;;  %2892 = vmatmul.mubr.msk.f32.vlgmr.msra.gmra.mrb[8].mxu1 %vm401_vm6, %v4111_v62 }
 0x182   : > { %3048 = vmatpush3.bf16.msra.mxu1 %v3045_v5  ;;  %2152 = vmatprep.mubr.f32.mxu0 %v3435_v1 }
 0x183   : > { %3050 = vmatprep.subr.bf16.mxu1 %v3049_v50  ;;  %2894 = vmatprep.mubr.msk.f32.mxu1 %vm401_vm6, %v2691_v33 }
 0x184   : > { %2707 = vmatmul.mubr.msk.f32.gmra.mrb[4].mxu0 %vm401_vm6, %v2703_v30 }
 0x185   : > { %2895 = vmatmul.mubr.msk.f32.gmra.mrb[10].mxu1 %vm401_vm6, %v2692_v8  ;;  %2158 = vmatprep.mubr.f32.mxu0 %v3435_v1 }
 0x186   : > { %3052 = vmatpush3.bf16.msra.mxu1 %v3049_v50  ;;  %2905 = vmatprep.mubr.msk.f32.mxu1 %vm401_vm6, %v2701_v10 }
 0x187   : > { %3062 = vmatprep.subr.bf16.mxu1 %v3061_v39 }
 0x188   : > { %2708 = vmatmul.mubr.msk.f32.gmra.mrb[6].mxu0 %vm401_vm6, %v2704_v52 }
 0x189   : > { %2906 = vmatmul.mubr.msk.f32.vlgmr.msra.gmra.mrb[8].mxu1 %vm401_vm6, %v2702_v47  ;;  %2388 = vmatprep.mubr.f32.mxu0 %v3435_v1 }
 0x18a   : > { %3064 = vmatpush3.bf16.msra.mxu1 %v3061_v39  ;;  %2908 = vmatprep.mubr.msk.f32.mxu1 %vm401_vm6, %v2703_v30 }
 0x18b   : > { %3066 = vmatprep.subr.bf16.mxu1 %v3065_v44 }
 0x18c   : > { %2717 = vmatmul.mubr.msk.f32.vlgmr.msra.gmra.mrb[0].mxu0 %vm401_vm6, %v2713_v43 }
 0x18d   : > { %2909 = vmatmul.mubr.msk.f32.gmra.mrb[10].mxu1 %vm401_vm6, %v2704_v52  ;;  %2394 = vmatprep.mubr.f32.mxu0 %v3435_v1 }
 0x18e   : > { %3068 = vmatpush3.bf16.msra.mxu1 %v3065_v44  ;;  %2919 = vmatprep.mubr.msk.f32.mxu1 %vm401_vm6, %v2713_v43 }
 0x190   : > { %2718 = vmatmul.mubr.msk.f32.gmra.mrb[2].mxu0 %vm401_vm6, %v2714_v40 }
 0x191   : > { %2920 = vmatmul.mubr.msk.f32.vlgmr.msra.gmra.mrb[8].mxu1 %vm401_vm6, %v2714_v40  ;;  %2400 = vmatprep.mubr.f32.mxu0 %v3435_v1 }
 0x192   : > { %2922 = vmatprep.mubr.msk.f32.mxu1 %vm401_vm6, %v2715_v7 }
 0x194   : > { %2719 = vmatmul.mubr.msk.f32.gmra.mrb[4].mxu0 %vm401_vm6, %v2715_v7 }
 0x195   : > { %2923 = vmatmul.mubr.msk.f32.gmra.mrb[10].mxu1 %vm401_vm6, %v2716_v19  ;;  %2406 = vmatprep.mubr.f32.mxu0 %v3435_v1  ;;  %v2522_v1 = vpop.permute.xlu1 %2521 }
 0x198   : > { %2720 = vmatmul.mubr.msk.f32.gmra.mrb[6].mxu0 %vm401_vm6, %v2716_v19 }
 0x199   : > { %v2527_v37 = vpop.permute.xlu1 %2526 }
 0x21c   : > { %v666_v35 = vpop.f32.mrb[0].mxu1 }
 0x21d   : > { %v668_v59 = vpop.f32.mrb[1].mxu1 }
 0x220   : > { %v672_v38 = vpop.f32.mrb[2].mxu1 }
 0x221   : > { %v674_v54 = vpop.f32.mrb[3].mxu1 }
 0x224   : > { %v678_v60 = vpop.f32.mrb[4].mxu1 }
 0x225   : > { %v680_v13 = vpop.f32.mrb[5].mxu1 }
 0x228   : > { %v684_v21 = vpop.f32.mrb[6].mxu1 }
 0x229   : > { %v686_v34 = vpop.f32.mrb[7].mxu1 }
 0x25f   : > { %v2390_v45 = vpop.f32.mrb[0].mxu0 }
 0x260   : > { %v3069_v29 = vadd.f32 %v2390_v45, %v666_v35  ;;  %v2392_v17 = vpop.f32.mrb[1].mxu0 }
 0x261   : > { %v3070_v31 = vadd.f32 %v2392_v17, %v668_v59 }
 0x262   : > { %v2534_v46 = vadd.f32 %v3069_v29, %v2517_v25 }
 0x263   : > { %v2535_v0 = vadd.f32 %v3070_v31, %v2517_v25  ;;  %v2396_v61 = vpop.f32.mrb[2].mxu0 }
 0x264   : > { %2546 = vst [vmem:[%s4247_s22] sm:$0xff] %v2534_v46  ;;  %v3071_v41 = vadd.f32 %v2396_v61, %v672_v38  ;;  %v2398_v62 = vpop.f32.mrb[3].mxu0  ;;  %v2921_v20 = vpop.f32.mrb[8].mxu1 }
 0x265   : > { %2547 = vst [vmem:[%s4247_s22 + $0x8] sm:$0xff] %v2535_v0  ;;  %v3072_v4 = vadd.f32 %v2398_v62, %v674_v54  ;;  %v2539_v27 = vadd.f32 %v2921_v20, %v2522_v1  ;;  %v2479_v3 = vpop.f32.mrb[9].mxu1 }
 0x266   : > { %v2537_v11 = vadd.f32 %v3071_v41, %v2522_v1  ;;  %v2536_v48 = vadd.f32 %v2517_v25, %v2479_v3 }
 0x267   : > { %v2538_v9 = vadd.f32 %v3072_v4, %v2522_v1  ;;  %2552 = vst.msk [vmem:[%s4247_s22 + $0x28] sm:$0xff] %vm2548_vm13, %v2539_v27  ;;  %v2402_v33 = vpop.f32.mrb[4].mxu0 }
 0x268   : > { %2550 = vst [vmem:[%s4247_s22 + $0x18] sm:$0xff] %v2537_v11  ;;  %2549 = vst.msk [vmem:[%s4247_s22 + $0x10] sm:$0xff] %vm2548_vm13, %v2536_v48  ;;  %v3073_v58 = vadd.f32 %v2402_v33, %v678_v60  ;;  %v2404_v6 = vpop.f32.mrb[5].mxu0  ;;  %v2924_v63 = vpop.f32.mrb[10].mxu1 }
 0x269   : > { %2551 = vst [vmem:[%s4247_s22 + $0x20] sm:$0xff] %v2538_v9  ;;  %v3074_v53 = vadd.f32 %v2404_v6, %v680_v13  ;;  %v2545_v18 = vadd.f32 %v2924_v63, %v2532_v26  ;;  %v2489_v12 = vpop.f32.mrb[11].mxu1 }
 0x26a   : > { %v2540_v8 = vadd.f32 %v3073_v58, %v2527_v37  ;;  %v2542_v32 = vadd.f32 %v2527_v37, %v2489_v12 }
 0x26b   : > { %2558 = vst.msk [vmem:[%s4247_s22 + $0x58] sm:$0xff] %vm2548_vm13, %v2545_v18  ;;  %v2541_v36 = vadd.f32 %v3074_v53, %v2527_v37  ;;  %v2408_v28 = vpop.f32.mrb[6].mxu0 }
 0x26c   : > { %2553 = vst [vmem:[%s4247_s22 + $0x30] sm:$0xff] %v2540_v8  ;;  %2555 = vst.msk [vmem:[%s4247_s22 + $0x40] sm:$0xff] %vm2548_vm13, %v2542_v32  ;;  %v3075_v2 = vadd.f32 %v2408_v28, %v684_v21  ;;  %v2410_v24 = vpop.f32.mrb[7].mxu0 }
 0x26d   : > { %2554 = vst [vmem:[%s4247_s22 + $0x38] sm:$0xff] %v2541_v36  ;;  %v3076_v14 = vadd.f32 %v2410_v24, %v686_v34 }
 0x26e   : > { %v2543_v22 = vadd.f32 %v3075_v2, %v2532_v26 }
 0x26f   : > { %v2544_v16 = vadd.f32 %v3076_v14, %v2532_v26 }
 0x270   : > { %2556 = vst [vmem:[%s4247_s22 + $0x48] sm:$0xff] %v2543_v22 }
 0x271   : > { %2557 = vst [vmem:[%s4247_s22 + $0x50] sm:$0xff] %v2544_v16 }
 0x272 PF: > { %s14_s15 = sadd.s32 1, %s3433_s15  }
 0x273   : > { %p11_p4 = scmp.ge.s32.totalorder %s14_s15, 4  }
 0x275   :  { %13 = sbr.rel (!%p11_p4) target bundleno = 1 (0x1), region = 74 }

// kernel: rg_forward_pallas.7
= control target key start
LH: loop header
LB: loop body
LE: loop exit
PB: predicated region body
PF: predicated region fallthrough
CT: control target
= control target key end

     0   :  { %s3483_s15 = smov 0   ;;  %s4280_s0 = inlined_call_operand.vmem [shape: f32[2,32,324], index: 0, kind: input, shape index: {}]   ;;  %s4281_s1 = inlined_call_operand.vmem [shape: f32[9,32,32], index: 1, kind: input, shape index: {}]   ;;  %s4282_s2 = inlined_call_operand.vmem [shape: f32[32,1], index: 2, kind: input, shape index: {}]   ;;  %s4283_s3 = inlined_call_operand.vmem [shape: f32[1,324], index: 3, kind: input, shape index: {}]   ;;  %s4284_s4 = inlined_call_operand.vmem [shape: f32[2,32,324], index: 4, kind: output, shape index: {}]  }
   0x1 LB: > { %s2626_s16 = sadd.s32 4294967295, %s3445_s15   ;;  %p2630_p0 = scmp.ge.s32.totalorder %s3445_s15, 1  ;;  %s3445_s15 = sphi %s3483_s15, %s14_s15  }
   0x2   : > { %p162_p1 = scmp.lt.s32.totalorder %s3445_s15, 3 }
   0x4   : > { %p163_p2 = pnand %p2630_p0, %p162_p1 }
   0x5   : > { %p188_p3 = scmp.lt.s32.totalorder (!%p163_p2), %s2626_s16, 1  ;;  %v225_v0 = vlaneseq (!%p163_p2)  ;;  %v3447_v1 = vmov (!%p163_p2), 0.0   ;;  %vm201_vm0 = vcmask (!%p163_p2), 867328   ;;  %v198_v3 = vld [vmem:[%s4283_s3] sm:$0x7] (!%p163_p2)  ;;  %s3448_s23 = smov (!%p163_p2), 19  }
   0x6   : > { %166 = sbr.rel (%p163_p2) target bundleno = 628 (0x274), region = 36  ;;  %199 = vst [vmem:[#allocation2] sm:$0xff] (!%p163_p2), %v3447_v1  ;;  %203 = vst [vmem:[#allocation2 + $0x18] sm:$0xff] (!%p163_p2), %v3447_v1  ;;  %900 = vmatprep.mubr.f32.mxu0 (!%p163_p2), %v3447_v1  ;;  %478 = vmatprep.mubr.f32.mxu1 (!%p163_p2), %v3447_v1  ;;  %vm309_vm1 = vcmask (!%p163_p2), 1047704   ;;  %vm288_vm2 = vcmask (!%p163_p2), 154624   ;;  %vm312_vm3 = vcmask (!%p163_p2), 711680  }
   0x7   : > { %206 = vst [vmem:[#allocation2 + $0x30] sm:$0xff] (!%p163_p2), %v3447_v1  ;;  %209 = vst [vmem:[#allocation2 + $0x48] sm:$0xff] (!%p163_p2), %v3447_v1  ;;  %v226_v2 = vshrl.u32 (!%p163_p2), %v225_v0, 7  ;;  %s3449_s24 = smov (!%p163_p2), 126   ;;  %s3450_s25 = smov (!%p163_p2), 127   ;;  %vm803_vm4 = vcmask (!%p163_p2), 1031168  }
   0x8   : > { %202 = vst.msk [vmem:[#allocation2 + $0x10] sm:$0xff] (!%p163_p2), %vm201_vm0, %v3447_v1  ;;  %205 = vst.msk [vmem:[#allocation2 + $0x28] sm:$0xff] (!%p163_p2), %vm201_vm0, %v3447_v1  ;;  %s3451_s26 = smov (!%p163_p2), 110   ;;  %s3452_s27 = smov (!%p163_p2), 109   ;;  %vm380_vm5 = vcmask (!%p163_p2), 1039360   ;;  %vm401_vm6 = vcmask (!%p163_p2), 261120  }
   0x9   : > { %208 = vst.msk [vmem:[#allocation2 + $0x40] sm:$0xff] (!%p163_p2), %vm201_vm0, %v3447_v1  ;;  %211 = vst.msk [vmem:[#allocation2 + $0x58] sm:$0xff] (!%p163_p2), %vm201_vm0, %v3447_v1  ;;  %v235_v4 = vsub.s32 (!%p163_p2), 2, %v226_v2  ;;  %v227_v5 = vsub.s32 (!%p163_p2), 0, %v226_v2  ;;  %v231_v6 = vsub.s32 (!%p163_p2), 1, %v226_v2  ;;  %s3453_s28 = smov (!%p163_p2), 108  }
   0xa   : > { %s3454_s29 = smov (!%p163_p2), 92   ;;  %s3455_s30 = smov (!%p163_p2), 91   ;;  %vm1051_vm7 = vcmask (!%p163_p2), 900096   ;;  %vm1299_vm8 = vcmask (!%p163_p2), 891904   ;;  %vm1547_vm9 = vcmask (!%p163_p2), 883712   ;;  %vm1795_vm10 = vcmask (!%p163_p2), 752640  }
   0xb   : > { %v236_v7 = vrot.slane (!%p163_p2), %v198_v3, %v235_v4  ;;  %v228_v8 = vrot.slane (!%p163_p2), %v198_v3, %v227_v5  ;;  %v232_v9 = vrot.slane (!%p163_p2), %v198_v3, %v231_v6  ;;  %s3456_s5 = smov (!%p163_p2), 90   ;;  %vm2043_vm11 = vcmask (!%p163_p2), 744448  }
   0xc   : > { %vm2291_vm12 = vcmask (!%p163_p2), 736256   ;;  %vm2560_vm13 = vcmask (!%p163_p2), 556032  }
   0xd   : > { %s4296_s16 = smov (!%p188_p3, %s2626_s16), 1 }
   0xe   : > { %s3177_s19 = smul.u32 96, %s4296_s16 }
  0x10   : > { %s3512_s22 = scalar_lea.vmem %s4280_s0, %s3177_s19 }
  0x11   : > { %v214_v10 = vld [vmem:[%s3512_s22 + $0x10] sm:$0xff]  ;;  %v212_v11 = vld [vmem:[%s3512_s22] sm:$0xff]  ;;  %v215_v12 = vld [vmem:[%s3512_s22 + $0x18] sm:$0xff] }
  0x12   : > { %v242_v13 = vmul.f32 %v236_v7, %v214_v10  ;;  %v240_v14 = vmul.f32 %v228_v8, %v212_v11  ;;  %v213_v15 = vld [vmem:[%s3512_s22 + $0x8] sm:$0xff]  ;;  %v243_v16 = vmul.f32 %v228_v8, %v215_v12  ;;  %v216_v19 = vld [vmem:[%s3512_s22 + $0x20] sm:$0xff]  ;;  %v219_v22 = vld [vmem:[%s3512_s22 + $0x38] sm:$0xff] }
  0x13   : > { %v241_v17 = vmul.f32 %v232_v9, %v213_v15  ;;  %v217_v18 = vld [vmem:[%s3512_s22 + $0x28] sm:$0xff]  ;;  %v244_v21 = vmul.f32 %v232_v9, %v216_v19  ;;  %v218_v23 = vld [vmem:[%s3512_s22 + $0x30] sm:$0xff]  ;;  %v247_v24 = vmul.f32 %v232_v9, %v219_v22  ;;  %v220_v27 = vld [vmem:[%s3512_s22 + $0x40] sm:$0xff]  ;;  %v3457_v22 = vmov 0  }
  0x14   : > { %268 = vrot.lane.b32.xlu1 %v242_v13, %s3448_s23  ;;  %264 = vrot.lane.b32.xlu0 %v240_v14, %s3448_s23  ;;  %v245_v20 = vmul.f32 %v236_v7, %v217_v18  ;;  %v246_v25 = vmul.f32 %v228_v8, %v218_v23  ;;  %v221_v26 = vld [vmem:[%s3512_s22 + $0x48] sm:$0xff]  ;;  %v248_v29 = vmul.f32 %v236_v7, %v220_v27  ;;  %v223_v30 = vld [vmem:[%s3512_s22 + $0x58] sm:$0xff] }
  0x15   : > { %v249_v28 = vmul.f32 %v228_v8, %v221_v26  ;;  %v222_v31 = vld [vmem:[%s3512_s22 + $0x50] sm:$0xff]  ;;  %v251_v32 = vmul.f32 %v236_v7, %v223_v30  ;;  %v2510_v18 = vld [vmem:[%s4282_s2] sm:$0xff]  ;;  %v2511_v19 = vld [vmem:[%s4282_s2 + $0x8] sm:$0xff]  ;;  %3437 = vset.pattern.permute.xlu0 %v3457_v22  ;;  %3438 = vset.pattern.permute.xlu1 %v3457_v22  ;;  %s4259_s22 = scalar_lea.vmem %s4284_s4, %s3177_s19 }
  0x16   : > { %v250_v33 = vmul.f32 %v232_v9, %v222_v31 }
  0x18   : > { %270 = vrot.lane.b32.xlu1 %v243_v16, %s3448_s23  ;;  %266 = vrot.lane.b32.xlu0 %v241_v17, %s3448_s23 }
  0x1c   : > { %274 = vrot.lane.b32.xlu1 %v245_v20, %s3448_s23  ;;  %272 = vrot.lane.b32.xlu0 %v244_v21, %s3448_s23 }
  0x20   : > { %278 = vrot.lane.b32.xlu1 %v247_v24, %s3448_s23  ;;  %276 = vrot.lane.b32.xlu0 %v246_v25, %s3448_s23  ;;  %v2513_v24 = vld [vmem:[%s4282_s2 + $0x18] sm:$0xff]  ;;  %v2512_v25 = vld [vmem:[%s4282_s2 + $0x10] sm:$0xff] }
  0x24   : > { %282 = vrot.lane.b32.xlu1 %v249_v28, %s3448_s23  ;;  %280 = vrot.lane.b32.xlu0 %v248_v29, %s3448_s23 }
  0x28   : > { %286 = vrot.lane.b32.xlu1 %v251_v32, %s3448_s23  ;;  %284 = vrot.lane.b32.xlu0 %v250_v33, %s3448_s23 }
  0x86   : > { %v269_v34 = vpop.permute.xlu1 %268  ;;  %v265_v35 = vpop.permute.xlu0 %264 }
  0x87   : > { %310 = vst.msk [vmem:[#allocation2] sm:$0xff] %vm309_vm1, %v265_v35 }
  0x8a   : > { %v271_v36 = vpop.permute.xlu1 %270  ;;  %v267_v37 = vpop.permute.xlu0 %266 }
  0x8b   : > { %314 = vst.msk [vmem:[#allocation2 + $0x18] sm:$0xff] %vm309_vm1, %v271_v36  ;;  %v3529_v38 = vsel %vm288_vm2, %v265_v35, %v267_v37  ;;  %v290_v39 = vsel %vm288_vm2, %v267_v37, %v269_v34 }
  0x8c   : > { %313 = vst.msk [vmem:[#allocation2 + $0x10] sm:$0xff] %vm312_vm3, %v290_v39 }
  0x8e   : > { %v275_v40 = vpop.permute.xlu1 %274  ;;  %v273_v41 = vpop.permute.xlu0 %272  ;;  %v3538_v44 = vld [vmem:[#allocation2] sm:$0xff] }
  0x8f   : > { %v3534_v42 = vsel %vm288_vm2, %v271_v36, %v273_v41  ;;  %v292_v43 = vsel %vm288_vm2, %v273_v41, %v275_v40 }
  0x90   : > { %316 = vst.msk [vmem:[#allocation2 + $0x28] sm:$0xff] %vm312_vm3, %v292_v43  ;;  %v2953_v45 = vpack.c.bf16 %v3534_v42, %v3529_v38 }
  0x92   : > { %v279_v46 = vpop.permute.xlu1 %278  ;;  %v277_v47 = vpop.permute.xlu0 %276  ;;  %v3542_v48 = vld [vmem:[#allocation2 + $0x18] sm:$0xff] }
  0x93   : > { %v3545_v49 = vsel %vm288_vm2, %v277_v47, %v279_v46  ;;  %317 = vst.msk [vmem:[#allocation2 + $0x30] sm:$0xff] %vm309_vm1, %v277_v47  ;;  %v3550_v50 = vpack.i.bf16 %v3542_v48, %v3538_v44  ;;  %v2955_v51 = vpack.c.bf16 %v3542_v48, %v3538_v44  ;;  %v325_v55 = vld [vmem:[#allocation2 + $0x10] sm:$0xff]  ;;  %v3853_v48 = vld [vmem:[%s4281_s1 + $0x78] sm:$0xff] }
  0x94   : > { %v3222_v2 = vpack.i.bf16 %v325_v55, %v3529_v38  ;;  %v3778_v38 = vld [vmem:[%s4281_s1 + $0x60] sm:$0xff] }
  0x95   : > { %3198 = vrot.lane.b32.xlu0 %v3550_v50, %s3449_s24 }
  0x96   : > { %v283_v52 = vpop.permute.xlu1 %282  ;;  %v281_v53 = vpop.permute.xlu0 %280 }
  0x97   : > { %320 = vst.msk [vmem:[#allocation2 + $0x48] sm:$0xff] %vm309_vm1, %v283_v52  ;;  %v294_v54 = vsel %vm288_vm2, %v279_v46, %v281_v53  ;;  %v328_v56 = vld [vmem:[#allocation2 + $0x28] sm:$0xff] }
  0x98   : > { %319 = vst.msk [vmem:[#allocation2 + $0x40] sm:$0xff] %vm312_vm3, %v294_v54  ;;  %v3559_v57 = vpack.c.bf16 %v328_v56, %v325_v55  ;;  %v3227_v9 = vpack.i.bf16 %v328_v56, %v3534_v42 }
  0x99   : > { %3208 = vrot.lane.b32.xlu0 %v3550_v50, %s3450_s25 }
  0x9a   : > { %v287_v58 = vpop.permute.xlu1 %286  ;;  %v285_v59 = vpop.permute.xlu0 %284  ;;  %v3568_v62 = vld [vmem:[#allocation2 + $0x30] sm:$0xff] }
  0x9b   : > { %v3564_v60 = vsel %vm288_vm2, %v283_v52, %v285_v59  ;;  %v296_v61 = vsel %vm288_vm2, %v285_v59, %v287_v58 }
  0x9c   : > { %322 = vst.msk [vmem:[#allocation2 + $0x58] sm:$0xff] %vm312_vm3, %v296_v61  ;;  %v2957_v63 = vpack.c.bf16 %v3564_v60, %v3545_v49 }
  0x9d   : > { %3218 = vrot.lane.b32.xlu0 %v3550_v50, %s3451_s26 }
  0x9e   : > { %v3573_v0 = vld [vmem:[#allocation2 + $0x48] sm:$0xff] }
  0x9f   : > { %v3202_v3 = vpack.i.bf16 %v3573_v0, %v3568_v62  ;;  %v2959_v4 = vpack.c.bf16 %v3573_v0, %v3568_v62  ;;  %v331_v6 = vld [vmem:[#allocation2 + $0x40] sm:$0xff] }
  0xa0   : > { %v3232_v10 = vpack.i.bf16 %v331_v6, %v3545_v49 }
  0xa1   : > { %3223 = vrot.lane.b32.xlu0 %v3222_v2, %s3449_s24  ;;  %3203 = vrot.lane.b32.xlu1 %v3202_v3, %s3449_s24 }
  0xa3   : > { %v334_v5 = vld [vmem:[#allocation2 + $0x58] sm:$0xff] }
  0xa4   : > { %v3237_v7 = vpack.i.bf16 %v334_v5, %v3564_v60  ;;  %v3583_v8 = vpack.c.bf16 %v334_v5, %v331_v6  ;;  %v3864_v60 = vld [vmem:[%s4281_s1] sm:$0xff] }
  0xa5   : > { %3213 = vrot.lane.b32.xlu1 %v3202_v3, %s3450_s25 }
  0xa6   : > { %3238 = vrot.lane.b32.xlu0 %v3237_v7, %s3449_s24 }
  0xa9   : > { %3228 = vrot.lane.b32.xlu1 %v3227_v9, %s3449_s24 }
  0xaa   : > { %3243 = vrot.lane.b32.xlu0 %v3222_v2, %s3450_s25 }
  0xad   : > { %3233 = vrot.lane.b32.xlu1 %v3232_v10, %s3449_s24 }
  0xae   : > { %3258 = vrot.lane.b32.xlu0 %v3237_v7, %s3450_s25 }
  0xb1   : > { %3248 = vrot.lane.b32.xlu1 %v3227_v9, %s3450_s25 }
  0xb2   : > { %3263 = vrot.lane.b32.xlu0 %v3222_v2, %s3451_s26 }
  0xb5   : > { %3253 = vrot.lane.b32.xlu1 %v3232_v10, %s3450_s25 }
  0xb6   : > { %3278 = vrot.lane.b32.xlu0 %v3237_v7, %s3451_s26 }
  0xb9   : > { %3268 = vrot.lane.b32.xlu1 %v3227_v9, %s3451_s26 }
  0xba   : > { %3288 = vrot.lane.b32.xlu0 %v3550_v50, %s3452_s27 }
  0xbd   : > { %3273 = vrot.lane.b32.xlu1 %v3232_v10, %s3451_s26 }
  0xbe   : > { %3293 = vrot.lane.b32.xlu0 %v3222_v2, %s3452_s27 }
  0xc1   : > { %3283 = vrot.lane.b32.xlu1 %v3202_v3, %s3451_s26 }
  0xc2   : > { %3308 = vrot.lane.b32.xlu0 %v3237_v7, %s3452_s27 }
  0xc5   : > { %3298 = vrot.lane.b32.xlu1 %v3227_v9, %s3452_s27 }
  0xc6   : > { %3318 = vrot.lane.b32.xlu0 %v3550_v50, %s3453_s28 }
  0xc9   : > { %3303 = vrot.lane.b32.xlu1 %v3232_v10, %s3452_s27 }
  0xca   : > { %3323 = vrot.lane.b32.xlu0 %v3222_v2, %s3453_s28 }
  0xcd   : > { %3313 = vrot.lane.b32.xlu1 %v3202_v3, %s3452_s27 }
  0xce   : > { %3338 = vrot.lane.b32.xlu0 %v3237_v7, %s3453_s28 }
  0xd1   : > { %3328 = vrot.lane.b32.xlu1 %v3227_v9, %s3453_s28 }
  0xd2   : > { %3348 = vrot.lane.b32.xlu0 %v3550_v50, %s3454_s29 }
  0xd5   : > { %3333 = vrot.lane.b32.xlu1 %v3232_v10, %s3453_s28 }
  0xd6   : > { %3353 = vrot.lane.b32.xlu0 %v3222_v2, %s3454_s29 }
  0xd9   : > { %3343 = vrot.lane.b32.xlu1 %v3202_v3, %s3453_s28 }
  0xda   : > { %3368 = vrot.lane.b32.xlu0 %v3237_v7, %s3454_s29 }
  0xdd   : > { %3358 = vrot.lane.b32.xlu1 %v3227_v9, %s3454_s29 }
  0xde   : > { %3378 = vrot.lane.b32.xlu0 %v3550_v50, %s3455_s30 }
  0xe1   : > { %3363 = vrot.lane.b32.xlu1 %v3232_v10, %s3454_s29 }
  0xe2   : > { %3383 = vrot.lane.b32.xlu0 %v3222_v2, %s3455_s30 }
  0xe5   : > { %3373 = vrot.lane.b32.xlu1 %v3202_v3, %s3454_s29 }
  0xe6   : > { %3398 = vrot.lane.b32.xlu0 %v3237_v7, %s3455_s30 }
  0xe9   : > { %3388 = vrot.lane.b32.xlu1 %v3227_v9, %s3455_s30 }
  0xea   : > { %3408 = vrot.lane.b32.xlu0 %v3550_v50, %s3456_s5 }
  0xed   : > { %3393 = vrot.lane.b32.xlu1 %v3232_v10, %s3455_s30 }
  0xee   : > { %3413 = vrot.lane.b32.xlu0 %v3222_v2, %s3456_s5 }
  0xf1   : > { %3403 = vrot.lane.b32.xlu1 %v3202_v3, %s3455_s30 }
  0xf2   : > { %3428 = vrot.lane.b32.xlu0 %v3237_v7, %s3456_s5 }
  0xf5   : > { %3418 = vrot.lane.b32.xlu1 %v3227_v9, %s3456_s5 }
  0xf6   : > { %2516 = vperm.xlu0 %3437, %v2510_v18  }
  0xf9   : > { %3423 = vrot.lane.b32.xlu1 %v3232_v10, %s3456_s5 }
  0xfa   : > { %2531 = vperm.xlu0 %3437, %v2513_v24  }
  0xfd   : > { %3433 = vrot.lane.b32.xlu1 %v3202_v3, %s3456_s5 }
 0x101   : > { %2521 = vperm.xlu1 %3438, %v2511_v19  }
 0x105   : > { %2526 = vperm.xlu1 %3438, %v2512_v25  }
 0x107   : > { %v3199_v11 = vpop.permute.xlu0 %3198 }
 0x108   : > { %v3201_v26 = vunpack.i.h.bf16 %v3199_v11  ;;  %v3200_v27 = vunpack.i.l.bf16 %v3199_v11 }
 0x10b   : > { %v3600_v12 = vpop.permute.xlu0 %3208 }
 0x10c   : > { %v3211_v3 = vunpack.i.h.bf16 %v3600_v12  ;;  %v3210_v5 = vunpack.i.l.bf16 %v3600_v12  ;;  %v3669_v12 = vld [vmem:[%s4281_s1 + $0x40] sm:$0xff] }
 0x10f   : > { %v3602_v13 = vpop.permute.xlu0 %3218 }
 0x113   : > { %v3204_v14 = vpop.permute.xlu1 %3203  ;;  %v3604_v15 = vpop.permute.xlu0 %3223 }
 0x114   : > { %v3226_v20 = vunpack.i.h.bf16 %v3604_v15  ;;  %v3225_v21 = vunpack.i.l.bf16 %v3604_v15  ;;  %v3206_v37 = vunpack.i.h.bf16 %v3204_v14  ;;  %v3205_v43 = vunpack.i.l.bf16 %v3204_v14 }
 0x116   : > { %v805_v33 = vsel %vm803_vm4, %v3225_v21, %v3226_v20  ;;  %v804_v35 = vsel %vm803_vm4, %v3200_v27, %v3225_v21 }
 0x117   : > { %v3606_v16 = vpop.permute.xlu1 %3213 }
 0x118   : > { %v3608_v17 = vpop.permute.xlu0 %3238  ;;  %v3215_v27 = vunpack.i.l.bf16 %v3606_v16 }
 0x119   : > { %v3241_v31 = vunpack.i.h.bf16 %v3608_v17  ;;  %v3240_v32 = vunpack.i.l.bf16 %v3608_v17 }
 0x11b   : > { %v3618_v23 = vpop.permute.xlu1 %3228  ;;  %v811_v52 = vsel %vm803_vm4, %v3240_v32, %v3241_v31  ;;  %v810_v53 = vsel %vm803_vm4, %v3206_v37, %v3240_v32 }
 0x11c   : > { %v3231_v28 = vunpack.i.h.bf16 %v3618_v23  ;;  %v3230_v29 = vunpack.i.l.bf16 %v3618_v23  ;;  %v3628_v30 = vpop.permute.xlu0 %3243 }
 0x11d   : > { %v3246_v54 = vunpack.i.h.bf16 %v3628_v30  ;;  %v3245_v55 = vunpack.i.l.bf16 %v3628_v30 }
 0x11e   : > { %v807_v34 = vsel %vm803_vm4, %v3230_v29, %v3231_v28  ;;  %v806_v36 = vsel %vm803_vm4, %v3201_v26, %v3230_v29  ;;  %v3216_v26 = vunpack.i.h.bf16 %v3606_v16 }
 0x11f   : > { %v3640_v39 = vpop.permute.xlu1 %3233  ;;  %v2969_v40 = vpack.c.bf16 %v807_v34, %v805_v33  ;;  %v2971_v41 = vpack.c.bf16 %v806_v36, %v804_v35  ;;  %v382_v14 = vsel %vm380_vm5, %v3245_v55, %v3246_v54  ;;  %v381_v19 = vsel %vm380_vm5, %v3210_v5, %v3245_v55 }
 0x120   : > { %v3236_v46 = vunpack.i.h.bf16 %v3640_v39  ;;  %v3235_v47 = vunpack.i.l.bf16 %v3640_v39  ;;  %v3644_v50 = vpop.permute.xlu0 %3258 }
 0x121   : > { %2970 = vmatprep.subr.bf16.mxu0 %v2969_v40  ;;  %v3261_v10 = vunpack.i.h.bf16 %v3644_v50  ;;  %v3260_v11 = vunpack.i.l.bf16 %v3644_v50  ;;  %v3687_v40 = vld [vmem:[%s4281_s1 + $0x48] sm:$0xff] }
 0x122   : > { %2972 = vmatpush1.bf16.msra.mxu0 %v2971_v41  ;;  %v809_v56 = vsel %vm803_vm4, %v3235_v47, %v3236_v46  ;;  %v808_v58 = vsel %vm803_vm4, %v3205_v43, %v3235_v47  ;;  %v3220_v41 = vunpack.i.l.bf16 %v3602_v13 }
 0x123   : > { %v3249_v59 = vpop.permute.xlu1 %3248  ;;  %v2973_v61 = vpack.c.bf16 %v811_v52, %v809_v56  ;;  %v2975_v2 = vpack.c.bf16 %v810_v53, %v808_v58  ;;  %v388_v35 = vsel %vm380_vm5, %v3260_v11, %v3261_v10  ;;  %v387_v37 = vsel %vm380_vm5, %v3216_v26, %v3260_v11 }
 0x124   : > { %v3251_v6 = vunpack.i.h.bf16 %v3249_v59  ;;  %v3250_v7 = vunpack.i.l.bf16 %v3249_v59  ;;  %v3658_v9 = vpop.permute.xlu0 %3263  ;;  %v3221_v52 = vunpack.i.h.bf16 %v3602_v13 }
 0x125   : > { %2974 = vmatprep.subr.bf16.mxu0 %v2973_v61  ;;  %v3266_v33 = vunpack.i.h.bf16 %v3658_v9  ;;  %v3265_v34 = vunpack.i.l.bf16 %v3658_v9 }
 0x126   : > { %2976 = vmatpush1.bf16.msra.mxu0 %v2975_v2  ;;  %v384_v18 = vsel %vm380_vm5, %v3250_v7, %v3251_v6  ;;  %v383_v21 = vsel %vm380_vm5, %v3211_v3, %v3250_v7  ;;  %v2945_v58 = vpack.c.bf16 %v3251_v6, %v3246_v54  ;;  %v3709_v54 = vld [vmem:[%s4281_s1 + $0x20] sm:$0xff] }
 0x127   : > { %v3254_v22 = vpop.permute.xlu1 %3253  ;;  %v2937_v24 = vpack.c.bf16 %v384_v18, %v382_v14  ;;  %v2939_v25 = vpack.c.bf16 %v383_v21, %v381_v19  ;;  %v1052_v59 = vsel %vm1051_vm7, %v3220_v41, %v3265_v34  ;;  %v1053_v61 = vsel %vm1051_vm7, %v3265_v34, %v3266_v33 }
 0x128   : > { %v3256_v29 = vunpack.i.h.bf16 %v3254_v22  ;;  %v3255_v30 = vunpack.i.l.bf16 %v3254_v22  ;;  %v3673_v32 = vpop.permute.xlu0 %3278  ;;  %v3726_v22 = vld [vmem:[%s4281_s1 + $0x50] sm:$0xff] }
 0x129   : > { %2938 = vmatprep.subr.bf16.mxu1 %v2937_v24  ;;  %2657 = vmatmul.mubr.msk.f32.vlgmr.msra.gmra.mrb[0].mxu0 %vm401_vm6, %v3669_v12  ;;  %v3281_v2 = vunpack.i.h.bf16 %v3673_v32  ;;  %v3280_v13 = vunpack.i.l.bf16 %v3673_v32  ;;  %v3731_v24 = vld [vmem:[%s4281_s1 + $0x28] sm:$0xff] }
 0x12a   : > { %2940 = vmatpush1.bf16.msra.mxu1 %v2939_v25  ;;  %v386_v36 = vsel %vm380_vm5, %v3255_v30, %v3256_v29  ;;  %v385_v16 = vsel %vm380_vm5, %v3215_v27, %v3255_v30  ;;  %906 = vmatprep.mubr.f32.mxu0 %v3447_v1  ;;  %v2949_v21 = vpack.c.bf16 %v3261_v10, %v3256_v29 }
 0x12b   : > { %v3690_v43 = vpop.permute.xlu1 %3268  ;;  %v2941_v47 = vpack.c.bf16 %v388_v35, %v386_v36  ;;  %v2943_v50 = vpack.c.bf16 %v387_v37, %v385_v16  ;;  %v1059_v25 = vsel %vm1051_vm7, %v3280_v13, %v3281_v2  ;;  %v3751_v16 = vld [vmem:[%s4281_s1 + $0x58] sm:$0xff] }
 0x12c   : > { %v3271_v53 = vunpack.i.h.bf16 %v3690_v43  ;;  %v3270_v55 = vunpack.i.l.bf16 %v3690_v43  ;;  %v3695_v56 = vpop.permute.xlu0 %3288 }
 0x12d   : > { %2942 = vmatprep.subr.bf16.mxu1 %v2941_v47  ;;  %2658 = vmatmul.mubr.msk.f32.gmra.mrb[2].mxu0 %vm401_vm6, %v3687_v40  ;;  %v2635_v47 = vld [vmem:[%s4281_s1 + $0x30] sm:$0xff] }
 0x12e   : > { %v1054_v3 = vsel %vm1051_vm7, %v3221_v52, %v3270_v55  ;;  %2944 = vmatpush1.bf16.msra.mxu1 %v2943_v50  ;;  %v1055_v5 = vsel %vm1051_vm7, %v3270_v55, %v3271_v53  ;;  %912 = vmatprep.mubr.f32.mxu0 %v3447_v1  ;;  %v3290_v50 = vunpack.i.l.bf16 %v3695_v56 }
 0x12f   : > { %v2987_v6 = vpack.c.bf16 %v1054_v3, %v1052_v59  ;;  %v3715_v7 = vpop.permute.xlu1 %3273  ;;  %2946 = vmatprep.subr.bf16.mxu1 %v2945_v58  ;;  %v2985_v11 = vpack.c.bf16 %v1055_v5, %v1053_v61 }
 0x130   : > { %v3276_v14 = vunpack.i.h.bf16 %v3715_v7  ;;  %v3275_v18 = vunpack.i.l.bf16 %v3715_v7  ;;  %v3719_v19 = vpop.permute.xlu0 %3293  ;;  %v4068_v7 = vld [vmem:[%s4281_s1 + $0xb8] sm:$0xff] }
 0x131   : > { %2637 = vmatmul.mubr.msk.f32.vlgmr.msra.gmra.mrb[0].mxu1 %vm401_vm6, %v3709_v54  ;;  %2986 = vmatprep.subr.bf16.mxu0 %v2985_v11  ;;  %v3296_v35 = vunpack.i.h.bf16 %v3719_v19  ;;  %v3295_v36 = vunpack.i.l.bf16 %v3719_v19 }
 0x132   : > { %2948 = vmatpush3.bf16.msra.mxu1 %v2945_v58  ;;  %2988 = vmatpush1.bf16.msra.mxu0 %v2987_v6  ;;  %v1057_v10 = vsel %vm1051_vm7, %v3275_v18, %v3276_v14  ;;  %v3291_v58 = vunpack.i.h.bf16 %v3695_v56  ;;  %v2636_v6 = vld [vmem:[%s4281_s1 + $0x38] sm:$0xff] }
 0x133   : > { %v3284_v26 = vpop.permute.xlu1 %3283  ;;  %2950 = vmatprep.subr.bf16.mxu1 %v2949_v21  ;;  %484 = vmatprep.mubr.f32.mxu1 %v3447_v1  ;;  %v2989_v27 = vpack.c.bf16 %v1059_v25, %v1057_v10  ;;  %v1300_v3 = vsel %vm1299_vm8, %v3290_v50, %v3295_v36  ;;  %v1301_v42 = vsel %vm1299_vm8, %v3295_v36, %v3296_v35 }
 0x134   : > { %v3286_v29 = vunpack.i.h.bf16 %v3284_v26  ;;  %v3285_v30 = vunpack.i.l.bf16 %v3284_v26  ;;  %v3740_v34 = vpop.permute.xlu0 %3308  ;;  %2659 = vmatmul.mubr.msk.f32.gmra.mrb[4].mxu0 %vm401_vm6, %v3726_v22 }
 0x135   : > { %2638 = vmatmul.mubr.msk.f32.gmra.mrb[2].mxu1 %vm401_vm6, %v3731_v24  ;;  %2990 = vmatprep.subr.bf16.mxu0 %v2989_v27  ;;  %v3310_v56 = vunpack.i.l.bf16 %v3740_v34 }
 0x136   : > { %v1056_v37 = vsel %vm1051_vm7, %v3285_v30, %v3275_v18  ;;  %v1058_v41 = vsel %vm1051_vm7, %v3286_v29, %v3280_v13  ;;  %2952 = vmatpush3.bf16.msra.mxu1 %v2949_v21  ;;  %918 = vmatprep.mubr.f32.mxu0 %v3447_v1  ;;  %v3806_v29 = vld [vmem:[%s4281_s1 + $0x68] sm:$0xff] }
 0x137   : > { %v2991_v52 = vpack.c.bf16 %v1058_v41, %v1056_v37  ;;  %v3760_v55 = vpop.permute.xlu1 %3298  ;;  %2954 = vmatprep.subr.bf16.mxu1 %v2953_v45  ;;  %490 = vmatprep.mubr.f32.mxu1 %v3447_v1  ;;  %v3311_v45 = vunpack.i.h.bf16 %v3740_v34 }
 0x138   : > { %v3301_v59 = vunpack.i.h.bf16 %v3760_v55  ;;  %v3300_v61 = vunpack.i.l.bf16 %v3760_v55  ;;  %v3769_v13 = vpop.permute.xlu0 %3318  ;;  %2660 = vmatmul.mubr.msk.f32.gmra.mrb[6].mxu0 %vm401_vm6, %v3751_v16 }
 0x139   : > { %2639 = vmatmul.mubr.msk.f32.gmra.mrb[4].mxu1 %vm401_vm6, %v2635_v47  ;;  %2992 = vmatpush1.bf16.msra.mxu0 %v2991_v52  ;;  %v1307_v36 = vsel %vm1299_vm8, %v3310_v56, %v3311_v45  ;;  %v3321_v44 = vunpack.i.h.bf16 %v3769_v13  ;;  %v3320_v0 = vunpack.i.l.bf16 %v3769_v13 }
 0x13a   : > { %v1302_v5 = vsel %vm1299_vm8, %v3291_v58, %v3300_v61  ;;  %1148 = vmatprep.mubr.f32.mxu0 %v3447_v1  ;;  %496 = vmatprep.mubr.f32.mxu1 %v3447_v1  ;;  %v1303_v11 = vsel %vm1299_vm8, %v3300_v61, %v3301_v59  ;;  %v3826_v61 = vld [vmem:[%s4281_s1 + $0x70] sm:$0xff]  ;;  %v3009_v32 = vpack.c.bf16 %v3301_v59, %v3296_v35 }
 0x13b   : > { %v3003_v18 = vpack.c.bf16 %v1302_v5, %v1300_v3  ;;  %v3794_v21 = vpop.permute.xlu1 %3303  ;;  %v3001_v10 = vpack.c.bf16 %v1303_v11, %v1301_v42 }
 0x13c   : > { %v3306_v25 = vunpack.i.h.bf16 %v3794_v21  ;;  %v3305_v26 = vunpack.i.l.bf16 %v3794_v21  ;;  %v3798_v27 = vpop.permute.xlu0 %3323  ;;  %2669 = vmatmul.mubr.msk.f32.vlgmr.msra.gmra.mrb[0].mxu0 %vm401_vm6, %v3778_v38 }
 0x13d   : > { %2640 = vmatmul.mubr.msk.f32.gmra.mrb[6].mxu1 %vm401_vm6, %v2636_v6  ;;  %3002 = vmatprep.subr.bf16.mxu0 %v3001_v10  ;;  %v3326_v3 = vunpack.i.h.bf16 %v3798_v27 }
 0x13e   : > { %3004 = vmatpush1.bf16.msra.mxu0 %v3003_v18  ;;  %1154 = vmatprep.mubr.f32.mxu0 %v3447_v1  ;;  %v1305_v30 = vsel %vm1299_vm8, %v3305_v26, %v3306_v25 }
 0x13f   : > { %v3314_v37 = vpop.permute.xlu1 %3313  ;;  %2819 = vmatprep.mubr.msk.f32.mxu1 %vm401_vm6, %v3709_v54  ;;  %v3005_v41 = vpack.c.bf16 %v1307_v36, %v1305_v30  ;;  %v3325_v54 = vunpack.i.l.bf16 %v3798_v27 }
 0x140   : > { %v3316_v50 = vunpack.i.h.bf16 %v3314_v37  ;;  %v3315_v52 = vunpack.i.l.bf16 %v3314_v37  ;;  %v3817_v58 = vpop.permute.xlu0 %3338  ;;  %2670 = vmatmul.mubr.msk.f32.gmra.mrb[2].mxu0 %vm401_vm6, %v3806_v29  ;;  %v3889_v37 = vld [vmem:[%s4281_s1 + $0x80] sm:$0xff] }
 0x141   : > { %2820 = vmatmul.mubr.msk.f32.vlgmr.msra.gmra.mrb[8].mxu1 %vm401_vm6, %v3731_v24  ;;  %3006 = vmatprep.subr.bf16.mxu0 %v3005_v41  ;;  %v4287_v49 = vunpack.i.h.bf16 %v3817_v58  ;;  %v1548_v13 = vsel %vm1547_vm9, %v3320_v0, %v3325_v54  ;;  %v3897_v41 = vld [vmem:[%s4281_s1 + $0x8] sm:$0xff] }
 0x142   : > { %v1304_v42 = vsel %vm1299_vm8, %v3315_v52, %v3305_v26  ;;  %v1306_v5 = vsel %vm1299_vm8, %v3316_v50, %v3310_v56  ;;  %2956 = vmatpush1.bf16.msra.mxu1 %v2955_v51  ;;  %1160 = vmatprep.mubr.f32.mxu0 %v3447_v1  ;;  %v3340_v51 = vunpack.i.l.bf16 %v3817_v58 }
 0x143   : > { %v3007_v24 = vpack.c.bf16 %v1306_v5, %v1304_v42  ;;  %2958 = vmatprep.subr.bf16.mxu1 %v2957_v63  ;;  %v3839_v11 = vpop.permute.xlu1 %3328  ;;  %2822 = vmatprep.mubr.msk.f32.mxu1 %vm401_vm6, %v2635_v47  ;;  %v1549_v63 = vsel %vm1547_vm9, %v3325_v54, %v3326_v3 }
 0x144   : > { %v4289_v18 = vunpack.i.h.bf16 %v3839_v11  ;;  %v3330_v56 = vunpack.i.l.bf16 %v3839_v11  ;;  %v3844_v10 = vpop.permute.xlu0 %3348  ;;  %2671 = vmatmul.mubr.msk.f32.gmra.mrb[4].mxu0 %vm401_vm6, %v3826_v61  ;;  %v1555_v52 = vsel %vm1547_vm9, %v3340_v51, %v4287_v49 }
 0x145   : > { %2823 = vmatmul.mubr.msk.f32.gmra.mrb[10].mxu1 %vm401_vm6, %v2636_v6  ;;  %3008 = vmatpush1.bf16.msra.mxu0 %v3007_v24 }
 0x146   : > { %2960 = vmatpush1.bf16.msra.mxu1 %v2959_v4  ;;  %1166 = vmatprep.mubr.f32.mxu0 %v3447_v1  ;;  %v1551_v47 = vsel %vm1547_vm9, %v3330_v56, %v4289_v18  ;;  %v1550_v4 = vsel %vm1547_vm9, %v3321_v44, %v3330_v56  ;;  %v2977_v44 = vpack.c.bf16 %v3231_v28, %v3226_v20  ;;  %v337_v20 = vld [vmem:[%s4281_s1 + $0x10] sm:$0xff] }
 0x147   : > { %2962 = vmatprep.subr.bf16.mxu1 %v3559_v57  ;;  %v3873_v6 = vpop.permute.xlu1 %3333  ;;  %664 = vmatprep.mubr.f32.mxu1 %v3447_v1  ;;  %v3017_v62 = vpack.c.bf16 %v1551_v47, %v1549_v63  ;;  %v3019_v42 = vpack.c.bf16 %v1550_v4, %v1548_v13  ;;  %v3920_v63 = vld [vmem:[%s4281_s1 + $0x88] sm:$0xff]  ;;  %v2981_v18 = vpack.c.bf16 %v3241_v31, %v3236_v46 }
 0x148   : > { %v4288_v26 = vunpack.i.h.bf16 %v3873_v6  ;;  %v3335_v30 = vunpack.i.l.bf16 %v3873_v6  ;;  %v3880_v36 = vpop.permute.xlu0 %3353  ;;  %2672 = vmatmul.mubr.msk.f32.gmra.mrb[6].mxu0 %vm401_vm6, %v3853_v48 }
 0x149   : > { %2645 = vmatmul.mubr.msk.f32.vlgmr.msra.gmra.mrb[0].mxu1 %vm401_vm6, %v3864_v60  ;;  %3018 = vmatprep.subr.bf16.mxu0 %v3017_v62  ;;  %v4286_v47 = vunpack.i.h.bf16 %v3880_v36  ;;  %v3355_v62 = vunpack.i.l.bf16 %v3880_v36 }
 0x14a   : > { %2964 = vmatpush3.bf16.msra.mxu1 %v3559_v57  ;;  %1396 = vmatprep.mubr.f32.mxu0 %v3447_v1  ;;  %v1553_v50 = vsel %vm1547_vm9, %v3335_v30, %v4288_v26 }
 0x14b   : > { %2966 = vmatprep.subr.bf16.mxu1 %v3583_v8  ;;  %v3344_v54 = vpop.permute.xlu1 %3343  ;;  %670 = vmatprep.mubr.f32.mxu1 %v3447_v1  ;;  %v3021_v57 = vpack.c.bf16 %v1555_v52, %v1553_v50  ;;  %v1797_v50 = vsel %vm1795_vm10, %v3355_v62, %v4286_v47 }
 0x14c   : > { %v3346_v5 = vunpack.i.h.bf16 %v3344_v54  ;;  %v3345_v24 = vunpack.i.l.bf16 %v3344_v54  ;;  %v3907_v56 = vpop.permute.xlu0 %3368  ;;  %2681 = vmatmul.mubr.msk.f32.vlgmr.msra.gmra.mrb[0].mxu0 %vm401_vm6, %v3889_v37 }
 0x14d   : > { %3020 = vmatpush1.bf16.msra.mxu0 %v3019_v42  ;;  %2646 = vmatmul.mubr.msk.f32.gmra.mrb[2].mxu1 %vm401_vm6, %v3897_v41 }
 0x14e   : > { %v1552_v0 = vsel %vm1547_vm9, %v3345_v24, %v3335_v30  ;;  %v1554_v15 = vsel %vm1547_vm9, %v3346_v5, %v3340_v51  ;;  %2968 = vmatpush3.bf16.msra.mxu1 %v3583_v8  ;;  %3022 = vmatprep.subr.bf16.mxu0 %v3021_v57  ;;  %v3944_v8 = vld [vmem:[%s4281_s1 + $0x90] sm:$0xff]  ;;  %v338_v51 = vld [vmem:[%s4281_s1 + $0x18] sm:$0xff] }
 0x14f   : > { %v3023_v23 = vpack.c.bf16 %v1554_v15, %v1552_v0  ;;  %2978 = vmatprep.subr.bf16.mxu1 %v2977_v44  ;;  %v3930_v28 = vpop.permute.xlu1 %3358  ;;  %1402 = vmatprep.mubr.f32.mxu0 %v3447_v1  ;;  %v3967_v24 = vld [vmem:[%s4281_s1 + $0x98] sm:$0xff]  ;;  %v3351_v0 = vunpack.i.h.bf16 %v3844_v10  ;;  %v3371_v15 = vunpack.i.h.bf16 %v3907_v56 }
 0x150   : > { %v4285_v4 = vunpack.i.h.bf16 %v3930_v28  ;;  %v3360_v30 = vunpack.i.l.bf16 %v3930_v28  ;;  %v3935_v13 = vpop.permute.xlu0 %3378  ;;  %676 = vmatprep.mubr.f32.mxu1 %v3447_v1  ;;  %2682 = vmatmul.mubr.msk.f32.gmra.mrb[2].mxu0 %vm401_vm6, %v3920_v63 }
 0x151   : > { %2647 = vmatmul.mubr.msk.f32.gmra.mrb[4].mxu1 %vm401_vm6, %v337_v20  ;;  %3024 = vmatpush1.bf16.msra.mxu0 %v3023_v23  ;;  %v3370_v23 = vunpack.i.l.bf16 %v3907_v56 }
 0x152   : > { %1408 = vmatprep.mubr.f32.mxu0 %v3447_v1  ;;  %682 = vmatprep.mubr.f32.mxu1 %v3447_v1  ;;  %v1799_v52 = vsel %vm1795_vm10, %v3360_v30, %v4285_v4  ;;  %v1798_v4 = vsel %vm1795_vm10, %v3351_v0, %v3360_v30 }
 0x153   : > { %v3957_v42 = vpop.permute.xlu1 %3363  ;;  %v3033_v54 = vpack.c.bf16 %v1799_v52, %v1797_v50  ;;  %v3350_v52 = vunpack.i.l.bf16 %v3844_v10  ;;  %v3994_v10 = vld [vmem:[%s4281_s1 + $0xa0] sm:$0xff]  ;;  %v1803_v17 = vsel %vm1795_vm10, %v3370_v23, %v3371_v15 }
 0x154   : > { %v3366_v57 = vunpack.i.h.bf16 %v3957_v42  ;;  %v3365_v5 = vunpack.i.l.bf16 %v3957_v42  ;;  %2683 = vmatmul.mubr.msk.f32.gmra.mrb[4].mxu0 %vm401_vm6, %v3944_v8  ;;  %v3972_v50 = vpop.permute.xlu0 %3383 }
 0x155   : > { %2648 = vmatmul.mubr.msk.f32.gmra.mrb[6].mxu1 %vm401_vm6, %v338_v51  ;;  %3034 = vmatprep.subr.bf16.mxu0 %v3033_v54  ;;  %v3386_v30 = vunpack.i.h.bf16 %v3972_v50  ;;  %v3385_v0 = vunpack.i.l.bf16 %v3972_v50 }
 0x156   : > { %1414 = vmatprep.mubr.f32.mxu0 %v3447_v1  ;;  %2833 = vmatprep.mubr.msk.f32.mxu1 %vm401_vm6, %v3864_v60  ;;  %v1801_v26 = vsel %vm1795_vm10, %v3365_v5, %v3366_v57  ;;  %v1796_v60 = vsel %vm1795_vm10, %v3350_v52, %v3355_v62 }
 0x157   : > { %v3374_v54 = vpop.permute.xlu1 %3373  ;;  %v3035_v31 = vpack.c.bf16 %v1798_v4, %v1796_v60  ;;  %v3037_v46 = vpack.c.bf16 %v1803_v17, %v1801_v26  ;;  %v2993_v4 = vpack.c.bf16 %v3271_v53, %v3266_v33  ;;  %v2045_v26 = vsel %vm2043_vm11, %v3385_v0, %v3386_v30 }
 0x158   : > { %v3376_v47 = vunpack.i.h.bf16 %v3374_v54  ;;  %v3375_v49 = vunpack.i.l.bf16 %v3374_v54  ;;  %2684 = vmatmul.mubr.msk.f32.gmra.mrb[6].mxu0 %vm401_vm6, %v3967_v24  ;;  %v4007_v52 = vpop.permute.xlu0 %3398 }
 0x159   : > { %2834 = vmatmul.mubr.msk.f32.vlgmr.msra.gmra.mrb[8].mxu1 %vm401_vm6, %v3897_v41  ;;  %1644 = vmatprep.mubr.f32.mxu0 %v3447_v1  ;;  %v3401_v19 = vunpack.i.h.bf16 %v4007_v52 }
 0x15a   : > { %2980 = vmatpush3.bf16.msra.mxu1 %v2977_v44  ;;  %2836 = vmatprep.mubr.msk.f32.mxu1 %vm401_vm6, %v337_v20  ;;  %v1800_v41 = vsel %vm1795_vm10, %v3375_v49, %v3365_v5  ;;  %v1802_v62 = vsel %vm1795_vm10, %v3376_v47, %v3370_v23  ;;  %v4021_v49 = vld [vmem:[%s4281_s1 + $0xa8] sm:$0xff]  ;;  %v4047_v47 = vld [vmem:[%s4281_s1 + $0xb0] sm:$0xff] }
 0x15b   : > { %2982 = vmatprep.subr.bf16.mxu1 %v2981_v18  ;;  %v4003_v39 = vpop.permute.xlu1 %3388  ;;  %v3039_v33 = vpack.c.bf16 %v1802_v62, %v1800_v41  ;;  %v4123_v62 = vld [vmem:[%s4281_s1 + $0xc8] sm:$0xff] }
 0x15c   : > { %v3391_v44 = vunpack.i.h.bf16 %v4003_v39  ;;  %v3390_v20 = vunpack.i.l.bf16 %v4003_v39  ;;  %2693 = vmatmul.mubr.msk.f32.vlgmr.msra.gmra.mrb[0].mxu0 %vm401_vm6, %v3994_v10 }
 0x15d   : > { %3036 = vmatpush1.bf16.msra.mxu0 %v3035_v31  ;;  %2837 = vmatmul.mubr.msk.f32.gmra.mrb[10].mxu1 %vm401_vm6, %v338_v51  ;;  %v4049_v51 = vpop.permute.xlu0 %3408 }
 0x15e   : > { %2984 = vmatpush3.bf16.msra.mxu1 %v2981_v18  ;;  %3038 = vmatprep.subr.bf16.mxu0 %v3037_v46  ;;  %v2047_v9 = vsel %vm2043_vm11, %v3390_v20, %v3391_v44  ;;  %v2997_v18 = vpack.c.bf16 %v3281_v2, %v3276_v14  ;;  %v3381_v14 = vunpack.i.h.bf16 %v3935_v13 }
 0x15f   : > { %2994 = vmatprep.subr.bf16.mxu1 %v2993_v4  ;;  %v4031_v43 = vpop.permute.xlu1 %3393  ;;  %1650 = vmatprep.mubr.f32.mxu0 %v3447_v1  ;;  %v3049_v53 = vpack.c.bf16 %v2047_v9, %v2045_v26  ;;  %v4292_v26 = vunpack.i.h.bf16 %v3817_v58  ;;  %v4293_v58 = vunpack.i.h.bf16 %v3880_v36 }
 0x160   : > { %2847 = vmatprep.mubr.msk.f32.mxu1 %vm401_vm6, %v3669_v12  ;;  %2694 = vmatmul.mubr.msk.f32.gmra.mrb[2].mxu0 %vm401_vm6, %v4021_v49  ;;  %v3395_v2 = vunpack.i.l.bf16 %v4031_v43  ;;  %v2046_v55 = vsel %vm2043_vm11, %v3381_v14, %v3390_v20 }
 0x161   : > { %3040 = vmatpush1.bf16.msra.mxu0 %v3039_v33  ;;  %2848 = vmatmul.mubr.msk.f32.vlgmr.msra.gmra.mrb[8].mxu1 %vm401_vm6, %v3687_v40  ;;  %v3396_v40 = vunpack.i.h.bf16 %v4031_v43  ;;  %v4079_v59 = vpop.permute.xlu0 %3413  ;;  %v2703_v33 = vld [vmem:[%s4281_s1 + $0xd0] sm:$0xff]  ;;  %v2725_v43 = vld [vmem:[%s4281_s1 + $0x100] sm:$0xff] }
 0x162   : > { %2996 = vmatpush3.bf16.msra.mxu1 %v2993_v4  ;;  %3050 = vmatprep.subr.bf16.mxu0 %v3049_v53 }
 0x163   : > { %2998 = vmatprep.subr.bf16.mxu1 %v2997_v18  ;;  %v3404_v12 = vpop.permute.xlu1 %3403  ;;  %1656 = vmatprep.mubr.f32.mxu0 %v3447_v1  ;;  %v2049_v21 = vsel %vm2043_vm11, %v3395_v2, %v3396_v40  ;;  %v3061_v50 = vpack.c.bf16 %v3401_v19, %v3396_v40  ;;  %v2726_v40 = vld [vmem:[%s4281_s1 + $0x108] sm:$0xff] }
 0x164   : > { %2850 = vmatprep.mubr.msk.f32.mxu1 %vm401_vm6, %v3726_v22  ;;  %2695 = vmatmul.mubr.msk.f32.gmra.mrb[4].mxu0 %vm401_vm6, %v4047_v47  ;;  %v3400_v22 = vunpack.i.l.bf16 %v4007_v52  ;;  %v3406_v5 = vunpack.i.h.bf16 %v3404_v12  ;;  %v3405_v23 = vunpack.i.l.bf16 %v3404_v12  ;;  %v2716_v52 = vld [vmem:[%s4281_s1 + $0xf8] sm:$0xff] }
 0x165   : > { %2851 = vmatmul.mubr.msk.f32.gmra.mrb[10].mxu1 %vm401_vm6, %v3751_v16  ;;  %1662 = vmatprep.mubr.f32.mxu0 %v3447_v1  ;;  %v3380_v16 = vunpack.i.l.bf16 %v3935_v13  ;;  %v4095_v13 = vld [vmem:[%s4281_s1 + $0xc0] sm:$0xff] }
 0x166   : > { %3000 = vmatpush3.bf16.msra.mxu1 %v2997_v18  ;;  %2861 = vmatprep.mubr.msk.f32.mxu1 %vm401_vm6, %v3778_v38  ;;  %v3013_v38 = vpack.c.bf16 %v3311_v45, %v3306_v25  ;;  %v3416_v25 = vunpack.i.h.bf16 %v4079_v59  ;;  %v2051_v17 = vsel %vm2043_vm11, %v3400_v22, %v3401_v19  ;;  %v2048_v31 = vsel %vm2043_vm11, %v3405_v23, %v3395_v2  ;;  %v2728_v19 = vld [vmem:[%s4281_s1 + $0x118] sm:$0xff] }
 0x167   : > { %3010 = vmatprep.subr.bf16.mxu1 %v3009_v32  ;;  %v4075_v35 = vpop.permute.xlu1 %3418  ;;  %v2044_v34 = vsel %vm2043_vm11, %v3380_v16, %v3385_v0  ;;  %v2050_v46 = vsel %vm2043_vm11, %v3406_v5, %v3400_v22  ;;  %v3053_v0 = vpack.c.bf16 %v2051_v17, %v2049_v21  ;;  %v3410_v2 = vunpack.i.l.bf16 %v4049_v51 }
 0x168   : > { %2696 = vmatmul.mubr.msk.f32.gmra.mrb[6].mxu0 %vm401_vm6, %v4068_v7  ;;  %v3421_v54 = vunpack.i.h.bf16 %v4075_v35  ;;  %v3420_v60 = vunpack.i.l.bf16 %v4075_v35  ;;  %v3051_v45 = vpack.c.bf16 %v2046_v55, %v2044_v34  ;;  %v3055_v4 = vpack.c.bf16 %v2050_v46, %v2048_v31 }
 0x169   : > { %2862 = vmatmul.mubr.msk.f32.vlgmr.msra.gmra.mrb[8].mxu1 %vm401_vm6, %v3806_v29  ;;  %1892 = vmatprep.mubr.f32.mxu0 %v3447_v1  ;;  %v3415_v29 = vunpack.i.l.bf16 %v4079_v59  ;;  %v3045_v16 = vpack.c.bf16 %v3371_v15, %v3366_v57  ;;  %v3057_v5 = vpack.c.bf16 %v3391_v44, %v3386_v30  ;;  %v2715_v30 = vld [vmem:[%s4281_s1 + $0xf0] sm:$0xff] }
 0x16a   : > { %3012 = vmatpush3.bf16.msra.mxu1 %v3009_v32  ;;  %2864 = vmatprep.mubr.msk.f32.mxu1 %vm401_vm6, %v3826_v61  ;;  %v4290_v61 = vunpack.i.h.bf16 %v3839_v11  ;;  %v2295_v20 = vsel %vm2291_vm12, %v3420_v60, %v3421_v54  ;;  %v3411_v32 = vunpack.i.h.bf16 %v4049_v51  ;;  %v3073_v39 = vpack.c.bf16 %v3421_v54, %v3416_v25 }
 0x16b   : > { %3014 = vmatprep.subr.bf16.mxu1 %v3013_v38  ;;  %v4128_v27 = vpop.permute.xlu1 %3423  ;;  %v2292_v55 = vsel %vm2291_vm12, %v3410_v2, %v3415_v29 }
 0x16c   : > { %2705 = vmatmul.mubr.msk.f32.vlgmr.msra.gmra.mrb[0].mxu0 %vm401_vm6, %v4095_v13  ;;  %v3025_v41 = vpack.c.bf16 %v4290_v61, %v3326_v3  ;;  %v2293_v3 = vsel %vm2291_vm12, %v3415_v29, %v3416_v25  ;;  %v3426_v53 = vunpack.i.h.bf16 %v4128_v27  ;;  %v3425_v18 = vunpack.i.l.bf16 %v4128_v27 }
 0x16d   : > { %3052 = vmatpush1.bf16.msra.mxu0 %v3051_v45  ;;  %2865 = vmatmul.mubr.msk.f32.gmra.mrb[10].mxu1 %vm401_vm6, %v3853_v48  ;;  %v3065_v11 = vpack.c.bf16 %v2295_v20, %v2293_v3  ;;  %v4291_v48 = vunpack.i.h.bf16 %v3873_v6  ;;  %v4294_v6 = vunpack.i.h.bf16 %v3930_v28 }
 0x16e   : > { %3016 = vmatpush3.bf16.msra.mxu1 %v3013_v38  ;;  %3054 = vmatprep.subr.bf16.mxu0 %v3053_v0  ;;  %v2297_v51 = vsel %vm2291_vm12, %v3425_v18, %v3426_v53 }
 0x16f   : > { %3026 = vmatprep.subr.bf16.mxu1 %v3025_v41  ;;  %1898 = vmatprep.mubr.f32.mxu0 %v3447_v1  ;;  %v3029_v9 = vpack.c.bf16 %v4292_v26, %v4291_v48  ;;  %v3434_v12 = vpop.permute.xlu1 %3433 }
 0x170   : > { %2875 = vmatprep.mubr.msk.f32.mxu1 %vm401_vm6, %v3889_v37  ;;  %2706 = vmatmul.mubr.msk.f32.gmra.mrb[2].mxu0 %vm401_vm6, %v4123_v62  ;;  %v4148_v37 = vpop.permute.xlu0 %3428  ;;  %v3436_v14 = vunpack.i.h.bf16 %v3434_v12  ;;  %v3435_v22 = vunpack.i.l.bf16 %v3434_v12 }
 0x171   : > { %3056 = vmatpush1.bf16.msra.mxu0 %v3055_v4  ;;  %2876 = vmatmul.mubr.msk.f32.vlgmr.msra.gmra.mrb[8].mxu1 %vm401_vm6, %v3920_v63  ;;  %v3041_v63 = vpack.c.bf16 %v4294_v6, %v4293_v58  ;;  %v3431_v36 = vunpack.i.h.bf16 %v4148_v37  ;;  %v3430_v28 = vunpack.i.l.bf16 %v4148_v37 }
 0x172   : > { %3028 = vmatpush3.bf16.msra.mxu1 %v3025_v41  ;;  %3066 = vmatprep.subr.bf16.mxu0 %v3065_v11  ;;  %v2296_v57 = vsel %vm2291_vm12, %v3435_v22, %v3425_v18 }
 0x173   : > { %3030 = vmatprep.subr.bf16.mxu1 %v3029_v9  ;;  %1904 = vmatprep.mubr.f32.mxu0 %v3447_v1  ;;  %v2299_v56 = vsel %vm2291_vm12, %v3430_v28, %v3431_v36  ;;  %v2298_v15 = vsel %vm2291_vm12, %v3436_v14, %v3430_v28  ;;  %v3077_v44 = vpack.c.bf16 %v3431_v36, %v3426_v53 }
 0x174   : > { %2878 = vmatprep.mubr.msk.f32.mxu1 %vm401_vm6, %v3944_v8  ;;  %2707 = vmatmul.mubr.msk.f32.gmra.mrb[4].mxu0 %vm401_vm6, %v2703_v33  ;;  %v2704_v8 = vld [vmem:[%s4281_s1 + $0xd8] sm:$0xff]  ;;  %v3071_v23 = vpack.c.bf16 %v2298_v15, %v2296_v57 }
 0x175   : > { %2879 = vmatmul.mubr.msk.f32.gmra.mrb[10].mxu1 %vm401_vm6, %v3967_v24  ;;  %1910 = vmatprep.mubr.f32.mxu0 %v3447_v1  ;;  %v2294_v24 = vsel %vm2291_vm12, %v3411_v32, %v3420_v60  ;;  %v2517_v25 = vpop.permute.xlu0 %2516 }
 0x176   : > { %3032 = vmatpush3.bf16.msra.mxu1 %v3029_v9  ;;  %2889 = vmatprep.mubr.msk.f32.mxu1 %vm401_vm6, %v3994_v10  ;;  %v2713_v10 = vld [vmem:[%s4281_s1 + $0xe0] sm:$0xff]  ;;  %v3067_v42 = vpack.c.bf16 %v2294_v24, %v2292_v55 }
 0x177   : > { %3042 = vmatprep.subr.bf16.mxu1 %v3041_v63 }
 0x178   : > { %2708 = vmatmul.mubr.msk.f32.gmra.mrb[6].mxu0 %vm401_vm6, %v2704_v8 }
 0x179   : > { %2890 = vmatmul.mubr.msk.f32.vlgmr.msra.gmra.mrb[8].mxu1 %vm401_vm6, %v4021_v49  ;;  %2140 = vmatprep.mubr.f32.mxu0 %v3447_v1  ;;  %v3069_v49 = vpack.c.bf16 %v2299_v56, %v2297_v51 }
 0x17a   : > { %3044 = vmatpush3.bf16.msra.mxu1 %v3041_v63  ;;  %2892 = vmatprep.mubr.msk.f32.mxu1 %vm401_vm6, %v4047_v47  ;;  %v2714_v47 = vld [vmem:[%s4281_s1 + $0xe8] sm:$0xff] }
 0x17b   : > { %3046 = vmatprep.subr.bf16.mxu1 %v3045_v16 }
 0x17c   : > { %2717 = vmatmul.mubr.msk.f32.vlgmr.msra.gmra.mrb[0].mxu0 %vm401_vm6, %v2713_v10 }
 0x17d   : > { %3068 = vmatpush1.bf16.msra.mxu0 %v3067_v42  ;;  %2893 = vmatmul.mubr.msk.f32.gmra.mrb[10].mxu1 %vm401_vm6, %v4068_v7  ;;  %v2727_v7 = vld [vmem:[%s4281_s1 + $0x110] sm:$0xff] }
 0x17e   : > { %3048 = vmatpush3.bf16.msra.mxu1 %v3045_v16  ;;  %3070 = vmatprep.subr.bf16.mxu0 %v3069_v49 }
 0x17f   : > { %3058 = vmatprep.subr.bf16.mxu1 %v3057_v5  ;;  %2146 = vmatprep.mubr.f32.mxu0 %v3447_v1 }
 0x180   : > { %2903 = vmatprep.mubr.msk.f32.mxu1 %vm401_vm6, %v4095_v13  ;;  %2718 = vmatmul.mubr.msk.f32.gmra.mrb[2].mxu0 %vm401_vm6, %v2714_v47  ;;  %v2522_v46 = vpop.permute.xlu1 %2521 }
 0x181   : > { %3072 = vmatpush1.bf16.msra.mxu0 %v3071_v23  ;;  %2904 = vmatmul.mubr.msk.f32.vlgmr.msra.gmra.mrb[8].mxu1 %vm401_vm6, %v4123_v62 }
 0x182   : > { %3060 = vmatpush3.bf16.msra.mxu1 %v3057_v5  ;;  %2152 = vmatprep.mubr.f32.mxu0 %v3447_v1 }
 0x183   : > { %3062 = vmatprep.subr.bf16.mxu1 %v3061_v50  ;;  %2906 = vmatprep.mubr.msk.f32.mxu1 %vm401_vm6, %v2703_v33  ;;  %v2532_v33 = vpop.permute.xlu0 %2531 }
 0x184   : > { %2719 = vmatmul.mubr.msk.f32.gmra.mrb[4].mxu0 %vm401_vm6, %v2715_v30  ;;  %v2527_v63 = vpop.permute.xlu1 %2526 }
 0x185   : > { %2907 = vmatmul.mubr.msk.f32.gmra.mrb[10].mxu1 %vm401_vm6, %v2704_v8  ;;  %2158 = vmatprep.mubr.f32.mxu0 %v3447_v1 }
 0x186   : > { %3064 = vmatpush3.bf16.msra.mxu1 %v3061_v50  ;;  %2917 = vmatprep.mubr.msk.f32.mxu1 %vm401_vm6, %v2713_v10 }
 0x187   : > { %3074 = vmatprep.subr.bf16.mxu1 %v3073_v39 }
 0x188   : > { %2720 = vmatmul.mubr.msk.f32.gmra.mrb[6].mxu0 %vm401_vm6, %v2716_v52 }
 0x189   : > { %2918 = vmatmul.mubr.msk.f32.vlgmr.msra.gmra.mrb[8].mxu1 %vm401_vm6, %v2714_v47  ;;  %2388 = vmatprep.mubr.f32.mxu0 %v3447_v1 }
 0x18a   : > { %3076 = vmatpush3.bf16.msra.mxu1 %v3073_v39  ;;  %2920 = vmatprep.mubr.msk.f32.mxu1 %vm401_vm6, %v2715_v30 }
 0x18b   : > { %3078 = vmatprep.subr.bf16.mxu1 %v3077_v44 }
 0x18c   : > { %2729 = vmatmul.mubr.msk.f32.vlgmr.msra.gmra.mrb[0].mxu0 %vm401_vm6, %v2725_v43 }
 0x18d   : > { %2921 = vmatmul.mubr.msk.f32.gmra.mrb[10].mxu1 %vm401_vm6, %v2716_v52  ;;  %2394 = vmatprep.mubr.f32.mxu0 %v3447_v1 }
 0x18e   : > { %3080 = vmatpush3.bf16.msra.mxu1 %v3077_v44  ;;  %2931 = vmatprep.mubr.msk.f32.mxu1 %vm401_vm6, %v2725_v43 }
 0x190   : > { %2730 = vmatmul.mubr.msk.f32.gmra.mrb[2].mxu0 %vm401_vm6, %v2726_v40 }
 0x191   : > { %2932 = vmatmul.mubr.msk.f32.vlgmr.msra.gmra.mrb[8].mxu1 %vm401_vm6, %v2726_v40  ;;  %2400 = vmatprep.mubr.f32.mxu0 %v3447_v1 }
 0x192   : > { %2934 = vmatprep.mubr.msk.f32.mxu1 %vm401_vm6, %v2727_v7 }
 0x194   : > { %2731 = vmatmul.mubr.msk.f32.gmra.mrb[4].mxu0 %vm401_vm6, %v2727_v7 }
 0x195   : > { %2935 = vmatmul.mubr.msk.f32.gmra.mrb[10].mxu1 %vm401_vm6, %v2728_v19  ;;  %2406 = vmatprep.mubr.f32.mxu0 %v3447_v1 }
 0x198   : > { %2732 = vmatmul.mubr.msk.f32.gmra.mrb[6].mxu0 %vm401_vm6, %v2728_v19 }
 0x21c   : > { %v666_v35 = vpop.f32.mrb[0].mxu1 }
 0x21d   : > { %v668_v59 = vpop.f32.mrb[1].mxu1 }
 0x220   : > { %v672_v38 = vpop.f32.mrb[2].mxu1 }
 0x221   : > { %v674_v54 = vpop.f32.mrb[3].mxu1 }
 0x224   : > { %v678_v60 = vpop.f32.mrb[4].mxu1 }
 0x225   : > { %v680_v13 = vpop.f32.mrb[5].mxu1 }
 0x228   : > { %v684_v21 = vpop.f32.mrb[6].mxu1 }
 0x229   : > { %v686_v34 = vpop.f32.mrb[7].mxu1 }
 0x25f   : > { %v2390_v45 = vpop.f32.mrb[0].mxu0 }
 0x260   : > { %v3081_v29 = vadd.f32 %v2390_v45, %v666_v35  ;;  %v2392_v17 = vpop.f32.mrb[1].mxu0 }
 0x261   : > { %v3082_v31 = vadd.f32 %v2392_v17, %v668_v59 }
 0x262   : > { %v2534_v0 = vadd.f32 %v3081_v29, %v2517_v25 }
 0x263   : > { %v2535_v1 = vadd.f32 %v3082_v31, %v2517_v25  ;;  %v2396_v61 = vpop.f32.mrb[2].mxu0 }
 0x264   : > { %v2546_v41 = vmax.f32 %v2534_v0, 0.0  ;;  %v3083_v62 = vadd.f32 %v2396_v61, %v672_v38  ;;  %v2398_v20 = vpop.f32.mrb[3].mxu0  ;;  %v2933_v4 = vpop.f32.mrb[8].mxu1 }
 0x265   : > { %v2547_v27 = vmax.f32 %v2535_v1, 0.0  ;;  %v3084_v3 = vadd.f32 %v2398_v20, %v674_v54  ;;  %v2539_v11 = vadd.f32 %v2933_v4, %v2522_v46  ;;  %v2479_v48 = vpop.f32.mrb[9].mxu1 }
 0x266   : > { %2558 = vst [vmem:[%s4259_s22] sm:$0xff] %v2546_v41  ;;  %v2537_v26 = vadd.f32 %v3083_v62, %v2522_v46  ;;  %v2536_v9 = vadd.f32 %v2517_v25, %v2479_v48 }
 0x267   : > { %2559 = vst [vmem:[%s4259_s22 + $0x8] sm:$0xff] %v2547_v27  ;;  %v2538_v37 = vadd.f32 %v3084_v3, %v2522_v46  ;;  %v2551_v58 = vmax.f32 %v2539_v11, 0.0  ;;  %v2402_v6 = vpop.f32.mrb[4].mxu0 }
 0x268   : > { %v2549_v53 = vmax.f32 %v2537_v26, 0.0  ;;  %v2548_v18 = vmax.f32 %v2536_v9, 0.0  ;;  %v3085_v12 = vadd.f32 %v2402_v6, %v678_v60  ;;  %v2404_v8 = vpop.f32.mrb[5].mxu0  ;;  %v2936_v32 = vpop.f32.mrb[10].mxu1 }
 0x269   : > { %v2550_v36 = vmax.f32 %v2538_v37, 0.0  ;;  %2564 = vst.msk [vmem:[%s4259_s22 + $0x28] sm:$0xff] %vm2560_vm13, %v2551_v58  ;;  %v3086_v28 = vadd.f32 %v2404_v8, %v680_v13  ;;  %v2545_v2 = vadd.f32 %v2936_v32, %v2532_v33  ;;  %v2489_v24 = vpop.f32.mrb[11].mxu1 }
 0x26a   : > { %2562 = vst [vmem:[%s4259_s22 + $0x18] sm:$0xff] %v2549_v53  ;;  %2561 = vst.msk [vmem:[%s4259_s22 + $0x10] sm:$0xff] %vm2560_vm13, %v2548_v18  ;;  %v2540_v14 = vadd.f32 %v3085_v12, %v2527_v63  ;;  %v2542_v22 = vadd.f32 %v2527_v63, %v2489_v24 }
 0x26b   : > { %2563 = vst [vmem:[%s4259_s22 + $0x20] sm:$0xff] %v2550_v36  ;;  %v2557_v16 = vmax.f32 %v2545_v2, 0.0  ;;  %v2541_v10 = vadd.f32 %v3086_v28, %v2527_v63  ;;  %v2408_v51 = vpop.f32.mrb[6].mxu0 }
 0x26c   : > { %v2552_v55 = vmax.f32 %v2540_v14, 0.0  ;;  %v2554_v42 = vmax.f32 %v2542_v22, 0.0  ;;  %v3087_v56 = vadd.f32 %v2408_v51, %v684_v21  ;;  %v2410_v57 = vpop.f32.mrb[7].mxu0 }
 0x26d   : > { %2570 = vst.msk [vmem:[%s4259_s22 + $0x58] sm:$0xff] %vm2560_vm13, %v2557_v16  ;;  %v2553_v15 = vmax.f32 %v2541_v10, 0.0  ;;  %v3088_v49 = vadd.f32 %v2410_v57, %v686_v34 }
 0x26e   : > { %2565 = vst [vmem:[%s4259_s22 + $0x30] sm:$0xff] %v2552_v55  ;;  %2567 = vst.msk [vmem:[%s4259_s22 + $0x40] sm:$0xff] %vm2560_vm13, %v2554_v42  ;;  %v2543_v5 = vadd.f32 %v3087_v56, %v2532_v33 }
 0x26f   : > { %2566 = vst [vmem:[%s4259_s22 + $0x38] sm:$0xff] %v2553_v15  ;;  %v2544_v47 = vadd.f32 %v3088_v49, %v2532_v33 }
 0x270   : > { %v2555_v23 = vmax.f32 %v2543_v5, 0.0 }
 0x271   : > { %v2556_v50 = vmax.f32 %v2544_v47, 0.0 }
 0x272   : > { %2568 = vst [vmem:[%s4259_s22 + $0x48] sm:$0xff] %v2555_v23 }
 0x273   : > { %2569 = vst [vmem:[%s4259_s22 + $0x50] sm:$0xff] %v2556_v50 }
 0x274 PF: > { %s14_s15 = sadd.s32 1, %s3445_s15  }
 0x275   : > { %p11_p4 = scmp.ge.s32.totalorder %s14_s15, 4  }
 0x277   :  { %13 = sbr.rel (!%p11_p4) target bundleno = 1 (0x1), region = 74 }

// kernel: rg_forward_pallas.13
= control target key start
LH: loop header
LB: loop body
LE: loop exit
PB: predicated region body
PF: predicated region fallthrough
CT: control target
= control target key end

     0   :  { %s3560_s18 = smov 0   ;;  %s4375_s0 = inlined_call_operand.vmem [shape: f32[2,32,324], index: 0, kind: input, shape index: {}]   ;;  %s4376_s1 = inlined_call_operand.vmem [shape: f32[9,32,32], index: 1, kind: input, shape index: {}]   ;;  %s4377_s2 = inlined_call_operand.vmem [shape: f32[32,1], index: 2, kind: input, shape index: {}]   ;;  %s4378_s3 = inlined_call_operand.vmem [shape: f32[1,324], index: 3, kind: input, shape index: {}]   ;;  %s4379_s4 = inlined_call_operand.vmem [shape: f32[2,32,324], index: 4, kind: input, shape index: {}]   ;;  %s4380_s5 = inlined_call_operand.vmem [shape: f32[2,32,324], index: 5, kind: output, shape index: {}]  }
   0x1 LB: > { %s2697_s19 = sadd.s32 4294967295, %s3517_s18   ;;  %p2701_p0 = scmp.ge.s32.totalorder %s3517_s18, 1  ;;  %s3517_s18 = sphi %s3560_s18, %s15_s18  }
   0x2   : > { %p197_p1 = scmp.lt.s32.totalorder %s3517_s18, 3 }
   0x4   : > { %p198_p2 = pnand %p2701_p0, %p197_p1 }
   0x5   : > { %p230_p3 = scmp.lt.s32.totalorder (!%p198_p2), %s2697_s19, 1  ;;  %v272_v0 = vlaneseq (!%p198_p2)  ;;  %v3519_v1 = vmov (!%p198_p2), 0.0   ;;  %vm248_vm0 = vcmask (!%p198_p2), 867328   ;;  %v245_v3 = vld [vmem:[%s4378_s3] sm:$0x7] (!%p198_p2)  ;;  %s3520_s26 = smov (!%p198_p2), 19  }
   0x6   : > { %201 = sbr.rel (%p198_p2) target bundleno = 628 (0x274), region = 40  ;;  %246 = vst [vmem:[#allocation2] sm:$0xff] (!%p198_p2), %v3519_v1  ;;  %250 = vst [vmem:[#allocation2 + $0x18] sm:$0xff] (!%p198_p2), %v3519_v1  ;;  %947 = vmatprep.mubr.f32.mxu0 (!%p198_p2), %v3519_v1  ;;  %525 = vmatprep.mubr.f32.mxu1 (!%p198_p2), %v3519_v1  ;;  %vm356_vm1 = vcmask (!%p198_p2), 1047704   ;;  %vm335_vm2 = vcmask (!%p198_p2), 154624   ;;  %vm359_vm3 = vcmask (!%p198_p2), 711680  }
   0x7   : > { %253 = vst [vmem:[#allocation2 + $0x30] sm:$0xff] (!%p198_p2), %v3519_v1  ;;  %256 = vst [vmem:[#allocation2 + $0x48] sm:$0xff] (!%p198_p2), %v3519_v1  ;;  %v273_v2 = vshrl.u32 (!%p198_p2), %v272_v0, 7  ;;  %s3521_s27 = smov (!%p198_p2), 126   ;;  %s3522_s28 = smov (!%p198_p2), 127   ;;  %vm850_vm4 = vcmask (!%p198_p2), 1031168  }
   0x8   : > { %249 = vst.msk [vmem:[#allocation2 + $0x10] sm:$0xff] (!%p198_p2), %vm248_vm0, %v3519_v1  ;;  %252 = vst.msk [vmem:[#allocation2 + $0x28] sm:$0xff] (!%p198_p2), %vm248_vm0, %v3519_v1  ;;  %s3523_s29 = smov (!%p198_p2), 110   ;;  %s3524_s30 = smov (!%p198_p2), 109   ;;  %vm427_vm5 = vcmask (!%p198_p2), 1039360   ;;  %vm448_vm6 = vcmask (!%p198_p2), 261120  }
   0x9   : > { %255 = vst.msk [vmem:[#allocation2 + $0x40] sm:$0xff] (!%p198_p2), %vm248_vm0, %v3519_v1  ;;  %258 = vst.msk [vmem:[#allocation2 + $0x58] sm:$0xff] (!%p198_p2), %vm248_vm0, %v3519_v1  ;;  %v282_v4 = vsub.s32 (!%p198_p2), 2, %v273_v2  ;;  %v274_v5 = vsub.s32 (!%p198_p2), 0, %v273_v2  ;;  %v278_v6 = vsub.s32 (!%p198_p2), 1, %v273_v2  ;;  %s3525_s6 = smov (!%p198_p2), 108  }
   0xa   : > { %s3526_s7 = smov (!%p198_p2), 92   ;;  %s3527_s8 = smov (!%p198_p2), 91   ;;  %vm1098_vm7 = vcmask (!%p198_p2), 900096   ;;  %vm1346_vm8 = vcmask (!%p198_p2), 891904   ;;  %vm1594_vm9 = vcmask (!%p198_p2), 883712   ;;  %vm1842_vm10 = vcmask (!%p198_p2), 752640  }
   0xb   : > { %v283_v7 = vrot.slane (!%p198_p2), %v245_v3, %v282_v4  ;;  %v275_v8 = vrot.slane (!%p198_p2), %v245_v3, %v274_v5  ;;  %v279_v9 = vrot.slane (!%p198_p2), %v245_v3, %v278_v6  ;;  %s3528_s9 = smov (!%p198_p2), 90   ;;  %vm2090_vm11 = vcmask (!%p198_p2), 744448  }
   0xc   : > { %vm2338_vm12 = vcmask (!%p198_p2), 736256   ;;  %vm2619_vm13 = vcmask (!%p198_p2), 556032  }
   0xd   : > { %s4392_s19 = smov (!%p230_p3, %s2697_s19), 1 }
   0xe   : > { %s3581_s22 = smul.u32 96, %s4392_s19 }
  0x10   : > { %s3587_s25 = scalar_lea.vmem %s4375_s0, %s3581_s22 }
  0x11   : > { %v261_v10 = vld [vmem:[%s3587_s25 + $0x10] sm:$0xff]  ;;  %v259_v11 = vld [vmem:[%s3587_s25] sm:$0xff]  ;;  %v262_v12 = vld [vmem:[%s3587_s25 + $0x18] sm:$0xff] }
  0x12   : > { %v289_v13 = vmul.f32 %v283_v7, %v261_v10  ;;  %v287_v14 = vmul.f32 %v275_v8, %v259_v11  ;;  %v260_v15 = vld [vmem:[%s3587_s25 + $0x8] sm:$0xff]  ;;  %v290_v16 = vmul.f32 %v275_v8, %v262_v12  ;;  %v263_v19 = vld [vmem:[%s3587_s25 + $0x20] sm:$0xff]  ;;  %v266_v22 = vld [vmem:[%s3587_s25 + $0x38] sm:$0xff] }
  0x13   : > { %v288_v17 = vmul.f32 %v279_v9, %v260_v15  ;;  %v264_v18 = vld [vmem:[%s3587_s25 + $0x28] sm:$0xff]  ;;  %v291_v21 = vmul.f32 %v279_v9, %v263_v19  ;;  %v265_v23 = vld [vmem:[%s3587_s25 + $0x30] sm:$0xff]  ;;  %v294_v24 = vmul.f32 %v279_v9, %v266_v22  ;;  %v267_v27 = vld [vmem:[%s3587_s25 + $0x40] sm:$0xff]  ;;  %v3529_v22 = vmov 0  }
  0x14   : > { %315 = vrot.lane.b32.xlu1 %v289_v13, %s3520_s26  ;;  %311 = vrot.lane.b32.xlu0 %v287_v14, %s3520_s26  ;;  %v292_v20 = vmul.f32 %v283_v7, %v264_v18  ;;  %v293_v25 = vmul.f32 %v275_v8, %v265_v23  ;;  %v268_v26 = vld [vmem:[%s3587_s25 + $0x48] sm:$0xff]  ;;  %v295_v29 = vmul.f32 %v283_v7, %v267_v27  ;;  %v270_v30 = vld [vmem:[%s3587_s25 + $0x58] sm:$0xff] }
  0x15   : > { %v296_v28 = vmul.f32 %v275_v8, %v268_v26  ;;  %v269_v31 = vld [vmem:[%s3587_s25 + $0x50] sm:$0xff]  ;;  %v298_v32 = vmul.f32 %v283_v7, %v270_v30  ;;  %v2557_v18 = vld [vmem:[%s4377_s2] sm:$0xff]  ;;  %v2558_v19 = vld [vmem:[%s4377_s2 + $0x8] sm:$0xff]  ;;  %3509 = vset.pattern.permute.xlu0 %v3529_v22  ;;  %3510 = vset.pattern.permute.xlu1 %v3529_v22  ;;  %s4335_s25 = scalar_lea.vmem %s4379_s4, %s3581_s22 }
  0x16   : > { %v297_v33 = vmul.f32 %v279_v9, %v269_v31 }
  0x18   : > { %317 = vrot.lane.b32.xlu1 %v290_v16, %s3520_s26  ;;  %313 = vrot.lane.b32.xlu0 %v288_v17, %s3520_s26 }
  0x1c   : > { %321 = vrot.lane.b32.xlu1 %v292_v20, %s3520_s26  ;;  %319 = vrot.lane.b32.xlu0 %v291_v21, %s3520_s26 }
  0x20   : > { %325 = vrot.lane.b32.xlu1 %v294_v24, %s3520_s26  ;;  %323 = vrot.lane.b32.xlu0 %v293_v25, %s3520_s26  ;;  %v2560_v24 = vld [vmem:[%s4377_s2 + $0x18] sm:$0xff]  ;;  %v2559_v25 = vld [vmem:[%s4377_s2 + $0x10] sm:$0xff] }
  0x24   : > { %329 = vrot.lane.b32.xlu1 %v296_v28, %s3520_s26  ;;  %327 = vrot.lane.b32.xlu0 %v295_v29, %s3520_s26 }
  0x28   : > { %333 = vrot.lane.b32.xlu1 %v298_v32, %s3520_s26  ;;  %331 = vrot.lane.b32.xlu0 %v297_v33, %s3520_s26 }
  0x86   : > { %v316_v34 = vpop.permute.xlu1 %315  ;;  %v312_v35 = vpop.permute.xlu0 %311 }
  0x87   : > { %357 = vst.msk [vmem:[#allocation2] sm:$0xff] %vm356_vm1, %v312_v35 }
  0x8a   : > { %v318_v36 = vpop.permute.xlu1 %317  ;;  %v314_v37 = vpop.permute.xlu0 %313 }
  0x8b   : > { %361 = vst.msk [vmem:[#allocation2 + $0x18] sm:$0xff] %vm356_vm1, %v318_v36  ;;  %v3604_v38 = vsel %vm335_vm2, %v312_v35, %v314_v37  ;;  %v337_v39 = vsel %vm335_vm2, %v314_v37, %v316_v34 }
  0x8c   : > { %360 = vst.msk [vmem:[#allocation2 + $0x10] sm:$0xff] %vm359_vm3, %v337_v39 }
  0x8e   : > { %v322_v40 = vpop.permute.xlu1 %321  ;;  %v320_v41 = vpop.permute.xlu0 %319  ;;  %v3613_v44 = vld [vmem:[#allocation2] sm:$0xff] }
  0x8f   : > { %v3609_v42 = vsel %vm335_vm2, %v318_v36, %v320_v41  ;;  %v339_v43 = vsel %vm335_vm2, %v320_v41, %v322_v40 }
  0x90   : > { %363 = vst.msk [vmem:[#allocation2 + $0x28] sm:$0xff] %vm359_vm3, %v339_v43  ;;  %v3025_v45 = vpack.c.bf16 %v3609_v42, %v3604_v38 }
  0x92   : > { %v326_v46 = vpop.permute.xlu1 %325  ;;  %v324_v47 = vpop.permute.xlu0 %323  ;;  %v3617_v48 = vld [vmem:[#allocation2 + $0x18] sm:$0xff] }
  0x93   : > { %v3620_v49 = vsel %vm335_vm2, %v324_v47, %v326_v46  ;;  %364 = vst.msk [vmem:[#allocation2 + $0x30] sm:$0xff] %vm356_vm1, %v324_v47  ;;  %v3625_v50 = vpack.i.bf16 %v3617_v48, %v3613_v44  ;;  %v3027_v51 = vpack.c.bf16 %v3617_v48, %v3613_v44  ;;  %v372_v55 = vld [vmem:[#allocation2 + $0x10] sm:$0xff]  ;;  %v3928_v48 = vld [vmem:[%s4376_s1 + $0x78] sm:$0xff] }
  0x94   : > { %v3294_v2 = vpack.i.bf16 %v372_v55, %v3604_v38  ;;  %v3853_v38 = vld [vmem:[%s4376_s1 + $0x60] sm:$0xff] }
  0x95   : > { %3270 = vrot.lane.b32.xlu0 %v3625_v50, %s3521_s27 }
  0x96   : > { %v330_v52 = vpop.permute.xlu1 %329  ;;  %v328_v53 = vpop.permute.xlu0 %327 }
  0x97   : > { %367 = vst.msk [vmem:[#allocation2 + $0x48] sm:$0xff] %vm356_vm1, %v330_v52  ;;  %v341_v54 = vsel %vm335_vm2, %v326_v46, %v328_v53  ;;  %v375_v56 = vld [vmem:[#allocation2 + $0x28] sm:$0xff] }
  0x98   : > { %366 = vst.msk [vmem:[#allocation2 + $0x40] sm:$0xff] %vm359_vm3, %v341_v54  ;;  %v3634_v57 = vpack.c.bf16 %v375_v56, %v372_v55  ;;  %v3299_v9 = vpack.i.bf16 %v375_v56, %v3609_v42 }
  0x99   : > { %3280 = vrot.lane.b32.xlu0 %v3625_v50, %s3522_s28 }
  0x9a   : > { %v334_v58 = vpop.permute.xlu1 %333  ;;  %v332_v59 = vpop.permute.xlu0 %331  ;;  %v3643_v62 = vld [vmem:[#allocation2 + $0x30] sm:$0xff] }
  0x9b   : > { %v3639_v60 = vsel %vm335_vm2, %v330_v52, %v332_v59  ;;  %v343_v61 = vsel %vm335_vm2, %v332_v59, %v334_v58 }
  0x9c   : > { %369 = vst.msk [vmem:[#allocation2 + $0x58] sm:$0xff] %vm359_vm3, %v343_v61  ;;  %v3029_v63 = vpack.c.bf16 %v3639_v60, %v3620_v49 }
  0x9d   : > { %3290 = vrot.lane.b32.xlu0 %v3625_v50, %s3523_s29 }
  0x9e   : > { %v3648_v0 = vld [vmem:[#allocation2 + $0x48] sm:$0xff] }
  0x9f   : > { %v3274_v3 = vpack.i.bf16 %v3648_v0, %v3643_v62  ;;  %v3031_v4 = vpack.c.bf16 %v3648_v0, %v3643_v62  ;;  %v378_v6 = vld [vmem:[#allocation2 + $0x40] sm:$0xff] }
  0xa0   : > { %v3304_v10 = vpack.i.bf16 %v378_v6, %v3620_v49 }
  0xa1   : > { %3295 = vrot.lane.b32.xlu0 %v3294_v2, %s3521_s27  ;;  %3275 = vrot.lane.b32.xlu1 %v3274_v3, %s3521_s27 }
  0xa3   : > { %v381_v5 = vld [vmem:[#allocation2 + $0x58] sm:$0xff] }
  0xa4   : > { %v3309_v7 = vpack.i.bf16 %v381_v5, %v3639_v60  ;;  %v3658_v8 = vpack.c.bf16 %v381_v5, %v378_v6  ;;  %v3939_v60 = vld [vmem:[%s4376_s1] sm:$0xff] }
  0xa5   : > { %3285 = vrot.lane.b32.xlu1 %v3274_v3, %s3522_s28 }
  0xa6   : > { %3310 = vrot.lane.b32.xlu0 %v3309_v7, %s3521_s27 }
  0xa9   : > { %3300 = vrot.lane.b32.xlu1 %v3299_v9, %s3521_s27 }
  0xaa   : > { %3315 = vrot.lane.b32.xlu0 %v3294_v2, %s3522_s28 }
  0xad   : > { %3305 = vrot.lane.b32.xlu1 %v3304_v10, %s3521_s27 }
  0xae   : > { %3330 = vrot.lane.b32.xlu0 %v3309_v7, %s3522_s28 }
  0xb1   : > { %3320 = vrot.lane.b32.xlu1 %v3299_v9, %s3522_s28 }
  0xb2   : > { %3335 = vrot.lane.b32.xlu0 %v3294_v2, %s3523_s29 }
  0xb5   : > { %3325 = vrot.lane.b32.xlu1 %v3304_v10, %s3522_s28  ;;  %s4343_s28 = scalar_lea.vmem %s4380_s5, %s3581_s22 }
  0xb6   : > { %3350 = vrot.lane.b32.xlu0 %v3309_v7, %s3523_s29 }
  0xb9   : > { %3340 = vrot.lane.b32.xlu1 %v3299_v9, %s3523_s29 }
  0xba   : > { %3360 = vrot.lane.b32.xlu0 %v3625_v50, %s3524_s30 }
  0xbd   : > { %3345 = vrot.lane.b32.xlu1 %v3304_v10, %s3523_s29 }
  0xbe   : > { %3365 = vrot.lane.b32.xlu0 %v3294_v2, %s3524_s30 }
  0xc1   : > { %3355 = vrot.lane.b32.xlu1 %v3274_v3, %s3523_s29 }
  0xc2   : > { %3380 = vrot.lane.b32.xlu0 %v3309_v7, %s3524_s30 }
  0xc5   : > { %3370 = vrot.lane.b32.xlu1 %v3299_v9, %s3524_s30 }
  0xc6   : > { %3390 = vrot.lane.b32.xlu0 %v3625_v50, %s3525_s6 }
  0xc9   : > { %3375 = vrot.lane.b32.xlu1 %v3304_v10, %s3524_s30 }
  0xca   : > { %3395 = vrot.lane.b32.xlu0 %v3294_v2, %s3525_s6 }
  0xcd   : > { %3385 = vrot.lane.b32.xlu1 %v3274_v3, %s3524_s30 }
  0xce   : > { %3410 = vrot.lane.b32.xlu0 %v3309_v7, %s3525_s6 }
  0xd1   : > { %3400 = vrot.lane.b32.xlu1 %v3299_v9, %s3525_s6 }
  0xd2   : > { %3420 = vrot.lane.b32.xlu0 %v3625_v50, %s3526_s7 }
  0xd5   : > { %3405 = vrot.lane.b32.xlu1 %v3304_v10, %s3525_s6 }
  0xd6   : > { %3425 = vrot.lane.b32.xlu0 %v3294_v2, %s3526_s7 }
  0xd9   : > { %3415 = vrot.lane.b32.xlu1 %v3274_v3, %s3525_s6 }
  0xda   : > { %3440 = vrot.lane.b32.xlu0 %v3309_v7, %s3526_s7 }
  0xdd   : > { %3430 = vrot.lane.b32.xlu1 %v3299_v9, %s3526_s7 }
  0xde   : > { %3450 = vrot.lane.b32.xlu0 %v3625_v50, %s3527_s8 }
  0xe1   : > { %3435 = vrot.lane.b32.xlu1 %v3304_v10, %s3526_s7 }
  0xe2   : > { %3455 = vrot.lane.b32.xlu0 %v3294_v2, %s3527_s8 }
  0xe5   : > { %3445 = vrot.lane.b32.xlu1 %v3274_v3, %s3526_s7 }
  0xe6   : > { %3470 = vrot.lane.b32.xlu0 %v3309_v7, %s3527_s8 }
  0xe9   : > { %3460 = vrot.lane.b32.xlu1 %v3299_v9, %s3527_s8 }
  0xea   : > { %3480 = vrot.lane.b32.xlu0 %v3625_v50, %s3528_s9 }
  0xed   : > { %3465 = vrot.lane.b32.xlu1 %v3304_v10, %s3527_s8 }
  0xee   : > { %3485 = vrot.lane.b32.xlu0 %v3294_v2, %s3528_s9 }
  0xf1   : > { %3475 = vrot.lane.b32.xlu1 %v3274_v3, %s3527_s8 }
  0xf2   : > { %3500 = vrot.lane.b32.xlu0 %v3309_v7, %s3528_s9 }
  0xf5   : > { %3490 = vrot.lane.b32.xlu1 %v3299_v9, %s3528_s9 }
  0xf6   : > { %2563 = vperm.xlu0 %3509, %v2557_v18  }
  0xf9   : > { %3495 = vrot.lane.b32.xlu1 %v3304_v10, %s3528_s9 }
  0xfa   : > { %2578 = vperm.xlu0 %3509, %v2560_v24  }
  0xfd   : > { %3505 = vrot.lane.b32.xlu1 %v3274_v3, %s3528_s9 }
 0x101   : > { %2568 = vperm.xlu1 %3510, %v2558_v19  }
 0x105   : > { %2573 = vperm.xlu1 %3510, %v2559_v25  }
 0x107   : > { %v3271_v11 = vpop.permute.xlu0 %3270 }
 0x108   : > { %v3273_v26 = vunpack.i.h.bf16 %v3271_v11  ;;  %v3272_v27 = vunpack.i.l.bf16 %v3271_v11 }
 0x10b   : > { %v3675_v12 = vpop.permute.xlu0 %3280 }
 0x10c   : > { %v3283_v3 = vunpack.i.h.bf16 %v3675_v12  ;;  %v3282_v5 = vunpack.i.l.bf16 %v3675_v12  ;;  %v3744_v12 = vld [vmem:[%s4376_s1 + $0x40] sm:$0xff] }
 0x10f   : > { %v3677_v13 = vpop.permute.xlu0 %3290 }
 0x113   : > { %v3276_v14 = vpop.permute.xlu1 %3275  ;;  %v3679_v15 = vpop.permute.xlu0 %3295 }
 0x114   : > { %v3298_v20 = vunpack.i.h.bf16 %v3679_v15  ;;  %v3297_v21 = vunpack.i.l.bf16 %v3679_v15  ;;  %v3278_v37 = vunpack.i.h.bf16 %v3276_v14  ;;  %v3277_v43 = vunpack.i.l.bf16 %v3276_v14 }
 0x116   : > { %v852_v33 = vsel %vm850_vm4, %v3297_v21, %v3298_v20  ;;  %v851_v35 = vsel %vm850_vm4, %v3272_v27, %v3297_v21 }
 0x117   : > { %v3681_v16 = vpop.permute.xlu1 %3285 }
 0x118   : > { %v3683_v17 = vpop.permute.xlu0 %3310  ;;  %v3287_v27 = vunpack.i.l.bf16 %v3681_v16 }
 0x119   : > { %v3313_v31 = vunpack.i.h.bf16 %v3683_v17  ;;  %v3312_v32 = vunpack.i.l.bf16 %v3683_v17 }
 0x11b   : > { %v3693_v23 = vpop.permute.xlu1 %3300  ;;  %v858_v52 = vsel %vm850_vm4, %v3312_v32, %v3313_v31  ;;  %v857_v53 = vsel %vm850_vm4, %v3278_v37, %v3312_v32 }
 0x11c   : > { %v3303_v28 = vunpack.i.h.bf16 %v3693_v23  ;;  %v3302_v29 = vunpack.i.l.bf16 %v3693_v23  ;;  %v3703_v30 = vpop.permute.xlu0 %3315 }
 0x11d   : > { %v3318_v54 = vunpack.i.h.bf16 %v3703_v30  ;;  %v3317_v55 = vunpack.i.l.bf16 %v3703_v30 }
 0x11e   : > { %v854_v34 = vsel %vm850_vm4, %v3302_v29, %v3303_v28  ;;  %v853_v36 = vsel %vm850_vm4, %v3273_v26, %v3302_v29  ;;  %v3288_v26 = vunpack.i.h.bf16 %v3681_v16 }
 0x11f   : > { %v3715_v39 = vpop.permute.xlu1 %3305  ;;  %v3041_v40 = vpack.c.bf16 %v854_v34, %v852_v33  ;;  %v3043_v41 = vpack.c.bf16 %v853_v36, %v851_v35  ;;  %v429_v14 = vsel %vm427_vm5, %v3317_v55, %v3318_v54  ;;  %v428_v19 = vsel %vm427_vm5, %v3282_v5, %v3317_v55 }
 0x120   : > { %v3308_v46 = vunpack.i.h.bf16 %v3715_v39  ;;  %v3307_v47 = vunpack.i.l.bf16 %v3715_v39  ;;  %v3719_v50 = vpop.permute.xlu0 %3330 }
 0x121   : > { %3042 = vmatprep.subr.bf16.mxu0 %v3041_v40  ;;  %v3333_v10 = vunpack.i.h.bf16 %v3719_v50  ;;  %v3332_v11 = vunpack.i.l.bf16 %v3719_v50  ;;  %v3762_v40 = vld [vmem:[%s4376_s1 + $0x48] sm:$0xff] }
 0x122   : > { %3044 = vmatpush1.bf16.msra.mxu0 %v3043_v41  ;;  %v856_v56 = vsel %vm850_vm4, %v3307_v47, %v3308_v46  ;;  %v855_v58 = vsel %vm850_vm4, %v3277_v43, %v3307_v47  ;;  %v3292_v41 = vunpack.i.l.bf16 %v3677_v13 }
 0x123   : > { %v3321_v59 = vpop.permute.xlu1 %3320  ;;  %v3045_v61 = vpack.c.bf16 %v858_v52, %v856_v56  ;;  %v3047_v2 = vpack.c.bf16 %v857_v53, %v855_v58  ;;  %v435_v35 = vsel %vm427_vm5, %v3332_v11, %v3333_v10  ;;  %v434_v37 = vsel %vm427_vm5, %v3288_v26, %v3332_v11 }
 0x124   : > { %v3323_v6 = vunpack.i.h.bf16 %v3321_v59  ;;  %v3322_v7 = vunpack.i.l.bf16 %v3321_v59  ;;  %v3733_v9 = vpop.permute.xlu0 %3335  ;;  %v3293_v52 = vunpack.i.h.bf16 %v3677_v13 }
 0x125   : > { %3046 = vmatprep.subr.bf16.mxu0 %v3045_v61  ;;  %v3338_v33 = vunpack.i.h.bf16 %v3733_v9  ;;  %v3337_v34 = vunpack.i.l.bf16 %v3733_v9 }
 0x126   : > { %3048 = vmatpush1.bf16.msra.mxu0 %v3047_v2  ;;  %v431_v18 = vsel %vm427_vm5, %v3322_v7, %v3323_v6  ;;  %v430_v21 = vsel %vm427_vm5, %v3283_v3, %v3322_v7  ;;  %v3017_v58 = vpack.c.bf16 %v3323_v6, %v3318_v54  ;;  %v3784_v54 = vld [vmem:[%s4376_s1 + $0x20] sm:$0xff] }
 0x127   : > { %v3326_v22 = vpop.permute.xlu1 %3325  ;;  %v3009_v24 = vpack.c.bf16 %v431_v18, %v429_v14  ;;  %v3011_v25 = vpack.c.bf16 %v430_v21, %v428_v19  ;;  %v1099_v59 = vsel %vm1098_vm7, %v3292_v41, %v3337_v34  ;;  %v1100_v61 = vsel %vm1098_vm7, %v3337_v34, %v3338_v33 }
 0x128   : > { %v3328_v29 = vunpack.i.h.bf16 %v3326_v22  ;;  %v3327_v30 = vunpack.i.l.bf16 %v3326_v22  ;;  %v3748_v32 = vpop.permute.xlu0 %3350  ;;  %v3801_v22 = vld [vmem:[%s4376_s1 + $0x50] sm:$0xff] }
 0x129   : > { %3010 = vmatprep.subr.bf16.mxu1 %v3009_v24  ;;  %2729 = vmatmul.mubr.msk.f32.vlgmr.msra.gmra.mrb[0].mxu0 %vm448_vm6, %v3744_v12  ;;  %v3353_v2 = vunpack.i.h.bf16 %v3748_v32  ;;  %v3352_v13 = vunpack.i.l.bf16 %v3748_v32  ;;  %v3806_v24 = vld [vmem:[%s4376_s1 + $0x28] sm:$0xff] }
 0x12a   : > { %3012 = vmatpush1.bf16.msra.mxu1 %v3011_v25  ;;  %v433_v36 = vsel %vm427_vm5, %v3327_v30, %v3328_v29  ;;  %v432_v16 = vsel %vm427_vm5, %v3287_v27, %v3327_v30  ;;  %953 = vmatprep.mubr.f32.mxu0 %v3519_v1  ;;  %v3021_v21 = vpack.c.bf16 %v3333_v10, %v3328_v29 }
 0x12b   : > { %v3765_v43 = vpop.permute.xlu1 %3340  ;;  %v3013_v47 = vpack.c.bf16 %v435_v35, %v433_v36  ;;  %v3015_v50 = vpack.c.bf16 %v434_v37, %v432_v16  ;;  %v1106_v25 = vsel %vm1098_vm7, %v3352_v13, %v3353_v2  ;;  %v3826_v16 = vld [vmem:[%s4376_s1 + $0x58] sm:$0xff] }
 0x12c   : > { %v3343_v53 = vunpack.i.h.bf16 %v3765_v43  ;;  %v3342_v55 = vunpack.i.l.bf16 %v3765_v43  ;;  %v3770_v56 = vpop.permute.xlu0 %3360 }
 0x12d   : > { %3014 = vmatprep.subr.bf16.mxu1 %v3013_v47  ;;  %2730 = vmatmul.mubr.msk.f32.gmra.mrb[2].mxu0 %vm448_vm6, %v3762_v40  ;;  %v2707_v47 = vld [vmem:[%s4376_s1 + $0x30] sm:$0xff] }
 0x12e   : > { %v1101_v3 = vsel %vm1098_vm7, %v3293_v52, %v3342_v55  ;;  %3016 = vmatpush1.bf16.msra.mxu1 %v3015_v50  ;;  %v1102_v5 = vsel %vm1098_vm7, %v3342_v55, %v3343_v53  ;;  %959 = vmatprep.mubr.f32.mxu0 %v3519_v1  ;;  %v3362_v50 = vunpack.i.l.bf16 %v3770_v56 }
 0x12f   : > { %v3059_v6 = vpack.c.bf16 %v1101_v3, %v1099_v59  ;;  %v3790_v7 = vpop.permute.xlu1 %3345  ;;  %3018 = vmatprep.subr.bf16.mxu1 %v3017_v58  ;;  %v3057_v11 = vpack.c.bf16 %v1102_v5, %v1100_v61 }
 0x130   : > { %v3348_v14 = vunpack.i.h.bf16 %v3790_v7  ;;  %v3347_v18 = vunpack.i.l.bf16 %v3790_v7  ;;  %v3794_v19 = vpop.permute.xlu0 %3365  ;;  %v4143_v7 = vld [vmem:[%s4376_s1 + $0xb8] sm:$0xff] }
 0x131   : > { %2709 = vmatmul.mubr.msk.f32.vlgmr.msra.gmra.mrb[0].mxu1 %vm448_vm6, %v3784_v54  ;;  %3058 = vmatprep.subr.bf16.mxu0 %v3057_v11  ;;  %v3368_v35 = vunpack.i.h.bf16 %v3794_v19  ;;  %v3367_v36 = vunpack.i.l.bf16 %v3794_v19 }
 0x132   : > { %3020 = vmatpush3.bf16.msra.mxu1 %v3017_v58  ;;  %3060 = vmatpush1.bf16.msra.mxu0 %v3059_v6  ;;  %v1104_v10 = vsel %vm1098_vm7, %v3347_v18, %v3348_v14  ;;  %v3363_v58 = vunpack.i.h.bf16 %v3770_v56  ;;  %v2708_v6 = vld [vmem:[%s4376_s1 + $0x38] sm:$0xff] }
 0x133   : > { %v3356_v26 = vpop.permute.xlu1 %3355  ;;  %3022 = vmatprep.subr.bf16.mxu1 %v3021_v21  ;;  %531 = vmatprep.mubr.f32.mxu1 %v3519_v1  ;;  %v3061_v27 = vpack.c.bf16 %v1106_v25, %v1104_v10  ;;  %v1347_v3 = vsel %vm1346_vm8, %v3362_v50, %v3367_v36  ;;  %v1348_v42 = vsel %vm1346_vm8, %v3367_v36, %v3368_v35 }
 0x134   : > { %v3358_v29 = vunpack.i.h.bf16 %v3356_v26  ;;  %v3357_v30 = vunpack.i.l.bf16 %v3356_v26  ;;  %v3815_v34 = vpop.permute.xlu0 %3380  ;;  %2731 = vmatmul.mubr.msk.f32.gmra.mrb[4].mxu0 %vm448_vm6, %v3801_v22 }
 0x135   : > { %2710 = vmatmul.mubr.msk.f32.gmra.mrb[2].mxu1 %vm448_vm6, %v3806_v24  ;;  %3062 = vmatprep.subr.bf16.mxu0 %v3061_v27  ;;  %v3382_v56 = vunpack.i.l.bf16 %v3815_v34 }
 0x136   : > { %v1103_v37 = vsel %vm1098_vm7, %v3357_v30, %v3347_v18  ;;  %v1105_v41 = vsel %vm1098_vm7, %v3358_v29, %v3352_v13  ;;  %3024 = vmatpush3.bf16.msra.mxu1 %v3021_v21  ;;  %965 = vmatprep.mubr.f32.mxu0 %v3519_v1  ;;  %v3881_v29 = vld [vmem:[%s4376_s1 + $0x68] sm:$0xff] }
 0x137   : > { %v3063_v52 = vpack.c.bf16 %v1105_v41, %v1103_v37  ;;  %v3835_v55 = vpop.permute.xlu1 %3370  ;;  %3026 = vmatprep.subr.bf16.mxu1 %v3025_v45  ;;  %537 = vmatprep.mubr.f32.mxu1 %v3519_v1  ;;  %v3383_v45 = vunpack.i.h.bf16 %v3815_v34 }
 0x138   : > { %v3373_v59 = vunpack.i.h.bf16 %v3835_v55  ;;  %v3372_v61 = vunpack.i.l.bf16 %v3835_v55  ;;  %v3844_v13 = vpop.permute.xlu0 %3390  ;;  %2732 = vmatmul.mubr.msk.f32.gmra.mrb[6].mxu0 %vm448_vm6, %v3826_v16 }
 0x139   : > { %2711 = vmatmul.mubr.msk.f32.gmra.mrb[4].mxu1 %vm448_vm6, %v2707_v47  ;;  %3064 = vmatpush1.bf16.msra.mxu0 %v3063_v52  ;;  %v1354_v36 = vsel %vm1346_vm8, %v3382_v56, %v3383_v45  ;;  %v3393_v44 = vunpack.i.h.bf16 %v3844_v13  ;;  %v3392_v0 = vunpack.i.l.bf16 %v3844_v13 }
 0x13a   : > { %v1349_v5 = vsel %vm1346_vm8, %v3363_v58, %v3372_v61  ;;  %1195 = vmatprep.mubr.f32.mxu0 %v3519_v1  ;;  %543 = vmatprep.mubr.f32.mxu1 %v3519_v1  ;;  %v1350_v11 = vsel %vm1346_vm8, %v3372_v61, %v3373_v59  ;;  %v3901_v61 = vld [vmem:[%s4376_s1 + $0x70] sm:$0xff]  ;;  %v3081_v32 = vpack.c.bf16 %v3373_v59, %v3368_v35 }
 0x13b   : > { %v3075_v18 = vpack.c.bf16 %v1349_v5, %v1347_v3  ;;  %v3869_v21 = vpop.permute.xlu1 %3375  ;;  %v3073_v10 = vpack.c.bf16 %v1350_v11, %v1348_v42 }
 0x13c   : > { %v3378_v25 = vunpack.i.h.bf16 %v3869_v21  ;;  %v3377_v26 = vunpack.i.l.bf16 %v3869_v21  ;;  %v3873_v27 = vpop.permute.xlu0 %3395  ;;  %2741 = vmatmul.mubr.msk.f32.vlgmr.msra.gmra.mrb[0].mxu0 %vm448_vm6, %v3853_v38 }
 0x13d   : > { %2712 = vmatmul.mubr.msk.f32.gmra.mrb[6].mxu1 %vm448_vm6, %v2708_v6  ;;  %3074 = vmatprep.subr.bf16.mxu0 %v3073_v10  ;;  %v3398_v3 = vunpack.i.h.bf16 %v3873_v27 }
 0x13e   : > { %3076 = vmatpush1.bf16.msra.mxu0 %v3075_v18  ;;  %1201 = vmatprep.mubr.f32.mxu0 %v3519_v1  ;;  %v1352_v30 = vsel %vm1346_vm8, %v3377_v26, %v3378_v25 }
 0x13f   : > { %v3386_v37 = vpop.permute.xlu1 %3385  ;;  %2891 = vmatprep.mubr.msk.f32.mxu1 %vm448_vm6, %v3784_v54  ;;  %v3077_v41 = vpack.c.bf16 %v1354_v36, %v1352_v30  ;;  %v3397_v54 = vunpack.i.l.bf16 %v3873_v27 }
 0x140   : > { %v3388_v50 = vunpack.i.h.bf16 %v3386_v37  ;;  %v3387_v52 = vunpack.i.l.bf16 %v3386_v37  ;;  %v3892_v58 = vpop.permute.xlu0 %3410  ;;  %2742 = vmatmul.mubr.msk.f32.gmra.mrb[2].mxu0 %vm448_vm6, %v3881_v29  ;;  %v3964_v37 = vld [vmem:[%s4376_s1 + $0x80] sm:$0xff] }
 0x141   : > { %2892 = vmatmul.mubr.msk.f32.vlgmr.msra.gmra.mrb[8].mxu1 %vm448_vm6, %v3806_v24  ;;  %3078 = vmatprep.subr.bf16.mxu0 %v3077_v41  ;;  %v4383_v49 = vunpack.i.h.bf16 %v3892_v58  ;;  %v1595_v13 = vsel %vm1594_vm9, %v3392_v0, %v3397_v54  ;;  %v3972_v41 = vld [vmem:[%s4376_s1 + $0x8] sm:$0xff] }
 0x142   : > { %v1351_v42 = vsel %vm1346_vm8, %v3387_v52, %v3377_v26  ;;  %v1353_v5 = vsel %vm1346_vm8, %v3388_v50, %v3382_v56  ;;  %3028 = vmatpush1.bf16.msra.mxu1 %v3027_v51  ;;  %1207 = vmatprep.mubr.f32.mxu0 %v3519_v1  ;;  %v3412_v51 = vunpack.i.l.bf16 %v3892_v58 }
 0x143   : > { %v3079_v24 = vpack.c.bf16 %v1353_v5, %v1351_v42  ;;  %3030 = vmatprep.subr.bf16.mxu1 %v3029_v63  ;;  %v3914_v11 = vpop.permute.xlu1 %3400  ;;  %2894 = vmatprep.mubr.msk.f32.mxu1 %vm448_vm6, %v2707_v47  ;;  %v1596_v63 = vsel %vm1594_vm9, %v3397_v54, %v3398_v3 }
 0x144   : > { %v4385_v18 = vunpack.i.h.bf16 %v3914_v11  ;;  %v3402_v56 = vunpack.i.l.bf16 %v3914_v11  ;;  %v3919_v10 = vpop.permute.xlu0 %3420  ;;  %2743 = vmatmul.mubr.msk.f32.gmra.mrb[4].mxu0 %vm448_vm6, %v3901_v61  ;;  %v1602_v52 = vsel %vm1594_vm9, %v3412_v51, %v4383_v49 }
 0x145   : > { %2895 = vmatmul.mubr.msk.f32.gmra.mrb[10].mxu1 %vm448_vm6, %v2708_v6  ;;  %3080 = vmatpush1.bf16.msra.mxu0 %v3079_v24 }
 0x146   : > { %3032 = vmatpush1.bf16.msra.mxu1 %v3031_v4  ;;  %1213 = vmatprep.mubr.f32.mxu0 %v3519_v1  ;;  %v1598_v47 = vsel %vm1594_vm9, %v3402_v56, %v4385_v18  ;;  %v1597_v4 = vsel %vm1594_vm9, %v3393_v44, %v3402_v56  ;;  %v3049_v44 = vpack.c.bf16 %v3303_v28, %v3298_v20  ;;  %v384_v20 = vld [vmem:[%s4376_s1 + $0x10] sm:$0xff] }
 0x147   : > { %3034 = vmatprep.subr.bf16.mxu1 %v3634_v57  ;;  %v3948_v6 = vpop.permute.xlu1 %3405  ;;  %711 = vmatprep.mubr.f32.mxu1 %v3519_v1  ;;  %v3089_v62 = vpack.c.bf16 %v1598_v47, %v1596_v63  ;;  %v3091_v42 = vpack.c.bf16 %v1597_v4, %v1595_v13  ;;  %v3995_v63 = vld [vmem:[%s4376_s1 + $0x88] sm:$0xff]  ;;  %v3053_v18 = vpack.c.bf16 %v3313_v31, %v3308_v46 }
 0x148   : > { %v4384_v26 = vunpack.i.h.bf16 %v3948_v6  ;;  %v3407_v30 = vunpack.i.l.bf16 %v3948_v6  ;;  %v3955_v36 = vpop.permute.xlu0 %3425  ;;  %2744 = vmatmul.mubr.msk.f32.gmra.mrb[6].mxu0 %vm448_vm6, %v3928_v48 }
 0x149   : > { %2717 = vmatmul.mubr.msk.f32.vlgmr.msra.gmra.mrb[0].mxu1 %vm448_vm6, %v3939_v60  ;;  %3090 = vmatprep.subr.bf16.mxu0 %v3089_v62  ;;  %v4382_v47 = vunpack.i.h.bf16 %v3955_v36  ;;  %v3427_v62 = vunpack.i.l.bf16 %v3955_v36 }
 0x14a   : > { %3036 = vmatpush3.bf16.msra.mxu1 %v3634_v57  ;;  %1443 = vmatprep.mubr.f32.mxu0 %v3519_v1  ;;  %v1600_v50 = vsel %vm1594_vm9, %v3407_v30, %v4384_v26 }
 0x14b   : > { %3038 = vmatprep.subr.bf16.mxu1 %v3658_v8  ;;  %v3416_v54 = vpop.permute.xlu1 %3415  ;;  %717 = vmatprep.mubr.f32.mxu1 %v3519_v1  ;;  %v3093_v57 = vpack.c.bf16 %v1602_v52, %v1600_v50  ;;  %v1844_v50 = vsel %vm1842_vm10, %v3427_v62, %v4382_v47 }
 0x14c   : > { %v3418_v5 = vunpack.i.h.bf16 %v3416_v54  ;;  %v3417_v24 = vunpack.i.l.bf16 %v3416_v54  ;;  %v3982_v56 = vpop.permute.xlu0 %3440  ;;  %2753 = vmatmul.mubr.msk.f32.vlgmr.msra.gmra.mrb[0].mxu0 %vm448_vm6, %v3964_v37 }
 0x14d   : > { %3092 = vmatpush1.bf16.msra.mxu0 %v3091_v42  ;;  %2718 = vmatmul.mubr.msk.f32.gmra.mrb[2].mxu1 %vm448_vm6, %v3972_v41 }
 0x14e   : > { %v1599_v0 = vsel %vm1594_vm9, %v3417_v24, %v3407_v30  ;;  %v1601_v15 = vsel %vm1594_vm9, %v3418_v5, %v3412_v51  ;;  %3040 = vmatpush3.bf16.msra.mxu1 %v3658_v8  ;;  %3094 = vmatprep.subr.bf16.mxu0 %v3093_v57  ;;  %v4019_v8 = vld [vmem:[%s4376_s1 + $0x90] sm:$0xff]  ;;  %v385_v51 = vld [vmem:[%s4376_s1 + $0x18] sm:$0xff] }
 0x14f   : > { %v3095_v23 = vpack.c.bf16 %v1601_v15, %v1599_v0  ;;  %3050 = vmatprep.subr.bf16.mxu1 %v3049_v44  ;;  %v4005_v28 = vpop.permute.xlu1 %3430  ;;  %1449 = vmatprep.mubr.f32.mxu0 %v3519_v1  ;;  %v4042_v24 = vld [vmem:[%s4376_s1 + $0x98] sm:$0xff]  ;;  %v3423_v0 = vunpack.i.h.bf16 %v3919_v10  ;;  %v3443_v15 = vunpack.i.h.bf16 %v3982_v56 }
 0x150   : > { %v4381_v4 = vunpack.i.h.bf16 %v4005_v28  ;;  %v3432_v30 = vunpack.i.l.bf16 %v4005_v28  ;;  %v4010_v13 = vpop.permute.xlu0 %3450  ;;  %723 = vmatprep.mubr.f32.mxu1 %v3519_v1  ;;  %2754 = vmatmul.mubr.msk.f32.gmra.mrb[2].mxu0 %vm448_vm6, %v3995_v63 }
 0x151   : > { %2719 = vmatmul.mubr.msk.f32.gmra.mrb[4].mxu1 %vm448_vm6, %v384_v20  ;;  %3096 = vmatpush1.bf16.msra.mxu0 %v3095_v23  ;;  %v3442_v23 = vunpack.i.l.bf16 %v3982_v56 }
 0x152   : > { %1455 = vmatprep.mubr.f32.mxu0 %v3519_v1  ;;  %729 = vmatprep.mubr.f32.mxu1 %v3519_v1  ;;  %v1846_v52 = vsel %vm1842_vm10, %v3432_v30, %v4381_v4  ;;  %v1845_v4 = vsel %vm1842_vm10, %v3423_v0, %v3432_v30 }
 0x153   : > { %v4032_v42 = vpop.permute.xlu1 %3435  ;;  %v3105_v54 = vpack.c.bf16 %v1846_v52, %v1844_v50  ;;  %v3422_v52 = vunpack.i.l.bf16 %v3919_v10  ;;  %v4069_v10 = vld [vmem:[%s4376_s1 + $0xa0] sm:$0xff]  ;;  %v1850_v17 = vsel %vm1842_vm10, %v3442_v23, %v3443_v15 }
 0x154   : > { %v3438_v57 = vunpack.i.h.bf16 %v4032_v42  ;;  %v3437_v5 = vunpack.i.l.bf16 %v4032_v42  ;;  %2755 = vmatmul.mubr.msk.f32.gmra.mrb[4].mxu0 %vm448_vm6, %v4019_v8  ;;  %v4047_v50 = vpop.permute.xlu0 %3455 }
 0x155   : > { %2720 = vmatmul.mubr.msk.f32.gmra.mrb[6].mxu1 %vm448_vm6, %v385_v51  ;;  %3106 = vmatprep.subr.bf16.mxu0 %v3105_v54  ;;  %v3458_v30 = vunpack.i.h.bf16 %v4047_v50  ;;  %v3457_v0 = vunpack.i.l.bf16 %v4047_v50 }
 0x156   : > { %1461 = vmatprep.mubr.f32.mxu0 %v3519_v1  ;;  %2905 = vmatprep.mubr.msk.f32.mxu1 %vm448_vm6, %v3939_v60  ;;  %v1848_v26 = vsel %vm1842_vm10, %v3437_v5, %v3438_v57  ;;  %v1843_v60 = vsel %vm1842_vm10, %v3422_v52, %v3427_v62 }
 0x157   : > { %v3446_v54 = vpop.permute.xlu1 %3445  ;;  %v3107_v31 = vpack.c.bf16 %v1845_v4, %v1843_v60  ;;  %v3109_v46 = vpack.c.bf16 %v1850_v17, %v1848_v26  ;;  %v3065_v4 = vpack.c.bf16 %v3343_v53, %v3338_v33  ;;  %v2092_v26 = vsel %vm2090_vm11, %v3457_v0, %v3458_v30 }
 0x158   : > { %v3448_v47 = vunpack.i.h.bf16 %v3446_v54  ;;  %v3447_v49 = vunpack.i.l.bf16 %v3446_v54  ;;  %2756 = vmatmul.mubr.msk.f32.gmra.mrb[6].mxu0 %vm448_vm6, %v4042_v24  ;;  %v4082_v52 = vpop.permute.xlu0 %3470 }
 0x159   : > { %2906 = vmatmul.mubr.msk.f32.vlgmr.msra.gmra.mrb[8].mxu1 %vm448_vm6, %v3972_v41  ;;  %1691 = vmatprep.mubr.f32.mxu0 %v3519_v1  ;;  %v3473_v19 = vunpack.i.h.bf16 %v4082_v52 }
 0x15a   : > { %3052 = vmatpush3.bf16.msra.mxu1 %v3049_v44  ;;  %2908 = vmatprep.mubr.msk.f32.mxu1 %vm448_vm6, %v384_v20  ;;  %v1847_v41 = vsel %vm1842_vm10, %v3447_v49, %v3437_v5  ;;  %v1849_v62 = vsel %vm1842_vm10, %v3448_v47, %v3442_v23  ;;  %v4096_v49 = vld [vmem:[%s4376_s1 + $0xa8] sm:$0xff]  ;;  %v4122_v47 = vld [vmem:[%s4376_s1 + $0xb0] sm:$0xff] }
 0x15b   : > { %3054 = vmatprep.subr.bf16.mxu1 %v3053_v18  ;;  %v4078_v39 = vpop.permute.xlu1 %3460  ;;  %v3111_v33 = vpack.c.bf16 %v1849_v62, %v1847_v41  ;;  %v4198_v62 = vld [vmem:[%s4376_s1 + $0xc8] sm:$0xff] }
 0x15c   : > { %v3463_v44 = vunpack.i.h.bf16 %v4078_v39  ;;  %v3462_v20 = vunpack.i.l.bf16 %v4078_v39  ;;  %2765 = vmatmul.mubr.msk.f32.vlgmr.msra.gmra.mrb[0].mxu0 %vm448_vm6, %v4069_v10 }
 0x15d   : > { %3108 = vmatpush1.bf16.msra.mxu0 %v3107_v31  ;;  %2909 = vmatmul.mubr.msk.f32.gmra.mrb[10].mxu1 %vm448_vm6, %v385_v51  ;;  %v4124_v51 = vpop.permute.xlu0 %3480 }
 0x15e   : > { %3056 = vmatpush3.bf16.msra.mxu1 %v3053_v18  ;;  %3110 = vmatprep.subr.bf16.mxu0 %v3109_v46  ;;  %v2094_v9 = vsel %vm2090_vm11, %v3462_v20, %v3463_v44  ;;  %v3069_v18 = vpack.c.bf16 %v3353_v2, %v3348_v14  ;;  %v3453_v14 = vunpack.i.h.bf16 %v4010_v13 }
 0x15f   : > { %3066 = vmatprep.subr.bf16.mxu1 %v3065_v4  ;;  %v4106_v43 = vpop.permute.xlu1 %3465  ;;  %1697 = vmatprep.mubr.f32.mxu0 %v3519_v1  ;;  %v3121_v53 = vpack.c.bf16 %v2094_v9, %v2092_v26  ;;  %v4388_v26 = vunpack.i.h.bf16 %v3892_v58  ;;  %v4389_v58 = vunpack.i.h.bf16 %v3955_v36 }
 0x160   : > { %2919 = vmatprep.mubr.msk.f32.mxu1 %vm448_vm6, %v3744_v12  ;;  %2766 = vmatmul.mubr.msk.f32.gmra.mrb[2].mxu0 %vm448_vm6, %v4096_v49  ;;  %v3467_v2 = vunpack.i.l.bf16 %v4106_v43  ;;  %v2093_v55 = vsel %vm2090_vm11, %v3453_v14, %v3462_v20 }
 0x161   : > { %3112 = vmatpush1.bf16.msra.mxu0 %v3111_v33  ;;  %2920 = vmatmul.mubr.msk.f32.vlgmr.msra.gmra.mrb[8].mxu1 %vm448_vm6, %v3762_v40  ;;  %v3468_v40 = vunpack.i.h.bf16 %v4106_v43  ;;  %v4154_v59 = vpop.permute.xlu0 %3485  ;;  %v2775_v33 = vld [vmem:[%s4376_s1 + $0xd0] sm:$0xff]  ;;  %v2797_v43 = vld [vmem:[%s4376_s1 + $0x100] sm:$0xff] }
 0x162   : > { %3068 = vmatpush3.bf16.msra.mxu1 %v3065_v4  ;;  %3122 = vmatprep.subr.bf16.mxu0 %v3121_v53 }
 0x163   : > { %3070 = vmatprep.subr.bf16.mxu1 %v3069_v18  ;;  %v3476_v12 = vpop.permute.xlu1 %3475  ;;  %1703 = vmatprep.mubr.f32.mxu0 %v3519_v1  ;;  %v2096_v21 = vsel %vm2090_vm11, %v3467_v2, %v3468_v40  ;;  %v3133_v50 = vpack.c.bf16 %v3473_v19, %v3468_v40  ;;  %v2798_v40 = vld [vmem:[%s4376_s1 + $0x108] sm:$0xff] }
 0x164   : > { %2922 = vmatprep.mubr.msk.f32.mxu1 %vm448_vm6, %v3801_v22  ;;  %2767 = vmatmul.mubr.msk.f32.gmra.mrb[4].mxu0 %vm448_vm6, %v4122_v47  ;;  %v3472_v22 = vunpack.i.l.bf16 %v4082_v52  ;;  %v3478_v5 = vunpack.i.h.bf16 %v3476_v12  ;;  %v3477_v23 = vunpack.i.l.bf16 %v3476_v12  ;;  %v2788_v52 = vld [vmem:[%s4376_s1 + $0xf8] sm:$0xff] }
 0x165   : > { %2923 = vmatmul.mubr.msk.f32.gmra.mrb[10].mxu1 %vm448_vm6, %v3826_v16  ;;  %1709 = vmatprep.mubr.f32.mxu0 %v3519_v1  ;;  %v3452_v16 = vunpack.i.l.bf16 %v4010_v13  ;;  %v4170_v13 = vld [vmem:[%s4376_s1 + $0xc0] sm:$0xff] }
 0x166   : > { %3072 = vmatpush3.bf16.msra.mxu1 %v3069_v18  ;;  %2933 = vmatprep.mubr.msk.f32.mxu1 %vm448_vm6, %v3853_v38  ;;  %v3085_v38 = vpack.c.bf16 %v3383_v45, %v3378_v25  ;;  %v3488_v25 = vunpack.i.h.bf16 %v4154_v59  ;;  %v2098_v17 = vsel %vm2090_vm11, %v3472_v22, %v3473_v19  ;;  %v2095_v31 = vsel %vm2090_vm11, %v3477_v23, %v3467_v2  ;;  %v2800_v19 = vld [vmem:[%s4376_s1 + $0x118] sm:$0xff] }
 0x167   : > { %3082 = vmatprep.subr.bf16.mxu1 %v3081_v32  ;;  %v4150_v35 = vpop.permute.xlu1 %3490  ;;  %v2091_v34 = vsel %vm2090_vm11, %v3452_v16, %v3457_v0  ;;  %v2097_v46 = vsel %vm2090_vm11, %v3478_v5, %v3472_v22  ;;  %v3125_v0 = vpack.c.bf16 %v2098_v17, %v2096_v21  ;;  %v3482_v2 = vunpack.i.l.bf16 %v4124_v51 }
 0x168   : > { %2768 = vmatmul.mubr.msk.f32.gmra.mrb[6].mxu0 %vm448_vm6, %v4143_v7  ;;  %v3493_v54 = vunpack.i.h.bf16 %v4150_v35  ;;  %v3492_v60 = vunpack.i.l.bf16 %v4150_v35  ;;  %v3123_v45 = vpack.c.bf16 %v2093_v55, %v2091_v34  ;;  %v3127_v4 = vpack.c.bf16 %v2097_v46, %v2095_v31  ;;  %v2593_v31 = vld [vmem:[%s4335_s25] sm:$0xff] }
 0x169   : > { %2934 = vmatmul.mubr.msk.f32.vlgmr.msra.gmra.mrb[8].mxu1 %vm448_vm6, %v3881_v29  ;;  %1939 = vmatprep.mubr.f32.mxu0 %v3519_v1  ;;  %v3487_v29 = vunpack.i.l.bf16 %v4154_v59  ;;  %v3117_v16 = vpack.c.bf16 %v3443_v15, %v3438_v57  ;;  %v3129_v5 = vpack.c.bf16 %v3463_v44, %v3458_v30  ;;  %v2787_v30 = vld [vmem:[%s4376_s1 + $0xf0] sm:$0xff] }
 0x16a   : > { %3084 = vmatpush3.bf16.msra.mxu1 %v3081_v32  ;;  %2936 = vmatprep.mubr.msk.f32.mxu1 %vm448_vm6, %v3901_v61  ;;  %v4386_v61 = vunpack.i.h.bf16 %v3914_v11  ;;  %v2342_v20 = vsel %vm2338_vm12, %v3492_v60, %v3493_v54  ;;  %v3483_v32 = vunpack.i.h.bf16 %v4124_v51  ;;  %v3145_v39 = vpack.c.bf16 %v3493_v54, %v3488_v25 }
 0x16b   : > { %3086 = vmatprep.subr.bf16.mxu1 %v3085_v38  ;;  %v4203_v27 = vpop.permute.xlu1 %3495  ;;  %v2339_v55 = vsel %vm2338_vm12, %v3482_v2, %v3487_v29 }
 0x16c   : > { %2777 = vmatmul.mubr.msk.f32.vlgmr.msra.gmra.mrb[0].mxu0 %vm448_vm6, %v4170_v13  ;;  %v3097_v41 = vpack.c.bf16 %v4386_v61, %v3398_v3  ;;  %v2340_v3 = vsel %vm2338_vm12, %v3487_v29, %v3488_v25  ;;  %v3498_v53 = vunpack.i.h.bf16 %v4203_v27  ;;  %v3497_v18 = vunpack.i.l.bf16 %v4203_v27 }
 0x16d   : > { %3124 = vmatpush1.bf16.msra.mxu0 %v3123_v45  ;;  %2937 = vmatmul.mubr.msk.f32.gmra.mrb[10].mxu1 %vm448_vm6, %v3928_v48  ;;  %v3137_v11 = vpack.c.bf16 %v2342_v20, %v2340_v3  ;;  %v4387_v48 = vunpack.i.h.bf16 %v3948_v6  ;;  %v4390_v6 = vunpack.i.h.bf16 %v4005_v28 }
 0x16e   : > { %3088 = vmatpush3.bf16.msra.mxu1 %v3085_v38  ;;  %3126 = vmatprep.subr.bf16.mxu0 %v3125_v0  ;;  %v2344_v51 = vsel %vm2338_vm12, %v3497_v18, %v3498_v53  ;;  %v2594_v0 = vld [vmem:[%s4335_s25 + $0x8] sm:$0xff] }
 0x16f   : > { %3098 = vmatprep.subr.bf16.mxu1 %v3097_v41  ;;  %1945 = vmatprep.mubr.f32.mxu0 %v3519_v1  ;;  %v3101_v9 = vpack.c.bf16 %v4388_v26, %v4387_v48  ;;  %v3506_v12 = vpop.permute.xlu1 %3505  ;;  %v2596_v26 = vld [vmem:[%s4335_s25 + $0x18] sm:$0xff] }
 0x170   : > { %2947 = vmatprep.mubr.msk.f32.mxu1 %vm448_vm6, %v3964_v37  ;;  %2778 = vmatmul.mubr.msk.f32.gmra.mrb[2].mxu0 %vm448_vm6, %v4198_v62  ;;  %v4223_v37 = vpop.permute.xlu0 %3500  ;;  %v3508_v14 = vunpack.i.h.bf16 %v3506_v12  ;;  %v3507_v22 = vunpack.i.l.bf16 %v3506_v12 }
 0x171   : > { %3128 = vmatpush1.bf16.msra.mxu0 %v3127_v4  ;;  %2948 = vmatmul.mubr.msk.f32.vlgmr.msra.gmra.mrb[8].mxu1 %vm448_vm6, %v3995_v63  ;;  %v3113_v63 = vpack.c.bf16 %v4390_v6, %v4389_v58  ;;  %v3503_v36 = vunpack.i.h.bf16 %v4223_v37  ;;  %v3502_v28 = vunpack.i.l.bf16 %v4223_v37  ;;  %v2595_v58 = vld [vmem:[%s4335_s25 + $0x10] sm:$0xff] }
 0x172   : > { %3100 = vmatpush3.bf16.msra.mxu1 %v3097_v41  ;;  %3138 = vmatprep.subr.bf16.mxu0 %v3137_v11  ;;  %v2343_v57 = vsel %vm2338_vm12, %v3507_v22, %v3497_v18  ;;  %v2598_v11 = vld [vmem:[%s4335_s25 + $0x28] sm:$0xff] }
 0x173   : > { %3102 = vmatprep.subr.bf16.mxu1 %v3101_v9  ;;  %1951 = vmatprep.mubr.f32.mxu0 %v3519_v1  ;;  %v2346_v56 = vsel %vm2338_vm12, %v3502_v28, %v3503_v36  ;;  %v2345_v15 = vsel %vm2338_vm12, %v3508_v14, %v3502_v28  ;;  %v3149_v44 = vpack.c.bf16 %v3503_v36, %v3498_v53 }
 0x174   : > { %2950 = vmatprep.mubr.msk.f32.mxu1 %vm448_vm6, %v4019_v8  ;;  %2779 = vmatmul.mubr.msk.f32.gmra.mrb[4].mxu0 %vm448_vm6, %v2775_v33  ;;  %v2776_v8 = vld [vmem:[%s4376_s1 + $0xd8] sm:$0xff]  ;;  %v3143_v23 = vpack.c.bf16 %v2345_v15, %v2343_v57  ;;  %v2601_v57 = vld [vmem:[%s4335_s25 + $0x40] sm:$0xff] }
 0x175   : > { %2951 = vmatmul.mubr.msk.f32.gmra.mrb[10].mxu1 %vm448_vm6, %v4042_v24  ;;  %1957 = vmatprep.mubr.f32.mxu0 %v3519_v1  ;;  %v2341_v24 = vsel %vm2338_vm12, %v3483_v32, %v3492_v60  ;;  %v2564_v45 = vpop.permute.xlu0 %2563  ;;  %v2600_v15 = vld [vmem:[%s4335_s25 + $0x38] sm:$0xff] }
 0x176   : > { %3104 = vmatpush3.bf16.msra.mxu1 %v3101_v9  ;;  %2961 = vmatprep.mubr.msk.f32.mxu1 %vm448_vm6, %v4069_v10  ;;  %v2785_v10 = vld [vmem:[%s4376_s1 + $0xe0] sm:$0xff]  ;;  %v3139_v42 = vpack.c.bf16 %v2341_v24, %v2339_v55 }
 0x177   : > { %3114 = vmatprep.subr.bf16.mxu1 %v3113_v63 }
 0x178   : > { %2780 = vmatmul.mubr.msk.f32.gmra.mrb[6].mxu0 %vm448_vm6, %v2776_v8 }
 0x179   : > { %2962 = vmatmul.mubr.msk.f32.vlgmr.msra.gmra.mrb[8].mxu1 %vm448_vm6, %v4096_v49  ;;  %2187 = vmatprep.mubr.f32.mxu0 %v3519_v1  ;;  %v3141_v49 = vpack.c.bf16 %v2346_v56, %v2344_v51  ;;  %v2579_v18 = vpop.permute.xlu0 %2578 }
 0x17a   : > { %3116 = vmatpush3.bf16.msra.mxu1 %v3113_v63  ;;  %2964 = vmatprep.mubr.msk.f32.mxu1 %vm448_vm6, %v4122_v47  ;;  %v2786_v47 = vld [vmem:[%s4376_s1 + $0xe8] sm:$0xff]  ;;  %v2597_v63 = vld [vmem:[%s4335_s25 + $0x20] sm:$0xff] }
 0x17b   : > { %3118 = vmatprep.subr.bf16.mxu1 %v3117_v16 }
 0x17c   : > { %2789 = vmatmul.mubr.msk.f32.vlgmr.msra.gmra.mrb[0].mxu0 %vm448_vm6, %v2785_v10 }
 0x17d   : > { %3140 = vmatpush1.bf16.msra.mxu0 %v3139_v42  ;;  %2965 = vmatmul.mubr.msk.f32.gmra.mrb[10].mxu1 %vm448_vm6, %v4143_v7  ;;  %v2799_v7 = vld [vmem:[%s4376_s1 + $0x110] sm:$0xff] }
 0x17e   : > { %3120 = vmatpush3.bf16.msra.mxu1 %v3117_v16  ;;  %3142 = vmatprep.subr.bf16.mxu0 %v3141_v49  ;;  %v2604_v16 = vld [vmem:[%s4335_s25 + $0x58] sm:$0xff]  ;;  %v2599_v42 = vld [vmem:[%s4335_s25 + $0x30] sm:$0xff] }
 0x17f   : > { %3130 = vmatprep.subr.bf16.mxu1 %v3129_v5  ;;  %2193 = vmatprep.mubr.f32.mxu0 %v3519_v1 }
 0x180   : > { %2975 = vmatprep.mubr.msk.f32.mxu1 %vm448_vm6, %v4170_v13  ;;  %2790 = vmatmul.mubr.msk.f32.gmra.mrb[2].mxu0 %vm448_vm6, %v2786_v47  ;;  %v2569_v46 = vpop.permute.xlu1 %2568 }
 0x181   : > { %3144 = vmatpush1.bf16.msra.mxu0 %v3143_v23  ;;  %2976 = vmatmul.mubr.msk.f32.vlgmr.msra.gmra.mrb[8].mxu1 %vm448_vm6, %v4198_v62 }
 0x182   : > { %3132 = vmatpush3.bf16.msra.mxu1 %v3129_v5  ;;  %2199 = vmatprep.mubr.f32.mxu0 %v3519_v1 }
 0x183   : > { %3134 = vmatprep.subr.bf16.mxu1 %v3133_v50  ;;  %2978 = vmatprep.mubr.msk.f32.mxu1 %vm448_vm6, %v2775_v33 }
 0x184   : > { %2791 = vmatmul.mubr.msk.f32.gmra.mrb[4].mxu0 %vm448_vm6, %v2787_v30  ;;  %v2574_v36 = vpop.permute.xlu1 %2573 }
 0x185   : > { %2979 = vmatmul.mubr.msk.f32.gmra.mrb[10].mxu1 %vm448_vm6, %v2776_v8  ;;  %2205 = vmatprep.mubr.f32.mxu0 %v3519_v1 }
 0x186   : > { %3136 = vmatpush3.bf16.msra.mxu1 %v3133_v50  ;;  %2989 = vmatprep.mubr.msk.f32.mxu1 %vm448_vm6, %v2785_v10 }
 0x187   : > { %3146 = vmatprep.subr.bf16.mxu1 %v3145_v39 }
 0x188   : > { %2792 = vmatmul.mubr.msk.f32.gmra.mrb[6].mxu0 %vm448_vm6, %v2788_v52 }
 0x189   : > { %2990 = vmatmul.mubr.msk.f32.vlgmr.msra.gmra.mrb[8].mxu1 %vm448_vm6, %v2786_v47  ;;  %2435 = vmatprep.mubr.f32.mxu0 %v3519_v1 }
 0x18a   : > { %3148 = vmatpush3.bf16.msra.mxu1 %v3145_v39  ;;  %2992 = vmatprep.mubr.msk.f32.mxu1 %vm448_vm6, %v2787_v30 }
 0x18b   : > { %3150 = vmatprep.subr.bf16.mxu1 %v3149_v44 }
 0x18c   : > { %2801 = vmatmul.mubr.msk.f32.vlgmr.msra.gmra.mrb[0].mxu0 %vm448_vm6, %v2797_v43 }
 0x18d   : > { %2993 = vmatmul.mubr.msk.f32.gmra.mrb[10].mxu1 %vm448_vm6, %v2788_v52  ;;  %2441 = vmatprep.mubr.f32.mxu0 %v3519_v1 }
 0x18e   : > { %3152 = vmatpush3.bf16.msra.mxu1 %v3149_v44  ;;  %3003 = vmatprep.mubr.msk.f32.mxu1 %vm448_vm6, %v2797_v43 }
 0x190   : > { %2802 = vmatmul.mubr.msk.f32.gmra.mrb[2].mxu0 %vm448_vm6, %v2798_v40 }
 0x191   : > { %3004 = vmatmul.mubr.msk.f32.vlgmr.msra.gmra.mrb[8].mxu1 %vm448_vm6, %v2798_v40  ;;  %2447 = vmatprep.mubr.f32.mxu0 %v3519_v1  ;;  %v2602_v40 = vld [vmem:[%s4335_s25 + $0x48] sm:$0xff] }
 0x192   : > { %3006 = vmatprep.mubr.msk.f32.mxu1 %vm448_vm6, %v2799_v7 }
 0x194   : > { %2803 = vmatmul.mubr.msk.f32.gmra.mrb[4].mxu0 %vm448_vm6, %v2799_v7 }
 0x195   : > { %3007 = vmatmul.mubr.msk.f32.gmra.mrb[10].mxu1 %vm448_vm6, %v2800_v19  ;;  %2453 = vmatprep.mubr.f32.mxu0 %v3519_v1 }
 0x198   : > { %2804 = vmatmul.mubr.msk.f32.gmra.mrb[6].mxu0 %vm448_vm6, %v2800_v19 }
 0x21c   : > { %v713_v35 = vpop.f32.mrb[0].mxu1 }
 0x21d   : > { %v715_v59 = vpop.f32.mrb[1].mxu1 }
 0x220   : > { %v719_v38 = vpop.f32.mrb[2].mxu1 }
 0x221   : > { %v721_v54 = vpop.f32.mrb[3].mxu1 }
 0x224   : > { %v725_v60 = vpop.f32.mrb[4].mxu1 }
 0x225   : > { %v727_v13 = vpop.f32.mrb[5].mxu1 }
 0x228   : > { %v731_v21 = vpop.f32.mrb[6].mxu1 }
 0x229   : > { %v4329_v34 = vpop.f32.mrb[7].mxu1 }
 0x25f   : > { %v2437_v1 = vpop.f32.mrb[0].mxu0 }
 0x260   : > { %v3153_v25 = vadd.f32 %v2437_v1, %v713_v35  ;;  %v2439_v29 = vpop.f32.mrb[1].mxu0  ;;  %v2603_v35 = vld [vmem:[%s4335_s25 + $0x50] sm:$0xff] }
 0x261   : > { %v3154_v17 = vadd.f32 %v2439_v29, %v715_v59 }
 0x262   : > { %v2581_v61 = vadd.f32 %v3153_v25, %v2564_v45 }
 0x263   : > { %v2582_v41 = vadd.f32 %v3154_v17, %v2564_v45  ;;  %v2443_v62 = vpop.f32.mrb[2].mxu0 }
 0x264   : > { %v2605_v20 = vadd.f32 %v2593_v31, %v2581_v61  ;;  %v3155_v4 = vadd.f32 %v2443_v62, %v719_v38  ;;  %v2445_v27 = vpop.f32.mrb[3].mxu0  ;;  %v3005_v3 = vpop.f32.mrb[8].mxu1 }
 0x265   : > { %v2606_v48 = vadd.f32 %v2594_v0, %v2582_v41  ;;  %v3156_v9 = vadd.f32 %v2445_v27, %v721_v54  ;;  %v2586_v33 = vadd.f32 %v3005_v3, %v2569_v46  ;;  %v2526_v37 = vpop.f32.mrb[9].mxu1 }
 0x266   : > { %2617 = vst [vmem:[%s4343_s28] sm:$0xff] %v2605_v20  ;;  %v2584_v6 = vadd.f32 %v3155_v4, %v2569_v46  ;;  %v2583_v53 = vadd.f32 %v2564_v45, %v2526_v37 }
 0x267   : > { %2618 = vst [vmem:[%s4343_s28 + $0x8] sm:$0xff] %v2606_v48  ;;  %v2585_v12 = vadd.f32 %v3156_v9, %v2569_v46  ;;  %v2610_v8 = vadd.f32 %v2598_v11, %v2586_v33  ;;  %v2449_v32 = vpop.f32.mrb[4].mxu0 }
 0x268   : > { %v2608_v28 = vadd.f32 %v2596_v26, %v2584_v6  ;;  %v2607_v2 = vadd.f32 %v2595_v58, %v2583_v53  ;;  %v3157_v24 = vadd.f32 %v2449_v32, %v725_v60  ;;  %v2451_v14 = vpop.f32.mrb[5].mxu0  ;;  %v3008_v22 = vpop.f32.mrb[10].mxu1 }
 0x269   : > { %v2609_v10 = vadd.f32 %v2597_v63, %v2585_v12  ;;  %2623 = vst.msk [vmem:[%s4343_s28 + $0x28] sm:$0xff] %vm2619_vm13, %v2610_v8  ;;  %v3158_v51 = vadd.f32 %v2451_v14, %v727_v13  ;;  %v2592_v55 = vadd.f32 %v3008_v22, %v2579_v18  ;;  %v2536_v56 = vpop.f32.mrb[11].mxu1 }
 0x26a   : > { %2621 = vst [vmem:[%s4343_s28 + $0x18] sm:$0xff] %v2608_v28  ;;  %2620 = vst.msk [vmem:[%s4343_s28 + $0x10] sm:$0xff] %vm2619_vm13, %v2607_v2  ;;  %v2587_v49 = vadd.f32 %v3157_v24, %v2574_v36  ;;  %v2589_v5 = vadd.f32 %v2574_v36, %v2536_v56 }
 0x26b   : > { %2622 = vst [vmem:[%s4343_s28 + $0x20] sm:$0xff] %v2609_v10  ;;  %v2616_v47 = vadd.f32 %v2604_v16, %v2592_v55  ;;  %v2588_v23 = vadd.f32 %v3158_v51, %v2574_v36  ;;  %v2455_v50 = vpop.f32.mrb[6].mxu0 }
 0x26c   : > { %v2611_v30 = vadd.f32 %v2599_v42, %v2587_v49  ;;  %v2613_v39 = vadd.f32 %v2601_v57, %v2589_v5  ;;  %v3159_v52 = vadd.f32 %v2455_v50, %v731_v21  ;;  %v2457_v44 = vpop.f32.mrb[7].mxu0 }
 0x26d   : > { %2629 = vst.msk [vmem:[%s4343_s28 + $0x58] sm:$0xff] %vm2619_vm13, %v2616_v47  ;;  %v2612_v43 = vadd.f32 %v2600_v15, %v2588_v23  ;;  %v3160_v7 = vadd.f32 %v2457_v44, %v4329_v34 }
 0x26e   : > { %2624 = vst [vmem:[%s4343_s28 + $0x30] sm:$0xff] %v2611_v30  ;;  %2626 = vst.msk [vmem:[%s4343_s28 + $0x40] sm:$0xff] %vm2619_vm13, %v2613_v39  ;;  %v2590_v19 = vadd.f32 %v3159_v52, %v2579_v18 }
 0x26f   : > { %2625 = vst [vmem:[%s4343_s28 + $0x38] sm:$0xff] %v2612_v43  ;;  %v2591_v59 = vadd.f32 %v3160_v7, %v2579_v18 }
 0x270   : > { %v2614_v38 = vadd.f32 %v2602_v40, %v2590_v19 }
 0x271   : > { %v2615_v54 = vadd.f32 %v2603_v35, %v2591_v59 }
 0x272   : > { %2627 = vst [vmem:[%s4343_s28 + $0x48] sm:$0xff] %v2614_v38 }
 0x273   : > { %2628 = vst [vmem:[%s4343_s28 + $0x50] sm:$0xff] %v2615_v54 }
 0x274 PF: > { %s15_s18 = sadd.s32 1, %s3517_s18  }
 0x275   : > { %p12_p4 = scmp.ge.s32.totalorder %s15_s18, 4  }
 0x277   :  { %14 = sbr.rel (!%p12_p4) target bundleno = 1 (0x1), region = 81 }

</bundles_post_ra>
